<compile_context>
chip_gen: v5e
topology: v5e:2x2
jax: 0.10.0
libtpu: 0.0.40
codegen_flags: <defaults>
</compile_context>

<pallas_src>
import functools

import jax
import jax.numpy as jnp
from jax import lax
from jax.experimental import pallas as pl
from jax.experimental.pallas import tpu as pltpu


_VMEM_LIMIT = 48 * 1024 * 1024  # under v7x's 64 MiB physical, above 32 MiB default


# ------------------------------ helpers -------------------------------------

def _round_up(x, m):
    return (x + m - 1) // m * m


def _pick_tile(dim, pref, align):
    """Largest (8,128)-friendly tile <= pref that divides the padded dim."""
    padded = _round_up(dim, align)
    if padded <= pref:
        return padded
    t = pref
    while t > align and padded % t != 0:
        t //= 2
    return max(t, align)


def _pad2(x, rows, cols):
    pr, pc = rows - x.shape[0], cols - x.shape[1]
    if pr or pc:
        x = jnp.pad(x, ((0, pr), (0, pc)))
    return x


# ------------------------- tiled GEMM (+ fused epilogue) ---------------------

def _mm_kernel(*refs, has_bias, has_res, act):
    a_ref, b_ref = refs[0], refs[1]
    idx = 2
    bias_ref = res_ref = None
    if has_bias:
        bias_ref = refs[idx]
        idx += 1
    if has_res:
        res_ref = refs[idx]
        idx += 1
    o_ref = refs[idx]
    acc_ref = refs[idx + 1]

    k = pl.program_id(2)

    @pl.when(k == 0)
    def _():
        acc_ref[...] = jnp.zeros_like(acc_ref)

    acc_ref[...] += jnp.dot(a_ref[...], b_ref[...],
                            preferred_element_type=jnp.float32)

    @pl.when(k == pl.num_programs(2) - 1)
    def _():
        acc = acc_ref[...]
        if has_bias:
            acc = acc + bias_ref[...].astype(jnp.float32)
        if act == "quick_gelu":
            acc = acc * jax.nn.sigmoid(1.702 * acc)
        if has_res:
            acc = acc + res_ref[...].astype(jnp.float32)
        o_ref[...] = acc.astype(o_ref.dtype)


def pallas_matmul(a, b, bias=None, residual=None, act="none",
                  out_dtype=jnp.float32):
    """a: [M, K], b: [K, N] -> [M, N].  bf16-fed MXU, f32 accumulation."""
    M, K = a.shape
    K2, N = b.shape
    assert K == K2
    tm = _pick_tile(M, 256, 8)
    tn = _pick_tile(N, 256, 128)
    tk = _pick_tile(K, 512, 128)
    Mp, Np, Kp = _round_up(M, tm), _round_up(N, tn), _round_up(K, tk)

    args = [_pad2(a, Mp, Kp).astype(jnp.bfloat16),
            _pad2(b, Kp, Np).astype(jnp.bfloat16)]
    in_specs = [pl.BlockSpec((tm, tk), lambda i, j, k: (i, k)),
                pl.BlockSpec((tk, tn), lambda i, j, k: (k, j))]
    if bias is not None:
        args.append(_pad2(bias.reshape(1, N).astype(jnp.float32), 1, Np))
        in_specs.append(pl.BlockSpec((1, tn), lambda i, j, k: (0, j)))
    if residual is not None:
        args.append(_pad2(residual.astype(jnp.float32), Mp, Np))
        in_specs.append(pl.BlockSpec((tm, tn), lambda i, j, k: (i, j)))

    out = pl.pallas_call(
        functools.partial(_mm_kernel, has_bias=bias is not None,
                          has_res=residual is not None, act=act),
        grid=(Mp // tm, Np // tn, Kp // tk),
        in_specs=in_specs,
        out_specs=pl.BlockSpec((tm, tn), lambda i, j, k: (i, j)),
        out_shape=jax.ShapeDtypeStruct((Mp, Np), out_dtype),
        scratch_shapes=[pltpu.VMEM((tm, tn), jnp.float32)],
        compiler_params=pltpu.CompilerParams(
            dimension_semantics=("parallel", "parallel", "arbitrary"),
            vmem_limit_bytes=_VMEM_LIMIT),
    )(*args)
    return out[:M, :N]


# ------------------- fused LayerNorm + projection GEMM -----------------------

def _ln_mm_kernel(*refs, has_bias, has_res, act, eps):
    x_ref, g_ref, bt_ref, w_ref = refs[:4]
    idx = 4
    bias_ref = res_ref = None
    if has_bias:
        bias_ref = refs[idx]
        idx += 1
    if has_res:
        res_ref = refs[idx]
        idx += 1
    o_ref = refs[idx]

    x = x_ref[...].astype(jnp.float32)
    mean = jnp.mean(x, axis=-1, keepdims=True)
    var = jnp.mean(jnp.square(x - mean), axis=-1, keepdims=True)
    xn = (x - mean) * lax.rsqrt(var + eps)
    xn = xn * g_ref[...].astype(jnp.float32) + bt_ref[...].astype(jnp.float32)
    acc = jnp.dot(xn.astype(jnp.bfloat16), w_ref[...],
                  preferred_element_type=jnp.float32)
    if has_bias:
        acc = acc + bias_ref[...].astype(jnp.float32)
    if act == "quick_gelu":
        acc = acc * jax.nn.sigmoid(1.702 * acc)
    if has_res:
        acc = acc + res_ref[...].astype(jnp.float32)
    o_ref[...] = acc.astype(o_ref.dtype)


def layer_norm_linear(x2d, ln_p, lin_p, act="none", residual=None, eps=1e-5,
                      out_dtype=jnp.float32):
    """Fused LayerNorm(x) @ W (+bias) (+act) (+residual).  Full K per block."""
    M, K = x2d.shape
    w = lin_p["w"]
    N = w.shape[1]
    tm = _pick_tile(M, 256, 8)
    tn = _pick_tile(N, 256, 128)
    Mp, Np = _round_up(M, tm), _round_up(N, tn)

    args = [_pad2(x2d, Mp, K),
            ln_p["g"].reshape(1, K),
            ln_p["b"].reshape(1, K),
            _pad2(w, K, Np).astype(jnp.bfloat16)]
    in_specs = [pl.BlockSpec((tm, K), lambda i, j: (i, 0)),
                pl.BlockSpec((1, K), lambda i, j: (0, 0)),
                pl.BlockSpec((1, K), lambda i, j: (0, 0)),
                pl.BlockSpec((K, tn), lambda i, j: (0, j))]
    bias = lin_p.get("b")
    if bias is not None:
        args.append(_pad2(bias.reshape(1, N), 1, Np))
        in_specs.append(pl.BlockSpec((1, tn), lambda i, j: (0, j)))
    if residual is not None:
        args.append(_pad2(residual.astype(jnp.float32), Mp, Np))
        in_specs.append(pl.BlockSpec((tm, tn), lambda i, j: (i, j)))

    out = pl.pallas_call(
        functools.partial(_ln_mm_kernel, has_bias=bias is not None,
                          has_res=residual is not None, act=act, eps=eps),
        grid=(Mp // tm, Np // tn),
        in_specs=in_specs,
        out_specs=pl.BlockSpec((tm, tn), lambda i, j: (i, j)),
        out_shape=jax.ShapeDtypeStruct((Mp, Np), out_dtype),
        compiler_params=pltpu.CompilerParams(
            dimension_semantics=("parallel", "parallel"),
            vmem_limit_bytes=_VMEM_LIMIT),
    )(*args)
    return out[:M, :N]


# --------------------------- standalone LayerNorm ----------------------------

def _ln_kernel(x_ref, g_ref, b_ref, o_ref, *, eps):
    x = x_ref[...].astype(jnp.float32)
    mean = jnp.mean(x, axis=-1, keepdims=True)
    var = jnp.mean(jnp.square(x - mean), axis=-1, keepdims=True)
    y = (x - mean) * lax.rsqrt(var + eps)
    y = y * g_ref[...].astype(jnp.float32) + b_ref[...].astype(jnp.float32)
    o_ref[...] = y.astype(o_ref.dtype)


def layer_norm(x2d, p, eps=1e-5):
    M, D = x2d.shape
    tm = _pick_tile(M, 512, 8)
    Mp = _round_up(M, tm)
    out = pl.pallas_call(
        functools.partial(_ln_kernel, eps=eps),
        grid=(Mp // tm,),
        in_specs=[pl.BlockSpec((tm, D), lambda i: (i, 0)),
                  pl.BlockSpec((1, D), lambda i: (0, 0)),
                  pl.BlockSpec((1, D), lambda i: (0, 0))],
        out_specs=pl.BlockSpec((tm, D), lambda i: (i, 0)),
        out_shape=jax.ShapeDtypeStruct((Mp, D), x2d.dtype),
        compiler_params=pltpu.CompilerParams(
            dimension_semantics=("parallel",),
            vmem_limit_bytes=_VMEM_LIMIT),
    )(_pad2(x2d, Mp, D), p["g"].reshape(1, D), p["b"].reshape(1, D))
    return out[:M]


# -------------------- multi-head attention (all heads / step) ----------------

def _attn_kernel(q_ref, k_ref, v_ref, o_ref, *, scale):
    # scale folded into q (matches CLIP: q_proj(x) * scale), [H, S, Dh] per step
    q = (q_ref[0].astype(jnp.float32) * scale).astype(jnp.bfloat16)
    k = k_ref[0]
    v = v_ref[0]
    s = jnp.einsum("hqd,hkd->hqk", q, k, preferred_element_type=jnp.float32)
    m = jnp.max(s, axis=-1, keepdims=True)
    p = jnp.exp(s - m)
    denom = jnp.sum(p, axis=-1, keepdims=True)
    o = jnp.einsum("hqk,hkd->hqd", p.astype(jnp.bfloat16), v,
                   preferred_element_type=jnp.float32)
    o = o * pl.reciprocal(denom, approx=True)
    o_ref[0] = o.astype(o_ref.dtype)


def pallas_attention(q, k, v, scale):
    """q/k/v: [B, H, S, Dh] bf16 -> [B, H, S, Dh] bf16."""
    B, H, S, D = q.shape
    return pl.pallas_call(
        functools.partial(_attn_kernel, scale=scale),
        grid=(B,),
        in_specs=[pl.BlockSpec((1, H, S, D), lambda b: (b, 0, 0, 0))] * 3,
        out_specs=pl.BlockSpec((1, H, S, D), lambda b: (b, 0, 0, 0)),
        out_shape=jax.ShapeDtypeStruct((B, H, S, D), jnp.bfloat16),
        compiler_params=pltpu.CompilerParams(
            dimension_semantics=("parallel",),
            vmem_limit_bytes=_VMEM_LIMIT),
    )(q, k, v)


# ------------------------------ model forward --------------------------------

def encoder_layer(x2d, p, B, S, heads):
    C = x2d.shape[1]
    Dh = C // heads
    # fused LN1 + QKV projection (single [C, 3C] GEMM, bf16 out feeds attention)
    qkv = layer_norm_linear(x2d, p["ln1"], p["qkv"], out_dtype=jnp.bfloat16)
    qkv = qkv.reshape(B, S, 3, heads, Dh).transpose(2, 0, 3, 1, 4)
    q, k, v = qkv[0], qkv[1], qkv[2]
    o = pallas_attention(q, k, v, scale=1.0 / (Dh ** 0.5))
    o = o.transpose(0, 2, 1, 3).reshape(B * S, C)
    # out-projection with fused bias + residual add
    x2d = pallas_matmul(o, p["out"]["w"], p["out"]["b"], residual=x2d)
    # fused LN2 + fc1 + quick_gelu, then fc2 with fused bias + residual add
    h = layer_norm_linear(x2d, p["ln2"], p["fc1"], act="quick_gelu",
                          out_dtype=jnp.bfloat16)
    x2d = pallas_matmul(h, p["fc2"]["w"], p["fc2"]["b"], residual=x2d)
    return x2d


def clip_vision_forward(params, pixel_values, cfg):
    B, Cc, H, W = pixel_values.shape
    patch, hidden, heads = cfg["patch"], cfg["hidden"], cfg["heads"]
    gh, gw = H // patch, W // patch

    # patch embedding: stride == kernel, so im2col is a pure reshape + one GEMM
    patches = pixel_values.reshape(B, Cc, gh, patch, gw, patch)
    patches = patches.transpose(0, 2, 4, 1, 3, 5).reshape(B * gh * gw,
                                                          Cc * patch * patch)
    wmat = params["patch_embed"]["w"].reshape(hidden, Cc * patch * patch).T
    emb = pallas_matmul(patches, wmat)                    # CLIP patch conv: no bias
    emb = emb.reshape(B, gh * gw, hidden)

    cls = jnp.broadcast_to(params["class_embedding"].reshape(1, 1, hidden),
                           (B, 1, hidden))
    hidden_states = jnp.concatenate([cls, emb], axis=1)
    hidden_states = hidden_states + params["position_embedding"][None]

    S = hidden_states.shape[1]
    x2d = hidden_states.reshape(B * S, hidden)
    x2d = layer_norm(x2d, params["pre_layernorm"])
    for lp in params["layers"]:
        x2d = encoder_layer(x2d, lp, B, S, heads)
    last_hidden_state = x2d.reshape(B, S, hidden)
    pooled = layer_norm(last_hidden_state[:, 0, :], params["post_layernorm"])
    return last_hidden_state, pooled


# ------------------------------- parameters ----------------------------------

def init_params(cfg, seed=0):
    key = jax.random.PRNGKey(seed)

    def nxt():
        nonlocal key
        key, sub = jax.random.split(key)
        return sub

    hidden, heads = cfg["hidden"], cfg["heads"]
    inter, patch = cfg["intermediate"], cfg["patch"]
    Cc, n_layers = cfg["in_ch"], cfg["layers"]
    sc = 0.02

    def dense(din, dout, bias=True):
        d = {"w": jax.random.normal(nxt(), (din, dout), jnp.float32) * sc}
        if bias:
            d["b"] = jnp.zeros((dout,), jnp.float32)
        return d

    def norm(c):
        return {"g": jnp.ones((c,), jnp.float32), "b": jnp.zeros((c,), jnp.float32)}

    def layer():
        q, k, v = dense(hidden, hidden), dense(hidden, hidden), dense(hidden, hidden)
        return {
            "ln1": norm(hidden),
            # q/k/v fused column-wise into one [hidden, 3*hidden] projection
            "qkv": {"w": jnp.concatenate([q["w"], k["w"], v["w"]], axis=1),
                    "b": jnp.concatenate([q["b"], k["b"], v["b"]], axis=0)},
            "out": dense(hidden, hidden),
            "ln2": norm(hidden),
            "fc1": dense(hidden, inter),
            "fc2": dense(inter, hidden),
        }

    num_pos = (cfg["image"] // patch) ** 2 + 1
    return {
        "patch_embed": {"w": jax.random.normal(nxt(), (hidden, Cc, patch, patch),
                                               jnp.float32) * sc},
        "class_embedding": jax.random.normal(nxt(), (hidden,), jnp.float32) * sc,
        "position_embedding": jax.random.normal(nxt(), (num_pos, hidden),
                                                jnp.float32) * sc,
        "pre_layernorm": norm(hidden),
        "layers": [layer() for _ in range(n_layers)],
        "post_layernorm": norm(hidden),
    }


# ---------------------------- module wrapper ----------------------------------

class NeuronSafetyModelWrap:
    """Mirrors forward: list(safety_model(clip_inputs).values())
       -> [last_hidden_state, pooler_output]."""

    def __init__(self, params, cfg):
        self.params = params
        self.cfg = cfg
        self._fwd = jax.jit(lambda x: clip_vision_forward(self.params, x, self.cfg))

    def __call__(self, clip_inputs):
        last_hidden_state, pooler_output = self._fwd(clip_inputs)
        return [last_hidden_state, pooler_output]


# ---------------------------------- main --------------------------------------

if __name__ == "__main__":
    cfg = dict(in_ch=3, image=32, patch=8, hidden=128, heads=4,
               intermediate=512, layers=2)
    params = init_params(cfg, seed=0)

    key = jax.random.PRNGKey(0)
    clip_inputs = jax.random.normal(
        key, (2, cfg["in_ch"], cfg["image"], cfg["image"]), jnp.float32)

    model = NeuronSafetyModelWrap(params, cfg)
    outs = model(clip_inputs)
    jax.block_until_ready(outs)

    seq = (cfg["image"] // cfg["patch"]) ** 2 + 1
    assert outs[0].shape == (2, seq, cfg["hidden"])
    assert outs[1].shape == (2, cfg["hidden"])
    assert outs[0].dtype == jnp.float32 and outs[1].dtype == jnp.float32
    print("KERNEL_OK")
</pallas_src>

<mosaic_0001>
module attributes {stable_mosaic.version = 11 : i64} {
  func.func @_mm_kernel(%arg0: i32, %arg1: i32, %arg2: i32, %arg3: memref<32x256xbf16, #tpu.memory_space<vmem>>, %arg4: memref<256x128xbf16, #tpu.memory_space<vmem>>, %arg5: memref<32x128xf32, #tpu.memory_space<vmem>>, %arg6: memref<32x128xf32, #tpu.memory_space<vmem>>) attributes {dimension_semantics = [#tpu.dimension_semantics<parallel>, #tpu.dimension_semantics<parallel>, #tpu.dimension_semantics<arbitrary>], iteration_bounds = array<i64: 1, 1, 1>, scalar_prefetch = 0 : i64, scratch_operands = 1 : i64, tpu.core_type = #tpu.core_type<tc>, window_params = [{transform_indices = @transform_0, window_bounds = array<i64: 32, 256>}, {transform_indices = @transform_1, window_bounds = array<i64: 256, 128>}, {transform_indices = @transform_2, window_bounds = array<i64: 32, 128>}]} {
    %c0_i32 = arith.constant 0 : i32
    %0 = arith.cmpi eq, %arg2, %c0_i32 : i32
    %1 = arith.extui %0 : i1 to i32
    %c0_i32_0 = arith.constant 0 : i32
    %2 = arith.cmpi ne, %1, %c0_i32_0 : i32
    scf.if %2 {
      %cst_10 = arith.constant 0.000000e+00 : f32
      %12 = vector.broadcast %cst_10 : f32 to vector<32x128xf32>
      %c0_11 = arith.constant 0 : index
      %c0_12 = arith.constant 0 : index
      %13 = vector.load %arg6[%c0_11, %c0_12] : memref<32x128xf32, #tpu.memory_space<vmem>>, vector<32x128xf32>
      tpu.vector_store %arg6[%c0_11, %c0_12], %12 {strides = array<i32>} : memref<32x128xf32, #tpu.memory_space<vmem>>, vector<32x128xf32>,
    } else {
    }
    %c0 = arith.constant 0 : index
    %c0_1 = arith.constant 0 : index
    %3 = vector.load %arg6[%c0, %c0_1] : memref<32x128xf32, #tpu.memory_space<vmem>>, vector<32x128xf32>
    %c0_2 = arith.constant 0 : index
    %c0_3 = arith.constant 0 : index
    %4 = vector.load %arg3[%c0_2, %c0_3] : memref<32x256xbf16, #tpu.memory_space<vmem>>, vector<32x256xbf16>
    %c0_4 = arith.constant 0 : index
    %c0_5 = arith.constant 0 : index
    %5 = vector.load %arg4[%c0_4, %c0_5] : memref<256x128xbf16, #tpu.memory_space<vmem>>, vector<256x128xbf16>
    %cst = arith.constant dense<0.000000e+00> : vector<32x128xf32>
    %6 = tpu.matmul %4, %5, %cst {dimension_numbers = #tpu.dot_dimension_numbers<[1], [0], [0], [1], [0, 0, 1, 1], [], []>} : vector<32x256xbf16>, vector<256x128xbf16>, vector<32x128xf32> -> vector<32x128xf32>
    %7 = arith.addf %3, %6 : vector<32x128xf32>
    %c0_6 = arith.constant 0 : index
    %c0_7 = arith.constant 0 : index
    %8 = vector.load %arg6[%c0_6, %c0_7] : memref<32x128xf32, #tpu.memory_space<vmem>>, vector<32x128xf32>
    tpu.vector_store %arg6[%c0_6, %c0_7], %7 {strides = array<i32>} : memref<32x128xf32, #tpu.memory_space<vmem>>, vector<32x128xf32>,
    %c0_i32_8 = arith.constant 0 : i32
    %9 = arith.cmpi eq, %arg2, %c0_i32_8 : i32
    %10 = arith.extui %9 : i1 to i32
    %c0_i32_9 = arith.constant 0 : i32
    %11 = arith.cmpi ne, %10, %c0_i32_9 : i32
    scf.if %11 {
      %c0_10 = arith.constant 0 : index
      %c0_11 = arith.constant 0 : index
      %12 = vector.load %arg6[%c0_10, %c0_11] : memref<32x128xf32, #tpu.memory_space<vmem>>, vector<32x128xf32>
      %c0_12 = arith.constant 0 : index
      %c0_13 = arith.constant 0 : index
      %13 = vector.load %arg5[%c0_12, %c0_13] : memref<32x128xf32, #tpu.memory_space<vmem>>, vector<32x128xf32>
      tpu.vector_store %arg5[%c0_12, %c0_13], %12 {strides = array<i32>} : memref<32x128xf32, #tpu.memory_space<vmem>>, vector<32x128xf32>,
    } else {
    }
    return
  }
  func.func @transform_0(%arg0: i32, %arg1: i32, %arg2: i32) -> (i32, i32) {
    %c0_i32 = arith.constant 0 : i32
    return %arg0, %arg2 : i32, i32
  }
  func.func @transform_1(%arg0: i32, %arg1: i32, %arg2: i32) -> (i32, i32) {
    %c0_i32 = arith.constant 0 : i32
    return %arg2, %arg1 : i32, i32
  }
  func.func @transform_2(%arg0: i32, %arg1: i32, %arg2: i32) -> (i32, i32) {
    %c0_i32 = arith.constant 0 : i32
    return %arg0, %arg1 : i32, i32
  }
}

module attributes {stable_mosaic.version = 11 : i64} {
  func.func @_ln_kernel(%arg0: i32, %arg1: memref<40x128xf32, #tpu.memory_space<vmem>>, %arg2: memref<1x128xf32, #tpu.memory_space<vmem>>, %arg3: memref<1x128xf32, #tpu.memory_space<vmem>>, %arg4: memref<40x128xf32, #tpu.memory_space<vmem>>) attributes {dimension_semantics = [#tpu.dimension_semantics<parallel>], iteration_bounds = array<i64: 1>, scalar_prefetch = 0 : i64, scratch_operands = 0 : i64, tpu.core_type = #tpu.core_type<tc>, window_params = [{transform_indices = @transform_0, window_bounds = array<i64: 40, 128>}, {pipeline_mode = #tpu.pipeline_mode<synchronous>, transform_indices = @transform_1, window_bounds = array<i64: 1, 128>}, {pipeline_mode = #tpu.pipeline_mode<synchronous>, transform_indices = @transform_2, window_bounds = array<i64: 1, 128>}, {transform_indices = @transform_3, window_bounds = array<i64: 40, 128>}]} {
    %c0 = arith.constant 0 : index
    %c0_0 = arith.constant 0 : index
    %0 = vector.load %arg1[%c0, %c0_0] : memref<40x128xf32, #tpu.memory_space<vmem>>, vector<40x128xf32>
    %cst = arith.constant dense<0.000000e+00> : vector<40xf32>
    %1 = vector.multi_reduction <add>, %0, %cst [1] : vector<40x128xf32> to vector<40xf32>
    %2 = vector.shape_cast %1 : vector<40xf32> to vector<40x1xf32>
    %cst_1 = arith.constant 1.280000e+02 : f32
    %3 = vector.broadcast %cst_1 : f32 to vector<40x1xf32>
    %4 = arith.divf %2, %3 : vector<40x1xf32>
    %5 = vector.broadcast %4 : vector<40x1xf32> to vector<40x128xf32>
    %6 = arith.subf %0, %5 : vector<40x128xf32>
    %7 = arith.mulf %6, %6 : vector<40x128xf32>
    %cst_2 = arith.constant dense<0.000000e+00> : vector<40xf32>
    %8 = vector.multi_reduction <add>, %7, %cst_2 [1] : vector<40x128xf32> to vector<40xf32>
    %9 = vector.shape_cast %8 : vector<40xf32> to vector<40x1xf32>
    %cst_3 = arith.constant 1.280000e+02 : f32
    %10 = vector.broadcast %cst_3 : f32 to vector<40x1xf32>
    %11 = arith.divf %9, %10 : vector<40x1xf32>
    %12 = vector.broadcast %4 : vector<40x1xf32> to vector<40x128xf32>
    %13 = arith.subf %0, %12 : vector<40x128xf32>
    %cst_4 = arith.constant 9.99999974E-6 : f32
    %14 = vector.broadcast %cst_4 : f32 to vector<40x1xf32>
    %15 = arith.addf %11, %14 : vector<40x1xf32>
    %16 = math.rsqrt %15 : vector<40x1xf32>
    %17 = vector.broadcast %16 : vector<40x1xf32> to vector<40x128xf32>
    %18 = arith.mulf %13, %17 : vector<40x128xf32>
    %c0_5 = arith.constant 0 : index
    %c0_6 = arith.constant 0 : index
    %19 = vector.load %arg2[%c0_5, %c0_6] : memref<1x128xf32, #tpu.memory_space<vmem>>, vector<1x128xf32>
    %20 = vector.broadcast %19 : vector<1x128xf32> to vector<40x128xf32>
    %21 = arith.mulf %18, %20 : vector<40x128xf32>
    %c0_7 = arith.constant 0 : index
    %c0_8 = arith.constant 0 : index
    %22 = vector.load %arg3[%c0_7, %c0_8] : memref<1x128xf32, #tpu.memory_space<vmem>>, vector<1x128xf32>
    %23 = vector.broadcast %22 : vector<1x128xf32> to vector<40x128xf32>
    %24 = arith.addf %21, %23 : vector<40x128xf32>
    %c0_9 = arith.constant 0 : index
    %c0_10 = arith.constant 0 : index
    %25 = vector.load %arg4[%c0_9, %c0_10] : memref<40x128xf32, #tpu.memory_space<vmem>>, vector<40x128xf32>
    tpu.vector_store %arg4[%c0_9, %c0_10], %24 {strides = array<i32>} : memref<40x128xf32, #tpu.memory_space<vmem>>, vector<40x128xf32>,
    return
  }
  func.func @transform_0(%arg0: i32) -> (i32, i32) {
    %c0_i32 = arith.constant 0 : i32
    %c0_i32_0 = arith.constant 0 : i32
    return %arg0, %c0_i32 : i32, i32
  }
  func.func @transform_1(%arg0: i32) -> (i32, i32) {
    %c0_i32 = arith.constant 0 : i32
    %c0_i32_0 = arith.constant 0 : i32
    %c0_i32_1 = arith.constant 0 : i32
    return %c0_i32, %c0_i32_0 : i32, i32
  }
  func.func @transform_2(%arg0: i32) -> (i32, i32) {
    %c0_i32 = arith.constant 0 : i32
    %c0_i32_0 = arith.constant 0 : i32
    %c0_i32_1 = arith.constant 0 : i32
    return %c0_i32, %c0_i32_0 : i32, i32
  }
  func.func @transform_3(%arg0: i32) -> (i32, i32) {
    %c0_i32 = arith.constant 0 : i32
    %c0_i32_0 = arith.constant 0 : i32
    return %arg0, %c0_i32 : i32, i32
  }
}

module attributes {stable_mosaic.version = 11 : i64} {
  func.func @_ln_mm_kernel(%arg0: i32, %arg1: i32, %arg2: memref<40x128xf32, #tpu.memory_space<vmem>>, %arg3: memref<1x128xf32, #tpu.memory_space<vmem>>, %arg4: memref<1x128xf32, #tpu.memory_space<vmem>>, %arg5: memref<128x128xbf16, #tpu.memory_space<vmem>>, %arg6: memref<1x128xf32, #tpu.memory_space<vmem>>, %arg7: memref<40x128xbf16, #tpu.memory_space<vmem>>) attributes {dimension_semantics = [#tpu.dimension_semantics<parallel>, #tpu.dimension_semantics<parallel>], iteration_bounds = array<i64: 1, 3>, scalar_prefetch = 0 : i64, scratch_operands = 0 : i64, tpu.core_type = #tpu.core_type<tc>, window_params = [{transform_indices = @transform_0, window_bounds = array<i64: 40, 128>}, {pipeline_mode = #tpu.pipeline_mode<synchronous>, transform_indices = @transform_1, window_bounds = array<i64: 1, 128>}, {pipeline_mode = #tpu.pipeline_mode<synchronous>, transform_indices = @transform_2, window_bounds = array<i64: 1, 128>}, {transform_indices = @transform_3, window_bounds = array<i64: 128, 128>}, {transform_indices = @transform_4, window_bounds = array<i64: 1, 128>}, {transform_indices = @transform_5, window_bounds = array<i64: 40, 128>}]} {
    %c0 = arith.constant 0 : index
    %c0_0 = arith.constant 0 : index
    %0 = vector.load %arg2[%c0, %c0_0] : memref<40x128xf32, #tpu.memory_space<vmem>>, vector<40x128xf32>
    %cst = arith.constant dense<0.000000e+00> : vector<40xf32>
    %1 = vector.multi_reduction <add>, %0, %cst [1] : vector<40x128xf32> to vector<40xf32>
    %2 = vector.shape_cast %1 : vector<40xf32> to vector<40x1xf32>
    %cst_1 = arith.constant 1.280000e+02 : f32
    %3 = vector.broadcast %cst_1 : f32 to vector<40x1xf32>
    %4 = arith.divf %2, %3 : vector<40x1xf32>
    %5 = vector.broadcast %4 : vector<40x1xf32> to vector<40x128xf32>
    %6 = arith.subf %0, %5 : vector<40x128xf32>
    %7 = arith.mulf %6, %6 : vector<40x128xf32>
    %cst_2 = arith.constant dense<0.000000e+00> : vector<40xf32>
    %8 = vector.multi_reduction <add>, %7, %cst_2 [1] : vector<40x128xf32> to vector<40xf32>
    %9 = vector.shape_cast %8 : vector<40xf32> to vector<40x1xf32>
    %cst_3 = arith.constant 1.280000e+02 : f32
    %10 = vector.broadcast %cst_3 : f32 to vector<40x1xf32>
    %11 = arith.divf %9, %10 : vector<40x1xf32>
    %12 = vector.broadcast %4 : vector<40x1xf32> to vector<40x128xf32>
    %13 = arith.subf %0, %12 : vector<40x128xf32>
    %cst_4 = arith.constant 9.99999974E-6 : f32
    %14 = vector.broadcast %cst_4 : f32 to vector<40x1xf32>
    %15 = arith.addf %11, %14 : vector<40x1xf32>
    %16 = math.rsqrt %15 : vector<40x1xf32>
    %17 = vector.broadcast %16 : vector<40x1xf32> to vector<40x128xf32>
    %18 = arith.mulf %13, %17 : vector<40x128xf32>
    %c0_5 = arith.constant 0 : index
    %c0_6 = arith.constant 0 : index
    %19 = vector.load %arg3[%c0_5, %c0_6] : memref<1x128xf32, #tpu.memory_space<vmem>>, vector<1x128xf32>
    %20 = vector.broadcast %19 : vector<1x128xf32> to vector<40x128xf32>
    %21 = arith.mulf %18, %20 : vector<40x128xf32>
    %c0_7 = arith.constant 0 : index
    %c0_8 = arith.constant 0 : index
    %22 = vector.load %arg4[%c0_7, %c0_8] : memref<1x128xf32, #tpu.memory_space<vmem>>, vector<1x128xf32>
    %23 = vector.broadcast %22 : vector<1x128xf32> to vector<40x128xf32>
    %24 = arith.addf %21, %23 : vector<40x128xf32>
    %25 = arith.truncf %24 : vector<40x128xf32> to vector<40x128xbf16>
    %c0_9 = arith.constant 0 : index
    %c0_10 = arith.constant 0 : index
    %26 = vector.load %arg5[%c0_9, %c0_10] : memref<128x128xbf16, #tpu.memory_space<vmem>>, vector<128x128xbf16>
    %cst_11 = arith.constant dense<0.000000e+00> : vector<40x128xf32>
    %27 = tpu.matmul %25, %26, %cst_11 {dimension_numbers = #tpu.dot_dimension_numbers<[1], [0], [0], [1], [0, 0, 1, 1], [], []>} : vector<40x128xbf16>, vector<128x128xbf16>, vector<40x128xf32> -> vector<40x128xf32>
    %c0_12 = arith.constant 0 : index
    %c0_13 = arith.constant 0 : index
    %28 = vector.load %arg6[%c0_12, %c0_13] : memref<1x128xf32, #tpu.memory_space<vmem>>, vector<1x128xf32>
    %29 = vector.broadcast %28 : vector<1x128xf32> to vector<40x128xf32>
    %30 = arith.addf %27, %29 : vector<40x128xf32>
    %31 = arith.truncf %30 : vector<40x128xf32> to vector<40x128xbf16>
    %c0_14 = arith.constant 0 : index
    %c0_15 = arith.constant 0 : index
    %32 = vector.load %arg7[%c0_14, %c0_15] : memref<40x128xbf16, #tpu.memory_space<vmem>>, vector<40x128xbf16>
    tpu.vector_store %arg7[%c0_14, %c0_15], %31 {strides = array<i32>} : memref<40x128xbf16, #tpu.memory_space<vmem>>, vector<40x128xbf16>,
    return
  }
  func.func @transform_0(%arg0: i32, %arg1: i32) -> (i32, i32) {
    %c0_i32 = arith.constant 0 : i32
    %c0_i32_0 = arith.constant 0 : i32
    return %arg0, %c0_i32 : i32, i32
  }
  func.func @transform_1(%arg0: i32, %arg1: i32) -> (i32, i32) {
    %c0_i32 = arith.constant 0 : i32
    %c0_i32_0 = arith.constant 0 : i32
    %c0_i32_1 = arith.constant 0 : i32
    return %c0_i32, %c0_i32_0 : i32, i32
  }
  func.func @transform_2(%arg0: i32, %arg1: i32) -> (i32, i32) {
    %c0_i32 = arith.constant 0 : i32
    %c0_i32_0 = arith.constant 0 : i32
    %c0_i32_1 = arith.constant 0 : i32
    return %c0_i32, %c0_i32_0 : i32, i32
  }
  func.func @transform_3(%arg0: i32, %arg1: i32) -> (i32, i32) {
    %c0_i32 = arith.constant 0 : i32
    %c0_i32_0 = arith.constant 0 : i32
    return %c0_i32, %arg1 : i32, i32
  }
  func.func @transform_4(%arg0: i32, %arg1: i32) -> (i32, i32) {
    %c0_i32 = arith.constant 0 : i32
    %c0_i32_0 = arith.constant 0 : i32
    return %c0_i32, %arg1 : i32, i32
  }
  func.func @transform_5(%arg0: i32, %arg1: i32) -> (i32, i32) {
    %c0_i32 = arith.constant 0 : i32
    return %arg0, %arg1 : i32, i32
  }
}

module attributes {stable_mosaic.version = 11 : i64} {
  func.func @_attn_kernel(%arg0: i32, %arg1: memref<1x4x17x32xbf16, #tpu.memory_space<vmem>>, %arg2: memref<1x4x17x32xbf16, #tpu.memory_space<vmem>>, %arg3: memref<1x4x17x32xbf16, #tpu.memory_space<vmem>>, %arg4: memref<1x4x17x32xbf16, #tpu.memory_space<vmem>>) attributes {dimension_semantics = [#tpu.dimension_semantics<parallel>], iteration_bounds = array<i64: 2>, scalar_prefetch = 0 : i64, scratch_operands = 0 : i64, tpu.core_type = #tpu.core_type<tc>, window_params = [{transform_indices = @transform_0, window_bounds = array<i64: 1, 4, 17, 32>}, {transform_indices = @transform_1, window_bounds = array<i64: 1, 4, 17, 32>}, {transform_indices = @transform_2, window_bounds = array<i64: 1, 4, 17, 32>}, {transform_indices = @transform_3, window_bounds = array<i64: 1, 4, 17, 32>}]} {
    %c0 = arith.constant 0 : index
    %c0_0 = arith.constant 0 : index
    %c0_1 = arith.constant 0 : index
    %c0_2 = arith.constant 0 : index
    %0 = vector.load %arg1[%c0, %c0_0, %c0_1, %c0_2] : memref<1x4x17x32xbf16, #tpu.memory_space<vmem>>, vector<1x4x17x32xbf16>
    %1 = vector.shape_cast %0 : vector<1x4x17x32xbf16> to vector<4x17x32xbf16>
    %2 = arith.extf %1 : vector<4x17x32xbf16> to vector<4x17x32xf32>
    %cst = arith.constant 0.176776692 : f32
    %3 = vector.broadcast %cst : f32 to vector<4x17x32xf32>
    %4 = arith.mulf %2, %3 : vector<4x17x32xf32>
    %5 = arith.truncf %4 : vector<4x17x32xf32> to vector<4x17x32xbf16>
    %c0_3 = arith.constant 0 : index
    %c0_4 = arith.constant 0 : index
    %c0_5 = arith.constant 0 : index
    %c0_6 = arith.constant 0 : index
    %6 = vector.load %arg2[%c0_3, %c0_4, %c0_5, %c0_6] : memref<1x4x17x32xbf16, #tpu.memory_space<vmem>>, vector<1x4x17x32xbf16>
    %7 = vector.shape_cast %6 : vector<1x4x17x32xbf16> to vector<4x17x32xbf16>
    %c0_7 = arith.constant 0 : index
    %c0_8 = arith.constant 0 : index
    %c0_9 = arith.constant 0 : index
    %c0_10 = arith.constant 0 : index
    %8 = vector.load %arg3[%c0_7, %c0_8, %c0_9, %c0_10] : memref<1x4x17x32xbf16, #tpu.memory_space<vmem>>, vector<1x4x17x32xbf16>
    %9 = vector.shape_cast %8 : vector<1x4x17x32xbf16> to vector<4x17x32xbf16>
    "tpu.trace_start"() <{level = 10 : i32, message = "hqd,hkd->hqk"}> : () -> ()
    %cst_11 = arith.constant dense<0.000000e+00> : vector<4x17x17xf32>
    %10 = tpu.matmul %5, %7, %cst_11 {dimension_numbers = #tpu.dot_dimension_numbers<[2], [2], [1], [1], [0, 0, 0, 1, 1, 1], [0], [0]>} : vector<4x17x32xbf16>, vector<4x17x32xbf16>, vector<4x17x17xf32> -> vector<4x17x17xf32>
    "tpu.trace_stop"() : () -> ()
    %cst_12 = arith.constant dense<0xFF800000> : vector<4x17xf32>
    %11 = vector.multi_reduction <maximumf>, %10, %cst_12 [2] : vector<4x17x17xf32> to vector<4x17xf32>
    %12 = vector.shape_cast %11 : vector<4x17xf32> to vector<4x17x1xf32>
    %13 = vector.broadcast %12 : vector<4x17x1xf32> to vector<4x17x17xf32>
    %14 = arith.subf %10, %13 : vector<4x17x17xf32>
    %15 = math.exp %14 : vector<4x17x17xf32>
    %cst_13 = arith.constant dense<0.000000e+00> : vector<4x17xf32>
    %16 = vector.multi_reduction <add>, %15, %cst_13 [2] : vector<4x17x17xf32> to vector<4x17xf32>
    %17 = vector.shape_cast %16 : vector<4x17xf32> to vector<4x17x1xf32>
    %18 = arith.truncf %15 : vector<4x17x17xf32> to vector<4x17x17xbf16>
    "tpu.trace_start"() <{level = 10 : i32, message = "hqk,hkd->hqd"}> : () -> ()
    %cst_14 = arith.constant dense<0.000000e+00> : vector<4x17x32xf32>
    %19 = tpu.matmul %18, %9, %cst_14 {dimension_numbers = #tpu.dot_dimension_numbers<[2], [1], [1], [2], [0, 0, 0, 1, 1, 2], [0], [0]>} : vector<4x17x17xbf16>, vector<4x17x32xbf16>, vector<4x17x32xf32> -> vector<4x17x32xf32>
    "tpu.trace_stop"() : () -> ()
    %20 = tpu.reciprocal %17 {approx = true} : vector<4x17x1xf32> -> vector<4x17x1xf32>
    %21 = vector.broadcast %20 : vector<4x17x1xf32> to vector<4x17x32xf32>
    %22 = arith.mulf %19, %21 : vector<4x17x32xf32>
    %23 = arith.truncf %22 : vector<4x17x32xf32> to vector<4x17x32xbf16>
    %c0_15 = arith.constant 0 : index
    %c0_16 = arith.constant 0 : index
    %c0_17 = arith.constant 0 : index
    %c0_18 = arith.constant 0 : index
    %24 = vector.load %arg4[%c0_15, %c0_16, %c0_17, %c0_18] : memref<1x4x17x32xbf16, #tpu.memory_space<vmem>>, vector<1x4x17x32xbf16>
    %25 = vector.shape_cast %24 : vector<1x4x17x32xbf16> to vector<4x17x32xbf16>
    %26 = vector.shape_cast %23 : vector<4x17x32xbf16> to vector<1x4x17x32xbf16>
    tpu.vector_store %arg4[%c0_15, %c0_16, %c0_17, %c0_18], %26 {strides = array<i32>} : memref<1x4x17x32xbf16, #tpu.memory_space<vmem>>, vector<1x4x17x32xbf16>,
    return
  }
  func.func @transform_0(%arg0: i32) -> (i32, i32, i32, i32) {
    %c0_i32 = arith.constant 0 : i32
    %c0_i32_0 = arith.constant 0 : i32
    %c0_i32_1 = arith.constant 0 : i32
    %c0_i32_2 = arith.constant 0 : i32
    return %arg0, %c0_i32, %c0_i32_0, %c0_i32_1 : i32, i32, i32, i32
  }
  func.func @transform_1(%arg0: i32) -> (i32, i32, i32, i32) {
    %c0_i32 = arith.constant 0 : i32
    %c0_i32_0 = arith.constant 0 : i32
    %c0_i32_1 = arith.constant 0 : i32
    %c0_i32_2 = arith.constant 0 : i32
    return %arg0, %c0_i32, %c0_i32_0, %c0_i32_1 : i32, i32, i32, i32
  }
  func.func @transform_2(%arg0: i32) -> (i32, i32, i32, i32) {
    %c0_i32 = arith.constant 0 : i32
    %c0_i32_0 = arith.constant 0 : i32
    %c0_i32_1 = arith.constant 0 : i32
    %c0_i32_2 = arith.constant 0 : i32
    return %arg0, %c0_i32, %c0_i32_0, %c0_i32_1 : i32, i32, i32, i32
  }
  func.func @transform_3(%arg0: i32) -> (i32, i32, i32, i32) {
    %c0_i32 = arith.constant 0 : i32
    %c0_i32_0 = arith.constant 0 : i32
    %c0_i32_1 = arith.constant 0 : i32
    %c0_i32_2 = arith.constant 0 : i32
    return %arg0, %c0_i32, %c0_i32_0, %c0_i32_1 : i32, i32, i32, i32
  }
}

module attributes {stable_mosaic.version = 11 : i64} {
  func.func @_mm_kernel(%arg0: i32, %arg1: i32, %arg2: i32, %arg3: memref<40x128xbf16, #tpu.memory_space<vmem>>, %arg4: memref<128x128xbf16, #tpu.memory_space<vmem>>, %arg5: memref<1x128xf32, #tpu.memory_space<vmem>>, %arg6: memref<40x128xf32, #tpu.memory_space<vmem>>, %arg7: memref<40x128xf32, #tpu.memory_space<vmem>>, %arg8: memref<40x128xf32, #tpu.memory_space<vmem>>) attributes {dimension_semantics = [#tpu.dimension_semantics<parallel>, #tpu.dimension_semantics<parallel>, #tpu.dimension_semantics<arbitrary>], iteration_bounds = array<i64: 1, 1, 1>, scalar_prefetch = 0 : i64, scratch_operands = 1 : i64, tpu.core_type = #tpu.core_type<tc>, window_params = [{transform_indices = @transform_0, window_bounds = array<i64: 40, 128>}, {transform_indices = @transform_1, window_bounds = array<i64: 128, 128>}, {transform_indices = @transform_2, window_bounds = array<i64: 1, 128>}, {transform_indices = @transform_3, window_bounds = array<i64: 40, 128>}, {transform_indices = @transform_4, window_bounds = array<i64: 40, 128>}]} {
    %c0_i32 = arith.constant 0 : i32
    %0 = arith.cmpi eq, %arg2, %c0_i32 : i32
    %1 = arith.extui %0 : i1 to i32
    %c0_i32_0 = arith.constant 0 : i32
    %2 = arith.cmpi ne, %1, %c0_i32_0 : i32
    scf.if %2 {
      %cst_10 = arith.constant 0.000000e+00 : f32
      %12 = vector.broadcast %cst_10 : f32 to vector<40x128xf32>
      %c0_11 = arith.constant 0 : index
      %c0_12 = arith.constant 0 : index
      %13 = vector.load %arg8[%c0_11, %c0_12] : memref<40x128xf32, #tpu.memory_space<vmem>>, vector<40x128xf32>
      tpu.vector_store %arg8[%c0_11, %c0_12], %12 {strides = array<i32>} : memref<40x128xf32, #tpu.memory_space<vmem>>, vector<40x128xf32>,
    } else {
    }
    %c0 = arith.constant 0 : index
    %c0_1 = arith.constant 0 : index
    %3 = vector.load %arg8[%c0, %c0_1] : memref<40x128xf32, #tpu.memory_space<vmem>>, vector<40x128xf32>
    %c0_2 = arith.constant 0 : index
    %c0_3 = arith.constant 0 : index
    %4 = vector.load %arg3[%c0_2, %c0_3] : memref<40x128xbf16, #tpu.memory_space<vmem>>, vector<40x128xbf16>
    %c0_4 = arith.constant 0 : index
    %c0_5 = arith.constant 0 : index
    %5 = vector.load %arg4[%c0_4, %c0_5] : memref<128x128xbf16, #tpu.memory_space<vmem>>, vector<128x128xbf16>
    %cst = arith.constant dense<0.000000e+00> : vector<40x128xf32>
    %6 = tpu.matmul %4, %5, %cst {dimension_numbers = #tpu.dot_dimension_numbers<[1], [0], [0], [1], [0, 0, 1, 1], [], []>} : vector<40x128xbf16>, vector<128x128xbf16>, vector<40x128xf32> -> vector<40x128xf32>
    %7 = arith.addf %3, %6 : vector<40x128xf32>
    %c0_6 = arith.constant 0 : index
    %c0_7 = arith.constant 0 : index
    %8 = vector.load %arg8[%c0_6, %c0_7] : memref<40x128xf32, #tpu.memory_space<vmem>>, vector<40x128xf32>
    tpu.vector_store %arg8[%c0_6, %c0_7], %7 {strides = array<i32>} : memref<40x128xf32, #tpu.memory_space<vmem>>, vector<40x128xf32>,
    %c0_i32_8 = arith.constant 0 : i32
    %9 = arith.cmpi eq, %arg2, %c0_i32_8 : i32
    %10 = arith.extui %9 : i1 to i32
    %c0_i32_9 = arith.constant 0 : i32
    %11 = arith.cmpi ne, %10, %c0_i32_9 : i32
    scf.if %11 {
      %c0_10 = arith.constant 0 : index
      %c0_11 = arith.constant 0 : index
      %12 = vector.load %arg8[%c0_10, %c0_11] : memref<40x128xf32, #tpu.memory_space<vmem>>, vector<40x128xf32>
      %c0_12 = arith.constant 0 : index
      %c0_13 = arith.constant 0 : index
      %13 = vector.load %arg5[%c0_12, %c0_13] : memref<1x128xf32, #tpu.memory_space<vmem>>, vector<1x128xf32>
      %14 = vector.broadcast %13 : vector<1x128xf32> to vector<40x128xf32>
      %15 = arith.addf %12, %14 : vector<40x128xf32>
      %c0_14 = arith.constant 0 : index
      %c0_15 = arith.constant 0 : index
      %16 = vector.load %arg6[%c0_14, %c0_15] : memref<40x128xf32, #tpu.memory_space<vmem>>, vector<40x128xf32>
      %17 = arith.addf %15, %16 : vector<40x128xf32>
      %c0_16 = arith.constant 0 : index
      %c0_17 = arith.constant 0 : index
      %18 = vector.load %arg7[%c0_16, %c0_17] : memref<40x128xf32, #tpu.memory_space<vmem>>, vector<40x128xf32>
      tpu.vector_store %arg7[%c0_16, %c0_17], %17 {strides = array<i32>} : memref<40x128xf32, #tpu.memory_space<vmem>>, vector<40x128xf32>,
    } else {
    }
    return
  }
  func.func @transform_0(%arg0: i32, %arg1: i32, %arg2: i32) -> (i32, i32) {
    %c0_i32 = arith.constant 0 : i32
    return %arg0, %arg2 : i32, i32
  }
  func.func @transform_1(%arg0: i32, %arg1: i32, %arg2: i32) -> (i32, i32) {
    %c0_i32 = arith.constant 0 : i32
    return %arg2, %arg1 : i32, i32
  }
  func.func @transform_2(%arg0: i32, %arg1: i32, %arg2: i32) -> (i32, i32) {
    %c0_i32 = arith.constant 0 : i32
    %c0_i32_0 = arith.constant 0 : i32
    return %c0_i32, %arg1 : i32, i32
  }
  func.func @transform_3(%arg0: i32, %arg1: i32, %arg2: i32) -> (i32, i32) {
    %c0_i32 = arith.constant 0 : i32
    return %arg0, %arg1 : i32, i32
  }
  func.func @transform_4(%arg0: i32, %arg1: i32, %arg2: i32) -> (i32, i32) {
    %c0_i32 = arith.constant 0 : i32
    return %arg0, %arg1 : i32, i32
  }
}

module attributes {stable_mosaic.version = 11 : i64} {
  func.func @_ln_mm_kernel(%arg0: i32, %arg1: i32, %arg2: memref<40x128xf32, #tpu.memory_space<vmem>>, %arg3: memref<1x128xf32, #tpu.memory_space<vmem>>, %arg4: memref<1x128xf32, #tpu.memory_space<vmem>>, %arg5: memref<128x256xbf16, #tpu.memory_space<vmem>>, %arg6: memref<1x256xf32, #tpu.memory_space<vmem>>, %arg7: memref<40x256xbf16, #tpu.memory_space<vmem>>) attributes {dimension_semantics = [#tpu.dimension_semantics<parallel>, #tpu.dimension_semantics<parallel>], iteration_bounds = array<i64: 1, 2>, scalar_prefetch = 0 : i64, scratch_operands = 0 : i64, tpu.core_type = #tpu.core_type<tc>, window_params = [{transform_indices = @transform_0, window_bounds = array<i64: 40, 128>}, {pipeline_mode = #tpu.pipeline_mode<synchronous>, transform_indices = @transform_1, window_bounds = array<i64: 1, 128>}, {pipeline_mode = #tpu.pipeline_mode<synchronous>, transform_indices = @transform_2, window_bounds = array<i64: 1, 128>}, {transform_indices = @transform_3, window_bounds = array<i64: 128, 256>}, {transform_indices = @transform_4, window_bounds = array<i64: 1, 256>}, {transform_indices = @transform_5, window_bounds = array<i64: 40, 256>}]} {
    %c0 = arith.constant 0 : index
    %c0_0 = arith.constant 0 : index
    %0 = vector.load %arg2[%c0, %c0_0] : memref<40x128xf32, #tpu.memory_space<vmem>>, vector<40x128xf32>
    %cst = arith.constant dense<0.000000e+00> : vector<40xf32>
    %1 = vector.multi_reduction <add>, %0, %cst [1] : vector<40x128xf32> to vector<40xf32>
    %2 = vector.shape_cast %1 : vector<40xf32> to vector<40x1xf32>
    %cst_1 = arith.constant 1.280000e+02 : f32
    %3 = vector.broadcast %cst_1 : f32 to vector<40x1xf32>
    %4 = arith.divf %2, %3 : vector<40x1xf32>
    %5 = vector.broadcast %4 : vector<40x1xf32> to vector<40x128xf32>
    %6 = arith.subf %0, %5 : vector<40x128xf32>
    %7 = arith.mulf %6, %6 : vector<40x128xf32>
    %cst_2 = arith.constant dense<0.000000e+00> : vector<40xf32>
    %8 = vector.multi_reduction <add>, %7, %cst_2 [1] : vector<40x128xf32> to vector<40xf32>
    %9 = vector.shape_cast %8 : vector<40xf32> to vector<40x1xf32>
    %cst_3 = arith.constant 1.280000e+02 : f32
    %10 = vector.broadcast %cst_3 : f32 to vector<40x1xf32>
    %11 = arith.divf %9, %10 : vector<40x1xf32>
    %12 = vector.broadcast %4 : vector<40x1xf32> to vector<40x128xf32>
    %13 = arith.subf %0, %12 : vector<40x128xf32>
    %cst_4 = arith.constant 9.99999974E-6 : f32
    %14 = vector.broadcast %cst_4 : f32 to vector<40x1xf32>
    %15 = arith.addf %11, %14 : vector<40x1xf32>
    %16 = math.rsqrt %15 : vector<40x1xf32>
    %17 = vector.broadcast %16 : vector<40x1xf32> to vector<40x128xf32>
    %18 = arith.mulf %13, %17 : vector<40x128xf32>
    %c0_5 = arith.constant 0 : index
    %c0_6 = arith.constant 0 : index
    %19 = vector.load %arg3[%c0_5, %c0_6] : memref<1x128xf32, #tpu.memory_space<vmem>>, vector<1x128xf32>
    %20 = vector.broadcast %19 : vector<1x128xf32> to vector<40x128xf32>
    %21 = arith.mulf %18, %20 : vector<40x128xf32>
    %c0_7 = arith.constant 0 : index
    %c0_8 = arith.constant 0 : index
    %22 = vector.load %arg4[%c0_7, %c0_8] : memref<1x128xf32, #tpu.memory_space<vmem>>, vector<1x128xf32>
    %23 = vector.broadcast %22 : vector<1x128xf32> to vector<40x128xf32>
    %24 = arith.addf %21, %23 : vector<40x128xf32>
    %25 = arith.truncf %24 : vector<40x128xf32> to vector<40x128xbf16>
    %c0_9 = arith.constant 0 : index
    %c0_10 = arith.constant 0 : index
    %26 = vector.load %arg5[%c0_9, %c0_10] : memref<128x256xbf16, #tpu.memory_space<vmem>>, vector<128x256xbf16>
    %cst_11 = arith.constant dense<0.000000e+00> : vector<40x256xf32>
    %27 = tpu.matmul %25, %26, %cst_11 {dimension_numbers = #tpu.dot_dimension_numbers<[1], [0], [0], [1], [0, 0, 1, 1], [], []>} : vector<40x128xbf16>, vector<128x256xbf16>, vector<40x256xf32> -> vector<40x256xf32>
    %c0_12 = arith.constant 0 : index
    %c0_13 = arith.constant 0 : index
    %28 = vector.load %arg6[%c0_12, %c0_13] : memref<1x256xf32, #tpu.memory_space<vmem>>, vector<1x256xf32>
    %29 = vector.broadcast %28 : vector<1x256xf32> to vector<40x256xf32>
    %30 = arith.addf %27, %29 : vector<40x256xf32>
    %cst_14 = arith.constant 1.702000e+00 : f32
    %31 = vector.broadcast %cst_14 : f32 to vector<40x256xf32>
    %32 = arith.mulf %31, %30 : vector<40x256xf32>
    %33 = arith.negf %32 : vector<40x256xf32>
    %34 = math.exp %33 : vector<40x256xf32>
    %cst_15 = arith.constant 1.000000e+00 : f32
    %35 = vector.broadcast %cst_15 : f32 to vector<40x256xf32>
    %36 = arith.addf %35, %34 : vector<40x256xf32>
    %37 = arith.divf %35, %36 : vector<40x256xf32>
    %38 = arith.mulf %30, %37 : vector<40x256xf32>
    %39 = arith.truncf %38 : vector<40x256xf32> to vector<40x256xbf16>
    %c0_16 = arith.constant 0 : index
    %c0_17 = arith.constant 0 : index
    %40 = vector.load %arg7[%c0_16, %c0_17] : memref<40x256xbf16, #tpu.memory_space<vmem>>, vector<40x256xbf16>
    tpu.vector_store %arg7[%c0_16, %c0_17], %39 {strides = array<i32>} : memref<40x256xbf16, #tpu.memory_space<vmem>>, vector<40x256xbf16>,
    return
  }
  func.func @transform_0(%arg0: i32, %arg1: i32) -> (i32, i32) {
    %c0_i32 = arith.constant 0 : i32
    %c0_i32_0 = arith.constant 0 : i32
    return %arg0, %c0_i32 : i32, i32
  }
  func.func @transform_1(%arg0: i32, %arg1: i32) -> (i32, i32) {
    %c0_i32 = arith.constant 0 : i32
    %c0_i32_0 = arith.constant 0 : i32
    %c0_i32_1 = arith.constant 0 : i32
    return %c0_i32, %c0_i32_0 : i32, i32
  }
  func.func @transform_2(%arg0: i32, %arg1: i32) -> (i32, i32) {
    %c0_i32 = arith.constant 0 : i32
    %c0_i32_0 = arith.constant 0 : i32
    %c0_i32_1 = arith.constant 0 : i32
    return %c0_i32, %c0_i32_0 : i32, i32
  }
  func.func @transform_3(%arg0: i32, %arg1: i32) -> (i32, i32) {
    %c0_i32 = arith.constant 0 : i32
    %c0_i32_0 = arith.constant 0 : i32
    return %c0_i32, %arg1 : i32, i32
  }
  func.func @transform_4(%arg0: i32, %arg1: i32) -> (i32, i32) {
    %c0_i32 = arith.constant 0 : i32
    %c0_i32_0 = arith.constant 0 : i32
    return %c0_i32, %arg1 : i32, i32
  }
  func.func @transform_5(%arg0: i32, %arg1: i32) -> (i32, i32) {
    %c0_i32 = arith.constant 0 : i32
    return %arg0, %arg1 : i32, i32
  }
}

module attributes {stable_mosaic.version = 11 : i64} {
  func.func @_mm_kernel(%arg0: i32, %arg1: i32, %arg2: i32, %arg3: memref<40x512xbf16, #tpu.memory_space<vmem>>, %arg4: memref<512x128xbf16, #tpu.memory_space<vmem>>, %arg5: memref<1x128xf32, #tpu.memory_space<vmem>>, %arg6: memref<40x128xf32, #tpu.memory_space<vmem>>, %arg7: memref<40x128xf32, #tpu.memory_space<vmem>>, %arg8: memref<40x128xf32, #tpu.memory_space<vmem>>) attributes {dimension_semantics = [#tpu.dimension_semantics<parallel>, #tpu.dimension_semantics<parallel>, #tpu.dimension_semantics<arbitrary>], iteration_bounds = array<i64: 1, 1, 1>, scalar_prefetch = 0 : i64, scratch_operands = 1 : i64, tpu.core_type = #tpu.core_type<tc>, window_params = [{transform_indices = @transform_0, window_bounds = array<i64: 40, 512>}, {transform_indices = @transform_1, window_bounds = array<i64: 512, 128>}, {transform_indices = @transform_2, window_bounds = array<i64: 1, 128>}, {transform_indices = @transform_3, window_bounds = array<i64: 40, 128>}, {transform_indices = @transform_4, window_bounds = array<i64: 40, 128>}]} {
    %c0_i32 = arith.constant 0 : i32
    %0 = arith.cmpi eq, %arg2, %c0_i32 : i32
    %1 = arith.extui %0 : i1 to i32
    %c0_i32_0 = arith.constant 0 : i32
    %2 = arith.cmpi ne, %1, %c0_i32_0 : i32
    scf.if %2 {
      %cst_10 = arith.constant 0.000000e+00 : f32
      %12 = vector.broadcast %cst_10 : f32 to vector<40x128xf32>
      %c0_11 = arith.constant 0 : index
      %c0_12 = arith.constant 0 : index
      %13 = vector.load %arg8[%c0_11, %c0_12] : memref<40x128xf32, #tpu.memory_space<vmem>>, vector<40x128xf32>
      tpu.vector_store %arg8[%c0_11, %c0_12], %12 {strides = array<i32>} : memref<40x128xf32, #tpu.memory_space<vmem>>, vector<40x128xf32>,
    } else {
    }
    %c0 = arith.constant 0 : index
    %c0_1 = arith.constant 0 : index
    %3 = vector.load %arg8[%c0, %c0_1] : memref<40x128xf32, #tpu.memory_space<vmem>>, vector<40x128xf32>
    %c0_2 = arith.constant 0 : index
    %c0_3 = arith.constant 0 : index
    %4 = vector.load %arg3[%c0_2, %c0_3] : memref<40x512xbf16, #tpu.memory_space<vmem>>, vector<40x512xbf16>
    %c0_4 = arith.constant 0 : index
    %c0_5 = arith.constant 0 : index
    %5 = vector.load %arg4[%c0_4, %c0_5] : memref<512x128xbf16, #tpu.memory_space<vmem>>, vector<512x128xbf16>
    %cst = arith.constant dense<0.000000e+00> : vector<40x128xf32>
    %6 = tpu.matmul %4, %5, %cst {dimension_numbers = #tpu.dot_dimension_numbers<[1], [0], [0], [1], [0, 0, 1, 1], [], []>} : vector<40x512xbf16>, vector<512x128xbf16>, vector<40x128xf32> -> vector<40x128xf32>
    %7 = arith.addf %3, %6 : vector<40x128xf32>
    %c0_6 = arith.constant 0 : index
    %c0_7 = arith.constant 0 : index
    %8 = vector.load %arg8[%c0_6, %c0_7] : memref<40x128xf32, #tpu.memory_space<vmem>>, vector<40x128xf32>
    tpu.vector_store %arg8[%c0_6, %c0_7], %7 {strides = array<i32>} : memref<40x128xf32, #tpu.memory_space<vmem>>, vector<40x128xf32>,
    %c0_i32_8 = arith.constant 0 : i32
    %9 = arith.cmpi eq, %arg2, %c0_i32_8 : i32
    %10 = arith.extui %9 : i1 to i32
    %c0_i32_9 = arith.constant 0 : i32
    %11 = arith.cmpi ne, %10, %c0_i32_9 : i32
    scf.if %11 {
      %c0_10 = arith.constant 0 : index
      %c0_11 = arith.constant 0 : index
      %12 = vector.load %arg8[%c0_10, %c0_11] : memref<40x128xf32, #tpu.memory_space<vmem>>, vector<40x128xf32>
      %c0_12 = arith.constant 0 : index
      %c0_13 = arith.constant 0 : index
      %13 = vector.load %arg5[%c0_12, %c0_13] : memref<1x128xf32, #tpu.memory_space<vmem>>, vector<1x128xf32>
      %14 = vector.broadcast %13 : vector<1x128xf32> to vector<40x128xf32>
      %15 = arith.addf %12, %14 : vector<40x128xf32>
      %c0_14 = arith.constant 0 : index
      %c0_15 = arith.constant 0 : index
      %16 = vector.load %arg6[%c0_14, %c0_15] : memref<40x128xf32, #tpu.memory_space<vmem>>, vector<40x128xf32>
      %17 = arith.addf %15, %16 : vector<40x128xf32>
      %c0_16 = arith.constant 0 : index
      %c0_17 = arith.constant 0 : index
      %18 = vector.load %arg7[%c0_16, %c0_17] : memref<40x128xf32, #tpu.memory_space<vmem>>, vector<40x128xf32>
      tpu.vector_store %arg7[%c0_16, %c0_17], %17 {strides = array<i32>} : memref<40x128xf32, #tpu.memory_space<vmem>>, vector<40x128xf32>,
    } else {
    }
    return
  }
  func.func @transform_0(%arg0: i32, %arg1: i32, %arg2: i32) -> (i32, i32) {
    %c0_i32 = arith.constant 0 : i32
    return %arg0, %arg2 : i32, i32
  }
  func.func @transform_1(%arg0: i32, %arg1: i32, %arg2: i32) -> (i32, i32) {
    %c0_i32 = arith.constant 0 : i32
    return %arg2, %arg1 : i32, i32
  }
  func.func @transform_2(%arg0: i32, %arg1: i32, %arg2: i32) -> (i32, i32) {
    %c0_i32 = arith.constant 0 : i32
    %c0_i32_0 = arith.constant 0 : i32
    return %c0_i32, %arg1 : i32, i32
  }
  func.func @transform_3(%arg0: i32, %arg1: i32, %arg2: i32) -> (i32, i32) {
    %c0_i32 = arith.constant 0 : i32
    return %arg0, %arg1 : i32, i32
  }
  func.func @transform_4(%arg0: i32, %arg1: i32, %arg2: i32) -> (i32, i32) {
    %c0_i32 = arith.constant 0 : i32
    return %arg0, %arg1 : i32, i32
  }
}

module attributes {stable_mosaic.version = 11 : i64} {
  func.func @_ln_kernel(%arg0: i32, %arg1: memref<8x128xf32, #tpu.memory_space<vmem>>, %arg2: memref<1x128xf32, #tpu.memory_space<vmem>>, %arg3: memref<1x128xf32, #tpu.memory_space<vmem>>, %arg4: memref<8x128xf32, #tpu.memory_space<vmem>>) attributes {dimension_semantics = [#tpu.dimension_semantics<parallel>], iteration_bounds = array<i64: 1>, scalar_prefetch = 0 : i64, scratch_operands = 0 : i64, tpu.core_type = #tpu.core_type<tc>, window_params = [{transform_indices = @transform_0, window_bounds = array<i64: 8, 128>}, {pipeline_mode = #tpu.pipeline_mode<synchronous>, transform_indices = @transform_1, window_bounds = array<i64: 1, 128>}, {pipeline_mode = #tpu.pipeline_mode<synchronous>, transform_indices = @transform_2, window_bounds = array<i64: 1, 128>}, {transform_indices = @transform_3, window_bounds = array<i64: 8, 128>}]} {
    %c0 = arith.constant 0 : index
    %c0_0 = arith.constant 0 : index
    %0 = vector.load %arg1[%c0, %c0_0] : memref<8x128xf32, #tpu.memory_space<vmem>>, vector<8x128xf32>
    %cst = arith.constant dense<0.000000e+00> : vector<8xf32>
    %1 = vector.multi_reduction <add>, %0, %cst [1] : vector<8x128xf32> to vector<8xf32>
    %2 = vector.shape_cast %1 : vector<8xf32> to vector<8x1xf32>
    %cst_1 = arith.constant 1.280000e+02 : f32
    %3 = vector.broadcast %cst_1 : f32 to vector<8x1xf32>
    %4 = arith.divf %2, %3 : vector<8x1xf32>
    %5 = vector.broadcast %4 : vector<8x1xf32> to vector<8x128xf32>
    %6 = arith.subf %0, %5 : vector<8x128xf32>
    %7 = arith.mulf %6, %6 : vector<8x128xf32>
    %cst_2 = arith.constant dense<0.000000e+00> : vector<8xf32>
    %8 = vector.multi_reduction <add>, %7, %cst_2 [1] : vector<8x128xf32> to vector<8xf32>
    %9 = vector.shape_cast %8 : vector<8xf32> to vector<8x1xf32>
    %cst_3 = arith.constant 1.280000e+02 : f32
    %10 = vector.broadcast %cst_3 : f32 to vector<8x1xf32>
    %11 = arith.divf %9, %10 : vector<8x1xf32>
    %12 = vector.broadcast %4 : vector<8x1xf32> to vector<8x128xf32>
    %13 = arith.subf %0, %12 : vector<8x128xf32>
    %cst_4 = arith.constant 9.99999974E-6 : f32
    %14 = vector.broadcast %cst_4 : f32 to vector<8x1xf32>
    %15 = arith.addf %11, %14 : vector<8x1xf32>
    %16 = math.rsqrt %15 : vector<8x1xf32>
    %17 = vector.broadcast %16 : vector<8x1xf32> to vector<8x128xf32>
    %18 = arith.mulf %13, %17 : vector<8x128xf32>
    %c0_5 = arith.constant 0 : index
    %c0_6 = arith.constant 0 : index
    %19 = vector.load %arg2[%c0_5, %c0_6] : memref<1x128xf32, #tpu.memory_space<vmem>>, vector<1x128xf32>
    %20 = vector.broadcast %19 : vector<1x128xf32> to vector<8x128xf32>
    %21 = arith.mulf %18, %20 : vector<8x128xf32>
    %c0_7 = arith.constant 0 : index
    %c0_8 = arith.constant 0 : index
    %22 = vector.load %arg3[%c0_7, %c0_8] : memref<1x128xf32, #tpu.memory_space<vmem>>, vector<1x128xf32>
    %23 = vector.broadcast %22 : vector<1x128xf32> to vector<8x128xf32>
    %24 = arith.addf %21, %23 : vector<8x128xf32>
    %c0_9 = arith.constant 0 : index
    %c0_10 = arith.constant 0 : index
    %25 = vector.load %arg4[%c0_9, %c0_10] : memref<8x128xf32, #tpu.memory_space<vmem>>, vector<8x128xf32>
    tpu.vector_store %arg4[%c0_9, %c0_10], %24 {strides = array<i32>} : memref<8x128xf32, #tpu.memory_space<vmem>>, vector<8x128xf32>,
    return
  }
  func.func @transform_0(%arg0: i32) -> (i32, i32) {
    %c0_i32 = arith.constant 0 : i32
    %c0_i32_0 = arith.constant 0 : i32
    return %arg0, %c0_i32 : i32, i32
  }
  func.func @transform_1(%arg0: i32) -> (i32, i32) {
    %c0_i32 = arith.constant 0 : i32
    %c0_i32_0 = arith.constant 0 : i32
    %c0_i32_1 = arith.constant 0 : i32
    return %c0_i32, %c0_i32_0 : i32, i32
  }
  func.func @transform_2(%arg0: i32) -> (i32, i32) {
    %c0_i32 = arith.constant 0 : i32
    %c0_i32_0 = arith.constant 0 : i32
    %c0_i32_1 = arith.constant 0 : i32
    return %c0_i32, %c0_i32_0 : i32, i32
  }
  func.func @transform_3(%arg0: i32) -> (i32, i32) {
    %c0_i32 = arith.constant 0 : i32
    %c0_i32_0 = arith.constant 0 : i32
    return %arg0, %c0_i32 : i32, i32
  }
}

</mosaic_0001>

<bundles_post_ra>
// kernel: _lambda_.14
= control target key start
LH: loop header
LB: loop body
LE: loop exit
PB: predicated region body
PF: predicated region fallthrough
CT: control target
= control target key end

     0   :  { %v168_v5 = vmov 128.0   ;;  %s250_s0 = inlined_call_operand.vmem [shape: f32[40,128], index: 0, kind: input, shape index: {}]   ;;  %s251_s1 = inlined_call_operand.vmem [shape: f32[1,128], index: 1, kind: input, shape index: {}]   ;;  %s252_s2 = inlined_call_operand.vmem [shape: f32[1,128], index: 2, kind: input, shape index: {}]   ;;  %s253_s3 = inlined_call_operand.vmem [shape: f32[40,128], index: 3, kind: output, shape index: {}]  }
   0x1   :  { %v16_v0 = vld [vmem:[%s250_s0 + $0x10] sm:$0xff]  ;;  %v14_v1 = vld [vmem:[%s250_s0] sm:$0xff]  ;;  %v17_v3 = vld [vmem:[%s250_s0 + $0x18] sm:$0xff]  ;;  %156 = vrcp.f32 %v168_v5 }
   0x2   :  { %23 = vadd.xlane.f32.xlu1 %v16_v0  ;;  %19 = vadd.xlane.f32.xlu0 %v14_v1  ;;  %v18_v2 = vld [vmem:[%s250_s0 + $0x20] sm:$0xff]  ;;  %v15_v4 = vld [vmem:[%s250_s0 + $0x8] sm:$0xff] }
   0x3   :  { %27 = vadd.xlane.f32.xlu2 %v18_v2  ;;  %v154_v61 = vld [vmem:[%s251_s1] ss:$0 sm:$0xff] }
   0x7   :  { %v157_v6 = vpop.eup %156 }
   0x8   :  { %v30_v7 = vmul.f32 128.0, %v157_v6  ;;  %vm34_vm0 = vweird.f32 %v157_v6 }
   0xa   :  { %25 = vadd.xlane.f32.xlu1 %v17_v3  ;;  %21 = vadd.xlane.f32.xlu0 %v15_v4  ;;  %v31_v8 = vsub.f32 1.0, %v30_v7 }
   0xc   :  { %v32_v9 = vmul.f32 %v157_v6, %v31_v8 }
   0xe   :  { %v33_v10 = vadd.f32 %v157_v6, %v32_v9 }
  0x10   :  { %v35_v11 = vsel %vm34_vm0, %v157_v6, %v33_v10 }
  0x75   :  { %v24_v12 = vpop.xlane.xlu1 %23  ;;  %v20_v13 = vpop.xlane.xlu0 %19 }
  0x76   :  { %v38_v14 = vmul.f32 %v35_v11, %v24_v12  ;;  %v36_v15 = vmul.f32 %v35_v11, %v20_v13  ;;  %v28_v20 = vpop.xlane.xlu2 %27 }
  0x77   :  { %v40_v27 = vmul.f32 %v35_v11, %v28_v20 }
  0x78   :  { %v204_v16 = vsub.f32 %v16_v0, %v38_v14  ;;  %v206_v17 = vsub.f32 %v14_v1, %v36_v15 }
  0x79   :  { %v220_v30 = vsub.f32 %v18_v2, %v40_v27  ;;  %v155_v2 = vld [vmem:[%s252_s2] ss:$0 sm:$0xff] }
  0x7a   :  { %v48_v18 = vmul.f32 %v204_v16, %v204_v16  ;;  %v46_v19 = vmul.f32 %v206_v17, %v206_v17 }
  0x7b   :  { %v50_v31 = vmul.f32 %v220_v30, %v220_v30 }
  0x7c   :  { %55 = vadd.xlane.f32.xlu1 %v48_v18  ;;  %51 = vadd.xlane.f32.xlu2 %v46_v19 }
  0x7d   :  { %v26_v21 = vpop.xlane.xlu1 %25  ;;  %v22_v22 = vpop.xlane.xlu0 %21 }
  0x7e   :  { %v39_v23 = vmul.f32 %v35_v11, %v26_v21  ;;  %v37_v24 = vmul.f32 %v35_v11, %v22_v22 }
  0x80   :  { %v212_v25 = vsub.f32 %v17_v3, %v39_v23  ;;  %v214_v26 = vsub.f32 %v15_v4, %v37_v24 }
  0x82   :  { %v49_v28 = vmul.f32 %v212_v25, %v212_v25  ;;  %v47_v29 = vmul.f32 %v214_v26, %v214_v26 }
  0x84   :  { %57 = vadd.xlane.f32.xlu2 %v49_v28  ;;  %53 = vadd.xlane.f32.xlu0 %v47_v29 }
  0x8c   :  { %59 = vadd.xlane.f32.xlu0 %v50_v31 }
  0xef   :  { %v56_v32 = vpop.xlane.xlu1 %55  ;;  %v52_v33 = vpop.xlane.xlu2 %51 }
  0xf0   :  { %v63_v34 = vmul.f32 %v56_v32, %v35_v11  ;;  %v61_v35 = vmul.f32 %v52_v33, %v35_v11 }
  0xf2   :  { %v68_v36 = vadd.f32 1e-05, %v63_v34  ;;  %v66_v37 = vadd.f32 1e-05, %v61_v35 }
  0xf4   :  { %158 = vrsqrt.f32 %v68_v36  ;;  %vm97_vm1 = vweird.f32 %v68_v36  ;;  %vm77_vm5 = vweird.f32 %v66_v37 }
  0xf5   :  { %160 = vrsqrt.f32 %v66_v37 }
  0xf7   :  { %v58_v38 = vpop.xlane.xlu2 %57  ;;  %v54_v39 = vpop.xlane.xlu0 %53 }
  0xf8   :  { %v64_v40 = vmul.f32 %v58_v38, %v35_v11  ;;  %v62_v41 = vmul.f32 %v54_v39, %v35_v11 }
  0xfa   :  { %v159_v42 = vpop.eup %158  ;;  %v69_v43 = vadd.f32 1e-05, %v64_v40  ;;  %v67_v44 = vadd.f32 1e-05, %v62_v41 }
  0xfb   :  { %v161_v45 = vpop.eup %160  ;;  %v92_v46 = vmul.f32 %v159_v42, %v68_v36  ;;  %vm98_vm2 = vweird.f32 %v159_v42 }
  0xfc   :  { %v72_v47 = vmul.f32 %v161_v45, %v66_v37  ;;  %162 = vrsqrt.f32 %v69_v43  ;;  %vm78_vm3 = vweird.f32 %v161_v45  ;;  %vm99_vm4 = vmor %vm97_vm1, %vm98_vm2  ;;  %vm107_vm7 = vweird.f32 %v69_v43 }
  0xfd   :  { %v93_v48 = vmul.f32 %v159_v42, %v92_v46  ;;  %164 = vrsqrt.f32 %v67_v44  ;;  %vm79_vm6 = vmor %vm77_vm5, %vm78_vm3  ;;  %vm87_vm11 = vweird.f32 %v67_v44 }
  0xfe   :  { %v73_v49 = vmul.f32 %v161_v45, %v72_v47 }
  0xff   :  { %v94_v50 = vmul.f32 0.5, %v93_v48  ;;  %v60_v51 = vpop.xlane.xlu0 %59 }
 0x100   :  { %v74_v52 = vmul.f32 0.5, %v73_v49  ;;  %v65_v53 = vmul.f32 %v60_v51, %v35_v11 }
 0x101   :  { %v95_v54 = vsub.f32 1.5, %v94_v50 }
 0x102   :  { %v163_v55 = vpop.eup %162  ;;  %v75_v56 = vsub.f32 1.5, %v74_v52  ;;  %v70_v57 = vadd.f32 1e-05, %v65_v53 }
 0x103   :  { %v165_v58 = vpop.eup %164  ;;  %v96_v59 = vmul.f32 %v159_v42, %v95_v54  ;;  %v102_v60 = vmul.f32 %v163_v55, %v69_v43  ;;  %vm108_vm8 = vweird.f32 %v163_v55 }
 0x104   :  { %v76_v62 = vmul.f32 %v161_v45, %v75_v56  ;;  %v82_v63 = vmul.f32 %v165_v58, %v67_v44  ;;  %166 = vrsqrt.f32 %v70_v57  ;;  %vm88_vm9 = vweird.f32 %v165_v58  ;;  %vm109_vm10 = vmor %vm107_vm7, %vm108_vm8 }
 0x105   :  { %v100_v0 = vsel %vm99_vm4, %v159_v42, %v96_v59  ;;  %v103_v1 = vmul.f32 %v163_v55, %v102_v60  ;;  %vm89_vm12 = vmor %vm87_vm11, %vm88_vm9  ;;  %vm117_vm14 = vweird.f32 %v70_v57 }
 0x106   :  { %v123_v3 = vmul.f32 %v100_v0, %v204_v16  ;;  %v80_v4 = vsel %vm79_vm6, %v161_v45, %v76_v62  ;;  %v83_v5 = vmul.f32 %v165_v58, %v82_v63 }
 0x107   :  { %v121_v6 = vmul.f32 %v80_v4, %v206_v17  ;;  %v104_v7 = vmul.f32 0.5, %v103_v1 }
 0x108   :  { %v132_v8 = vmul.f32 %v154_v61, %v123_v3  ;;  %v84_v9 = vmul.f32 0.5, %v83_v5 }
 0x109   :  { %v130_v10 = vmul.f32 %v154_v61, %v121_v6  ;;  %v105_v11 = vsub.f32 1.5, %v104_v7 }
 0x10a   :  { %v167_v12 = vpop.eup %166  ;;  %v141_v13 = vadd.f32 %v155_v2, %v132_v8  ;;  %v85_v14 = vsub.f32 1.5, %v84_v9 }
 0x10b   :  { %v139_v15 = vadd.f32 %v155_v2, %v130_v10  ;;  %v106_v18 = vmul.f32 %v163_v55, %v105_v11  ;;  %v112_v19 = vmul.f32 %v167_v12, %v70_v57  ;;  %vm118_vm13 = vweird.f32 %v167_v12 }
 0x10c   :  { %146 = vst [vmem:[%s253_s3 + $0x10] sm:$0xff] %v141_v13  ;;  %v86_v16 = vmul.f32 %v165_v58, %v85_v14  ;;  %vm119_vm15 = vmor %vm117_vm14, %vm118_vm13 }
 0x10d   :  { %144 = vst [vmem:[%s253_s3] sm:$0xff] %v139_v15  ;;  %v110_v17 = vsel %vm109_vm10, %v163_v55, %v106_v18  ;;  %v113_v20 = vmul.f32 %v167_v12, %v112_v19 }
 0x10e   :  { %v124_v21 = vmul.f32 %v110_v17, %v212_v25  ;;  %v90_v22 = vsel %vm89_vm12, %v165_v58, %v86_v16 }
 0x10f   :  { %v122_v23 = vmul.f32 %v90_v22, %v214_v26  ;;  %v114_v24 = vmul.f32 0.5, %v113_v20 }
 0x110   :  { %v133_v27 = vmul.f32 %v154_v61, %v124_v21 }
 0x111   :  { %v131_v28 = vmul.f32 %v154_v61, %v122_v23  ;;  %v115_v29 = vsub.f32 1.5, %v114_v24 }
 0x112   :  { %v142_v31 = vadd.f32 %v155_v2, %v133_v27 }
 0x113   :  { %v140_v32 = vadd.f32 %v155_v2, %v131_v28  ;;  %v116_v33 = vmul.f32 %v167_v12, %v115_v29 }
 0x114   :  { %147 = vst [vmem:[%s253_s3 + $0x18] sm:$0xff] %v142_v31 }
 0x115   :  { %145 = vst [vmem:[%s253_s3 + $0x8] sm:$0xff] %v140_v32  ;;  %v120_v25 = vsel %vm119_vm15, %v167_v12, %v116_v33 }
 0x116   :  { %v125_v26 = vmul.f32 %v120_v25, %v220_v30 }
 0x118   :  { %v134_v34 = vmul.f32 %v154_v61, %v125_v26 }
 0x11a   :  { %v143_v35 = vadd.f32 %v155_v2, %v134_v34 }
 0x11c   :  { %148 = vst [vmem:[%s253_s3 + $0x20] sm:$0xff] %v143_v35 }

// kernel: _lambda_.15
= control target key start
LH: loop header
LB: loop body
LE: loop exit
PB: predicated region body
PF: predicated region fallthrough
CT: control target
= control target key end

     0   :  { %s974_s18 = smov 0   ;;  %s976_s19 = smov 0   ;;  %s1139_s0 = inlined_call_operand.vmem [shape: f32[40,128], index: 0, kind: input, shape index: {}]   ;;  %s1140_s1 = inlined_call_operand.vmem [shape: f32[1,128], index: 1, kind: input, shape index: {}]   ;;  %s1141_s2 = inlined_call_operand.vmem [shape: f32[1,128], index: 2, kind: input, shape index: {}]   ;;  %s1142_s3 = inlined_call_operand.vmem [shape: bf16[128,384], index: 3, kind: input, shape index: {}]   ;;  %s1143_s4 = inlined_call_operand.vmem [shape: f32[1,384], index: 4, kind: input, shape index: {}]   ;;  %s1144_s5 = inlined_call_operand.vmem [shape: bf16[40,384], index: 5, kind: output, shape index: {}]  }
   0x1   :  { %s978_s20 = smov 0   ;;  %s980_s21 = smov 0  }
   0x2   :  { %s982_s22 = smov 0  }
   0x3 LB: > { %s24_s23 = sadd.s32 1, %s937_s21  ;;  %s767_s24 = sadd.s32 4294967295, %s941_s22   ;;  %s941_s22 = sphi %s982_s22, %s15_s22   ;;  %s937_s21 = sphi %s980_s21, %s1149_s21   ;;  %s933_s20 = sphi %s978_s20, %s1148_s20   ;;  %s929_s19 = sphi %s976_s19, %s1147_s19   ;;  %s925_s18 = sphi %s974_s18, %s1146_s18  }
   0x4   : > { %p25_p0 = scmp.ge.s32.totalorder %s24_s23, 3  ;;  %p109_p1 = scmp.ne.s32.totalorder %s929_s19, %s925_s18 }
   0x5   : > { %p110_p2 = scmp.eq.s32.totalorder %s941_s22, 0  ;;  %p167_p4 = scmp.eq.s32.totalorder %s767_s24, 2 }
   0x6   : > { %s1151_s23 = smov (%p25_p0, %s24_s23), 0  ;;  %s102_s26 = sadd.s32 1, %s929_s19 }
   0x7   : > { %p111_p3 = por %p110_p2, %p109_p1  ;;  %s99_s25 = ssub.s32 %s937_s21, %s1151_s23 }
   0x8   : > { %p100_p5 = scmp.eq.s32.totalorder %s99_s25, 0  ;;  %p1009_p6 = por %p167_p4, %p109_p1 }
   0x9   : > { %p771_p7 = scmp.ge.s32.totalorder %s941_s22, 3 }
   0xa   : > { %s1014_s28 = scalar_select %p100_p5, %s929_s19, %s102_s26  }
   0xb   : > { %204 = sbr.rel (%p771_p7) target bundleno = 36 (0x24), region = 28 }
  0x10   : > { %207 = sbr.rel (!%p111_p3) target bundleno = 36 (0x24), region = 32  ;;  %s209_s29 = sand.u32 (%p111_p3), 1, %s929_s19  }
  0x11   : > { %s773_s30 = sshll.u32 (%p111_p3), %s937_s21, 2  ;;  %s772_s6 = sshll.u32 (%p111_p3), %s209_s29, 6 }
  0x12   : > { %s1022_s9 = scalar_lea.vmem (%p111_p3), %s1142_s3, %s773_s30  ;;  %s211_s10 = scalar_lea.vmem (%p111_p3), [#allocation2], %s772_s6 }
  0x13   : > { %v230_v0 = vld [vmem:[%s1022_s9] sm:$0xf] (%p111_p3)  ;;  %v232_v1 = vld [vmem:[%s1022_s9 + $0xc] sm:$0xf] (%p111_p3)  ;;  %v234_v2 = vld [vmem:[%s1022_s9 + $0x18] sm:$0xf] (%p111_p3) }
  0x14   : > { %231 = vst [vmem:[%s211_s10] sm:$0xf] (%p111_p3), %v230_v0  ;;  %v236_v3 = vld [vmem:[%s1022_s9 + $0x24] sm:$0xf] (%p111_p3)  ;;  %v238_v4 = vld [vmem:[%s1022_s9 + $0x30] sm:$0xf] (%p111_p3) }
  0x15   : > { %233 = vst [vmem:[%s211_s10 + $0x4] sm:$0xf] %v232_v1  ;;  %v240_v5 = vld [vmem:[%s1022_s9 + $0x3c] sm:$0xf]  ;;  %v242_v6 = vld [vmem:[%s1022_s9 + $0x48] sm:$0xf] }
  0x16   : > { %235 = vst [vmem:[%s211_s10 + $0x8] sm:$0xf] %v234_v2  ;;  %v244_v7 = vld [vmem:[%s1022_s9 + $0x54] sm:$0xf]  ;;  %v246_v8 = vld [vmem:[%s1022_s9 + $0x60] sm:$0xf] }
  0x17   : > { %237 = vst [vmem:[%s211_s10 + $0xc] sm:$0xf] %v236_v3  ;;  %v248_v9 = vld [vmem:[%s1022_s9 + $0x6c] sm:$0xf]  ;;  %v250_v10 = vld [vmem:[%s1022_s9 + $0x78] sm:$0xf] }
  0x18   : > { %239 = vst [vmem:[%s211_s10 + $0x10] sm:$0xf] %v238_v4  ;;  %v252_v11 = vld [vmem:[%s1022_s9 + $0x84] sm:$0xf]  ;;  %v254_v12 = vld [vmem:[%s1022_s9 + $0x90] sm:$0xf] }
  0x19   : > { %241 = vst [vmem:[%s211_s10 + $0x14] sm:$0xf] %v240_v5  ;;  %v256_v13 = vld [vmem:[%s1022_s9 + $0x9c] sm:$0xf]  ;;  %v258_v14 = vld [vmem:[%s1022_s9 + $0xa8] sm:$0xf] }
  0x1a   : > { %243 = vst [vmem:[%s211_s10 + $0x18] sm:$0xf] %v242_v6  ;;  %v260_v15 = vld [vmem:[%s1022_s9 + $0xb4] sm:$0xf] }
  0x1b   : > { %245 = vst [vmem:[%s211_s10 + $0x1c] sm:$0xf] %v244_v7 }
  0x1c   : > { %247 = vst [vmem:[%s211_s10 + $0x20] sm:$0xf] %v246_v8 }
  0x1d   : > { %249 = vst [vmem:[%s211_s10 + $0x24] sm:$0xf] %v248_v9 }
  0x1e   : > { %251 = vst [vmem:[%s211_s10 + $0x28] sm:$0xf] %v250_v10 }
  0x1f   : > { %253 = vst [vmem:[%s211_s10 + $0x2c] sm:$0xf] %v252_v11 }
  0x20   : > { %255 = vst [vmem:[%s211_s10 + $0x30] sm:$0xf] %v254_v12 }
  0x21   : > { %257 = vst [vmem:[%s211_s10 + $0x34] sm:$0xf] %v256_v13 }
  0x22   : > { %259 = vst [vmem:[%s211_s10 + $0x38] sm:$0xf] %v258_v14 }
  0x23   : > { %261 = vst [vmem:[%s211_s10 + $0x3c] sm:$0xf] %v260_v15 }
  0x24 PF: > { %p774_p8 = scmp.ge.s32.totalorder %s941_s22, 1  ;;  %p322_p9 = scmp.lt.s32.totalorder %s941_s22, 4 }
  0x26   : > { %p323_p10 = pnand %p774_p8, %p322_p9 }
  0x27   : > { %p369_p11 = scmp.lt.s32.totalorder (!%p323_p10), %s933_s20, 2  ;;  %s329_s8 = sand.u32 (!%p323_p10), 1, %s925_s18  }
  0x28   : > { %326 = sbr.rel (%p323_p10) target bundleno = 478 (0x1de), region = 77  ;;  %s775_s9 = sshll.u32 (!%p323_p10), %s329_s8, 6 }
  0x29   : > { %s331_s10 = scalar_lea.vmem (!%p323_p10), [#allocation2], %s775_s9  ;;  %s846_s17 = smul.u32 (!%p323_p10), 20, %s329_s8 }
  0x2b   : > { %s362_s24 = scalar_lea.vmem (!%p323_p10), [#allocation3], %s846_s17 }
  0x2d   : > { %v377_v16 = vld [vmem:[%s1139_s0 + $0x20] sm:$0xff]  ;;  %v374_v17 = vld [vmem:[%s1139_s0 + $0x8] sm:$0xff]  ;;  %v376_v18 = vld [vmem:[%s1139_s0 + $0x18] sm:$0xff]  ;;  %v943_v21 = vmov 128.0   ;;  %s1086_s29 = scalar_select %p369_p11, %s933_s20, 2 }
  0x2e   : > { %386 = vadd.xlane.f32.xlu0 %v377_v16  ;;  %380 = vadd.xlane.f32.xlu1 %v374_v17  ;;  %v375_v19 = vld [vmem:[%s1139_s0 + $0x10] sm:$0xff]  ;;  %v373_v20 = vld [vmem:[%s1139_s0] sm:$0xff]  ;;  %891 = vrcp.f32 %v943_v21  ;;  %v818_v48 = vld [vmem:[%s331_s10 + $0x38] sm:$0xff]  ;;  %s808_s18 = sshll.u32 (%p1009_p6), %s933_s20, 2 }
  0x2f   : > { %384 = vadd.xlane.f32.xlu2 %v376_v18  ;;  %s371_s7 = scalar_lea.vmem %s1143_s4, %s1086_s29  ;;  %831 = vmatpush.bf16.msra.mxu2 %v818_v48  ;;  %v817_v49 = vld [vmem:[%s331_s10 + $0x30] sm:$0xff]  ;;  %v816_v50 = vld [vmem:[%s331_s10 + $0x28] sm:$0xff]  ;;  %v815_v51 = vld [vmem:[%s331_s10 + $0x20] sm:$0xff]  ;;  %s618_s29 = scalar_lea.vmem (%p1009_p6), %s1144_s5, %s808_s18 }
  0x30   : > { %574 = vmatpush.bf16.msra.mxu0 %v818_v48  ;;  %830 = vmatpush.bf16.msra.mxu1 %v818_v48  ;;  %v814_v52 = vld [vmem:[%s331_s10 + $0x18] sm:$0xff]  ;;  %v813_v53 = vld [vmem:[%s331_s10 + $0x10] sm:$0xff]  ;;  %v812_v54 = vld [vmem:[%s331_s10 + $0x8] sm:$0xff] }
  0x31   : > { %v811_v55 = vld [vmem:[%s331_s10] sm:$0xff] }
  0x33   : > { %833 = vmatpush.bf16.msra.mxu2 %v817_v49 }
  0x34   : > { %v892_v22 = vpop.eup %891  ;;  %575 = vmatpush.bf16.msra.mxu0 %v817_v49  ;;  %832 = vmatpush.bf16.msra.mxu1 %v817_v49 }
  0x35   : > { %v389_v23 = vmul.f32 128.0, %v892_v22  ;;  %vm393_vm0 = vweird.f32 %v892_v22 }
  0x36   : > { %382 = vadd.xlane.f32.xlu1 %v375_v19  ;;  %378 = vadd.xlane.f32.xlu0 %v373_v20 }
  0x37   : > { %v390_v24 = vsub.f32 1.0, %v389_v23  ;;  %835 = vmatpush.bf16.msra.mxu2 %v816_v50  ;;  %v888_v23 = vld [vmem:[%s1140_s1] ss:$0 sm:$0xff] }
  0x38   : > { %576 = vmatpush.bf16.msra.mxu0 %v816_v50  ;;  %834 = vmatpush.bf16.msra.mxu1 %v816_v50 }
  0x39   : > { %v391_v25 = vmul.f32 %v892_v22, %v390_v24 }
  0x3b   : > { %v392_v26 = vadd.f32 %v892_v22, %v391_v25  ;;  %837 = vmatpush.bf16.msra.mxu2 %v815_v51 }
  0x3c   : > { %577 = vmatpush.bf16.msra.mxu0 %v815_v51  ;;  %836 = vmatpush.bf16.msra.mxu1 %v815_v51 }
  0x3d   : > { %v1057_v27 = vsel %vm393_vm0, %v892_v22, %v392_v26 }
  0x3f   : > { %839 = vmatpush.bf16.msra.mxu2 %v814_v52 }
  0x40   : > { %578 = vmatpush.bf16.msra.mxu0 %v814_v52  ;;  %838 = vmatpush.bf16.msra.mxu1 %v814_v52 }
  0x43   : > { %841 = vmatpush.bf16.msra.mxu2 %v813_v53 }
  0x44   : > { %579 = vmatpush.bf16.msra.mxu0 %v813_v53  ;;  %840 = vmatpush.bf16.msra.mxu1 %v813_v53 }
  0x47   : > { %843 = vmatpush.bf16.msra.mxu2 %v812_v54 }
  0x48   : > { %580 = vmatpush.bf16.msra.mxu0 %v812_v54  ;;  %842 = vmatpush.bf16.msra.mxu1 %v812_v54 }
  0x4b   : > { %845 = vmatpush.bf16.msra.mxu2 %v811_v55 }
  0x4c   : > { %581 = vmatpush.bf16.msra.mxu0 %v811_v55  ;;  %844 = vmatpush.bf16.msra.mxu1 %v811_v55 }
  0xa1   : > { %v387_v28 = vpop.xlane.xlu0 %386  ;;  %v381_v29 = vpop.xlane.xlu1 %380 }
  0xa2   : > { %v399_v30 = vmul.f32 %v1057_v27, %v387_v28  ;;  %v396_v31 = vmul.f32 %v1057_v27, %v381_v29  ;;  %v385_v36 = vpop.xlane.xlu2 %384  ;;  %v889_v28 = vld [vmem:[%s1141_s2] ss:$0 sm:$0xff] }
  0xa3   : > { %v398_v43 = vmul.f32 %v1057_v27, %v385_v36 }
  0xa4   : > { %v1061_v32 = vsub.f32 %v377_v16, %v399_v30  ;;  %v1063_v33 = vsub.f32 %v374_v17, %v396_v31 }
  0xa5   : > { %v1080_v46 = vsub.f32 %v376_v18, %v398_v43 }
  0xa6   : > { %v409_v34 = vmul.f32 %v1061_v32, %v1061_v32  ;;  %v406_v35 = vmul.f32 %v1063_v33, %v1063_v33 }
  0xa7   : > { %v408_v47 = vmul.f32 %v1080_v46, %v1080_v46 }
  0xa8   : > { %418 = vadd.xlane.f32.xlu2 %v409_v34  ;;  %412 = vadd.xlane.f32.xlu1 %v406_v35 }
  0xa9   : > { %v383_v37 = vpop.xlane.xlu1 %382  ;;  %v379_v38 = vpop.xlane.xlu0 %378 }
  0xaa   : > { %v397_v39 = vmul.f32 %v1057_v27, %v383_v37  ;;  %v395_v40 = vmul.f32 %v1057_v27, %v379_v38 }
  0xac   : > { %v1071_v41 = vsub.f32 %v375_v19, %v397_v39  ;;  %v1073_v42 = vsub.f32 %v373_v20, %v395_v40 }
  0xae   : > { %v407_v44 = vmul.f32 %v1071_v41, %v1071_v41  ;;  %v405_v45 = vmul.f32 %v1073_v42, %v1073_v42 }
  0xb0   : > { %414 = vadd.xlane.f32.xlu2 %v407_v44  ;;  %410 = vadd.xlane.f32.xlu0 %v405_v45 }
  0xb8   : > { %416 = vadd.xlane.f32.xlu0 %v408_v47 }
 0x11b   : > { %v419_v56 = vpop.xlane.xlu2 %418  ;;  %v413_v57 = vpop.xlane.xlu1 %412 }
 0x11c   : > { %v424_v58 = vmul.f32 %v419_v56, %v1057_v27  ;;  %v421_v59 = vmul.f32 %v413_v57, %v1057_v27 }
 0x11e   : > { %v429_v60 = vadd.f32 1e-05, %v424_v58  ;;  %v426_v61 = vadd.f32 1e-05, %v421_v59 }
 0x120   : > { %893 = vrsqrt.f32 %v429_v60  ;;  %vm476_vm2 = vweird.f32 %v429_v60  ;;  %vm446_vm3 = vweird.f32 %v426_v61 }
 0x121   : > { %895 = vrsqrt.f32 %v426_v61 }
 0x123   : > { %v415_v62 = vpop.xlane.xlu2 %414  ;;  %v411_v63 = vpop.xlane.xlu0 %410 }
 0x124   : > { %v422_v0 = vmul.f32 %v415_v62, %v1057_v27  ;;  %v420_v1 = vmul.f32 %v411_v63, %v1057_v27 }
 0x126   : > { %v894_v2 = vpop.eup %893  ;;  %v427_v3 = vadd.f32 1e-05, %v422_v0  ;;  %v425_v4 = vadd.f32 1e-05, %v420_v1 }
 0x127   : > { %v896_v5 = vpop.eup %895  ;;  %v471_v6 = vmul.f32 %v894_v2, %v429_v60  ;;  %vm477_vm1 = vweird.f32 %v894_v2 }
 0x128   : > { %v441_v7 = vmul.f32 %v896_v5, %v426_v61  ;;  %897 = vrsqrt.f32 %v427_v3  ;;  %vm478_vm4 = vmor %vm476_vm2, %vm477_vm1  ;;  %vm447_vm5 = vweird.f32 %v896_v5  ;;  %vm456_vm7 = vweird.f32 %v427_v3 }
 0x129   : > { %v472_v8 = vmul.f32 %v894_v2, %v471_v6  ;;  %899 = vrsqrt.f32 %v425_v4  ;;  %vm448_vm6 = vmor %vm446_vm3, %vm447_vm5  ;;  %vm436_vm10 = vweird.f32 %v425_v4 }
 0x12a   : > { %v442_v9 = vmul.f32 %v896_v5, %v441_v7 }
 0x12b   : > { %v473_v10 = vmul.f32 0.5, %v472_v8  ;;  %v417_v11 = vpop.xlane.xlu0 %416 }
 0x12c   : > { %v443_v12 = vmul.f32 0.5, %v442_v9  ;;  %v423_v13 = vmul.f32 %v417_v11, %v1057_v27 }
 0x12d   : > { %v474_v14 = vsub.f32 1.5, %v473_v10 }
 0x12e   : > { %v898_v15 = vpop.eup %897  ;;  %v444_v16 = vsub.f32 1.5, %v443_v12  ;;  %v428_v17 = vadd.f32 1e-05, %v423_v13 }
 0x12f   : > { %v900_v18 = vpop.eup %899  ;;  %v475_v19 = vmul.f32 %v894_v2, %v474_v14  ;;  %v451_v20 = vmul.f32 %v898_v15, %v427_v3  ;;  %vm457_vm9 = vweird.f32 %v898_v15 }
 0x130   : > { %v445_v21 = vmul.f32 %v896_v5, %v444_v16  ;;  %v431_v22 = vmul.f32 %v900_v18, %v425_v4  ;;  %901 = vrsqrt.f32 %v428_v17  ;;  %vm437_vm8 = vweird.f32 %v900_v18  ;;  %vm458_vm12 = vmor %vm456_vm7, %vm457_vm9 }
 0x131   : > { %v452_v24 = vmul.f32 %v898_v15, %v451_v20  ;;  %v479_v25 = vsel %vm478_vm4, %v894_v2, %v475_v19  ;;  %vm438_vm11 = vmor %vm436_vm10, %vm437_vm8  ;;  %vm466_vm14 = vweird.f32 %v428_v17 }
 0x132   : > { %v432_v26 = vmul.f32 %v900_v18, %v431_v22  ;;  %v484_v27 = vmul.f32 %v479_v25, %v1061_v32  ;;  %v449_v34 = vsel %vm448_vm6, %v896_v5, %v445_v21 }
 0x133   : > { %v453_v29 = vmul.f32 0.5, %v452_v24  ;;  %v481_v32 = vmul.f32 %v449_v34, %v1063_v33 }
 0x134   : > { %v433_v30 = vmul.f32 0.5, %v432_v26  ;;  %v493_v31 = vmul.f32 %v888_v23, %v484_v27 }
 0x135   : > { %v454_v35 = vsub.f32 1.5, %v453_v29  ;;  %v490_v50 = vmul.f32 %v888_v23, %v481_v32 }
 0x136   : > { %v902_v36 = vpop.eup %901  ;;  %v434_v37 = vsub.f32 1.5, %v433_v30  ;;  %v502_v38 = vadd.f32 %v889_v28, %v493_v31 }
 0x137   : > { %v455_v39 = vmul.f32 %v898_v15, %v454_v35  ;;  %v461_v40 = vmul.f32 %v902_v36, %v428_v17  ;;  %vm467_vm13 = vweird.f32 %v902_v36  ;;  %v499_v56 = vadd.f32 %v889_v28, %v490_v50 }
 0x138   : > { %v435_v43 = vmul.f32 %v900_v18, %v434_v37  ;;  %v505_v44 = vpack.c.bf16 %v502_v38, %v502_v38  ;;  %vm468_vm15 = vmor %vm466_vm14, %vm467_vm13 }
 0x139   : > { %v462_v45 = vmul.f32 %v902_v36, %v461_v40  ;;  %v459_v51 = vsel %vm458_vm12, %v898_v15, %v455_v39 }
 0x13a   : > { %592 = vmatmul.bf16.vlgmr.msra.gmra.mxu2 %v505_v44  ;;  %v439_v47 = vsel %vm438_vm11, %v900_v18, %v435_v43  ;;  %v482_v54 = vmul.f32 %v459_v51, %v1071_v41  ;;  %v890_v41 = vld [vmem:[%s371_s7] ss:$0 sm:$0xff] }
 0x13b   : > { %v463_v48 = vmul.f32 0.5, %v462_v45  ;;  %v480_v49 = vmul.f32 %v439_v47, %v1073_v42 }
 0x13c   : > { %v491_v60 = vmul.f32 %v888_v23, %v482_v54 }
 0x13d   : > { %v464_v52 = vsub.f32 1.5, %v463_v48  ;;  %v489_v53 = vmul.f32 %v888_v23, %v480_v49 }
 0x13e   : > { %v500_v61 = vadd.f32 %v889_v28, %v491_v60 }
 0x13f   : > { %v465_v33 = vmul.f32 %v902_v36, %v464_v52  ;;  %v498_v55 = vadd.f32 %v889_v28, %v489_v53 }
 0x141   : > { %v503_v57 = vpack.c.bf16 %v499_v56, %v498_v55  ;;  %v469_v58 = vsel %vm468_vm15, %v902_v36, %v465_v33 }
 0x142   : > { %v483_v59 = vmul.f32 %v469_v58, %v1080_v46 }
 0x143   : > { %582 = vmatmul.bf16.vlgmr.msra.gmra.mxu0 %v503_v57 }
 0x144   : > { %v492_v42 = vmul.f32 %v888_v23, %v483_v59 }
 0x146   : > { %v501_v62 = vadd.f32 %v889_v28, %v492_v42 }
 0x148   : > { %v504_v63 = vpack.c.bf16 %v501_v62, %v500_v61 }
 0x14a   : > { %587 = vmatmul.bf16.vlgmr.msra.gmra.mxu1 %v504_v63 }
 0x1bd   : > { %v593_v0 = vpop.f32.mrf.mxu2 }
 0x1be   : > { %v594_v1 = vadd.f32 %v890_v41, %v593_v0 }
 0x1c0   : > { %v601_v2 = vpack.c.bf16 %v594_v1, %v594_v1  ;;  %v583_v3 = vpop.f32.mrf.mxu0 }
 0x1c1   : > { %v584_v6 = vadd.f32 %v890_v41, %v583_v3 }
 0x1c2   : > { %606 = vst [vmem:[%s362_s24 + $0x10] sm:$0xf] %v601_v2 }
 0x1c5   : > { %v595_v46 = vpop.f32.mrf.mxu2 }
 0x1c7   : > { %v588_v4 = vpop.f32.mrf.mxu1 }
 0x1c8   : > { %v585_v5 = vpop.f32.mrf.mxu0  ;;  %v589_v10 = vadd.f32 %v890_v41, %v588_v4 }
 0x1c9   : > { %v586_v7 = vadd.f32 %v890_v41, %v585_v5  ;;  %v643_v17 = vld [vmem:[%s362_s24 + $0x10] sm:$0xf] (%p1009_p6) }
 0x1ca   : > { %644 = vst [vmem:[%s618_s29 + $0x30] sm:$0xf] (%p1009_p6), %v643_v17 }
 0x1cb   : > { %v822_v8 = vpack.c.bf16 %v586_v7, %v584_v6 }
 0x1cd   : > { %823 = vst [vmem:[%s362_s24] sm:$0xff] %v822_v8  }
 0x1cf   : > { %v590_v9 = vpop.f32.mrf.mxu1 }
 0x1d0   : > { %v591_v11 = vadd.f32 %v890_v41, %v590_v9  ;;  %613 = sbr.rel (!%p1009_p6) target bundleno = 478 (0x1de), region = 85 }
 0x1d2   : > { %v827_v12 = vpack.c.bf16 %v591_v11, %v589_v10 }
 0x1d4   : > { %829 = vst [vmem:[%s362_s24 + $0x8] sm:$0xff] %v827_v12   ;;  %v635_v13 = vld [vmem:[%s362_s24] sm:$0xf] (%p1009_p6)  ;;  %v637_v14 = vld [vmem:[%s362_s24 + $0x4] sm:$0xf] (%p1009_p6) }
 0x1d5   : > { %636 = vst [vmem:[%s618_s29] sm:$0xf] %v635_v13 }
 0x1d6   : > { %638 = vst [vmem:[%s618_s29 + $0xc] sm:$0xf] %v637_v14 }
 0x1db   : > { %v639_v15 = vld [vmem:[%s362_s24 + $0x8] sm:$0xf]  ;;  %v641_v16 = vld [vmem:[%s362_s24 + $0xc] sm:$0xf] }
 0x1dc   : > { %640 = vst [vmem:[%s618_s29 + $0x18] sm:$0xf] %v639_v15 }
 0x1dd   : > { %642 = vst [vmem:[%s618_s29 + $0x24] sm:$0xf] %v641_v16 }
 0x1de PF: > { %s15_s22 = sadd.s32 1, %s941_s22   ;;  %s1146_s18 = smov %s929_s19 }
 0x1df   : > { %p12_p12 = scmp.ge.s32.totalorder %s15_s22, 5   ;;  %s1147_s19 = smov %s1014_s28 }
 0x1e0   : > { %s1148_s20 = smov %s937_s21  ;;  %s1149_s21 = smov %s1151_s23 }
 0x1e1   :  { %14 = sbr.rel (!%p12_p12) target bundleno = 3 (0x3), region = 163 }

// kernel: _lambda_.13
= control target key start
LH: loop header
LB: loop body
LE: loop exit
PB: predicated region body
PF: predicated region fallthrough
CT: control target
= control target key end

     0   :  { %s451_s1 = inlined_call_operand.vmem [shape: bf16[256,128], index: 1, kind: input, shape index: {}]   ;;  %s452_s0 = inlined_call_operand.vmem [shape: bf16[32,256], index: 0, kind: input, shape index: {}]   ;;  %s453_s2 = inlined_call_operand.vmem [shape: f32[32,128], index: 2, kind: output, shape index: {}]  }
   0x1   :  { %v327_v0 = vld [vmem:[%s451_s1 + $0x38] sm:$0xff]  ;;  %v326_v2 = vld [vmem:[%s451_s1 + $0x30] sm:$0xff]  ;;  %v325_v4 = vld [vmem:[%s451_s1 + $0x28] sm:$0xff] }
   0x2   :  { %v335_v1 = vld [vmem:[%s451_s1 + $0x78] sm:$0xff]  ;;  %175 = vmatpush.bf16.msra.mxu0 %v327_v0  ;;  %336 = vmatpush.bf16.msra.mxu2 %v327_v0  ;;  %v334_v3 = vld [vmem:[%s451_s1 + $0x70] sm:$0xff]  ;;  %v333_v5 = vld [vmem:[%s451_s1 + $0x68] sm:$0xff] }
   0x3   :  { %194 = vmatpush.bf16.msra.mxu1 %v335_v1  ;;  %344 = vmatpush.bf16.msra.mxu3 %v335_v1  ;;  %v324_v6 = vld [vmem:[%s451_s1 + $0x20] sm:$0xff]  ;;  %v323_v8 = vld [vmem:[%s451_s1 + $0x18] sm:$0xff]  ;;  %v322_v10 = vld [vmem:[%s451_s1 + $0x10] sm:$0xff] }
   0x4   :  { %v332_v7 = vld [vmem:[%s451_s1 + $0x60] sm:$0xff]  ;;  %v331_v9 = vld [vmem:[%s451_s1 + $0x58] sm:$0xff]  ;;  %v330_v11 = vld [vmem:[%s451_s1 + $0x50] sm:$0xff] }
   0x5   :  { %v321_v12 = vld [vmem:[%s451_s1 + $0x8] sm:$0xff]  ;;  %v320_v14 = vld [vmem:[%s451_s1] sm:$0xff]  ;;  %v246_v18 = vld [vmem:[%s452_s0 + $0x10] sm:$0xf] }
   0x6   :  { %176 = vmatpush.bf16.msra.mxu0 %v326_v2  ;;  %337 = vmatpush.bf16.msra.mxu2 %v326_v2  ;;  %v329_v13 = vld [vmem:[%s451_s1 + $0x48] sm:$0xff]  ;;  %v328_v15 = vld [vmem:[%s451_s1 + $0x40] sm:$0xff]  ;;  %v319_v19 = vld [vmem:[%s452_s0 + $0x14] sm:$0xf0] }
   0x7   :  { %195 = vmatpush.bf16.msra.mxu1 %v334_v3  ;;  %345 = vmatpush.bf16.msra.mxu3 %v334_v3  ;;  %v238_v16 = vld [vmem:[%s452_s0] sm:$0xf]  ;;  %v317_v17 = vld [vmem:[%s452_s0 + $0x4] sm:$0xf0]  ;;  %v316_v20 = vld [vmem:[%s452_s0 + $0x4] sm:$0xf]  ;;  %v247_v25 = vor.u32 %v319_v19, %v246_v18 }
   0x8   :  { %v240_v21 = vld [vmem:[%s452_s0 + $0x8] sm:$0xf0]  ;;  %v318_v22 = vld [vmem:[%s452_s0 + $0x14] sm:$0xf]  ;;  %v248_v23 = vld [vmem:[%s452_s0 + $0x18] sm:$0xf0]  ;;  %v239_v24 = vor.u32 %v317_v17, %v238_v16 }
   0x9   :  { %v243_v26 = vor.u32 %v316_v20, %v240_v21  ;;  %v251_v27 = vor.u32 %v318_v22, %v248_v23 }
   0xa   :  { %177 = vmatpush.bf16.msra.mxu0 %v325_v4  ;;  %338 = vmatpush.bf16.msra.mxu2 %v325_v4 }
   0xb   :  { %196 = vmatpush.bf16.msra.mxu1 %v333_v5  ;;  %346 = vmatpush.bf16.msra.mxu3 %v333_v5 }
   0xe   :  { %178 = vmatpush.bf16.msra.mxu0 %v324_v6  ;;  %339 = vmatpush.bf16.msra.mxu2 %v324_v6 }
   0xf   :  { %197 = vmatpush.bf16.msra.mxu1 %v332_v7  ;;  %347 = vmatpush.bf16.msra.mxu3 %v332_v7 }
  0x12   :  { %179 = vmatpush.bf16.msra.mxu0 %v323_v8  ;;  %340 = vmatpush.bf16.msra.mxu2 %v323_v8 }
  0x13   :  { %198 = vmatpush.bf16.msra.mxu1 %v331_v9  ;;  %348 = vmatpush.bf16.msra.mxu3 %v331_v9 }
  0x16   :  { %180 = vmatpush.bf16.msra.mxu0 %v322_v10  ;;  %341 = vmatpush.bf16.msra.mxu2 %v322_v10 }
  0x17   :  { %199 = vmatpush.bf16.msra.mxu1 %v330_v11  ;;  %349 = vmatpush.bf16.msra.mxu3 %v330_v11 }
  0x1a   :  { %181 = vmatpush.bf16.msra.mxu0 %v321_v12  ;;  %342 = vmatpush.bf16.msra.mxu2 %v321_v12 }
  0x1b   :  { %200 = vmatpush.bf16.msra.mxu1 %v329_v13  ;;  %350 = vmatpush.bf16.msra.mxu3 %v329_v13 }
  0x1e   :  { %182 = vmatpush.bf16.msra.mxu0 %v320_v14  ;;  %343 = vmatpush.bf16.msra.mxu2 %v320_v14 }
  0x1f   :  { %201 = vmatpush.bf16.msra.mxu1 %v328_v15  ;;  %351 = vmatpush.bf16.msra.mxu3 %v328_v15 }
  0x21   :  { %183 = vmatmul.bf16.vlgmr.msra.gmra.mxu0 %v239_v24  ;;  %188 = vmatmul.bf16.vlgmr.msra.gmra.mxu2 %v247_v25 }
  0x22   :  { %202 = vmatmul.bf16.vlgmr.msra.gmra.mxu1 %v243_v26  ;;  %207 = vmatmul.bf16.vlgmr.msra.gmra.mxu3 %v251_v27 }
  0x9e   :  { %v184_v28 = vpop.f32.mrf.mxu0 }
  0x9f   :  { %v203_v29 = vpop.f32.mrf.mxu1 }
  0xa0   :  { %v204_v30 = vadd.f32 %v203_v29, %v184_v28 }
  0xa2   :  { %228 = vst [vmem:[%s453_s2] sm:$0xff] %v204_v30 }
  0xa4   :  { %v189_v31 = vpop.f32.mrf.mxu2 }
  0xa5   :  { %v208_v32 = vpop.f32.mrf.mxu3 }
  0xa6   :  { %v209_v33 = vadd.f32 %v208_v32, %v189_v31  ;;  %v186_v34 = vpop.f32.mrf.mxu0 }
  0xa7   :  { %v205_v35 = vpop.f32.mrf.mxu1 }
  0xa8   :  { %230 = vst [vmem:[%s453_s2 + $0x10] sm:$0xff] %v209_v33  ;;  %v206_v36 = vadd.f32 %v205_v35, %v186_v34 }
  0xaa   :  { %229 = vst [vmem:[%s453_s2 + $0x8] sm:$0xff] %v206_v36 }
  0xac   :  { %v191_v37 = vpop.f32.mrf.mxu2 }
  0xad   :  { %v210_v38 = vpop.f32.mrf.mxu3 }
  0xae   :  { %v211_v39 = vadd.f32 %v210_v38, %v191_v37 }
  0xb0   :  { %231 = vst [vmem:[%s453_s2 + $0x18] sm:$0xff] %v211_v39 }

// kernel: _lambda_.17
= control target key start
LH: loop header
LB: loop body
LE: loop exit
PB: predicated region body
PF: predicated region fallthrough
CT: control target
= control target key end

     0   :  { %s343_s1 = inlined_call_operand.vmem [shape: bf16[128,128], index: 1, kind: input, shape index: {}]   ;;  %s344_s2 = inlined_call_operand.vmem [shape: f32[1,128], index: 2, kind: input, shape index: {}]   ;;  %s345_s0 = inlined_call_operand.vmem [shape: bf16[40,128], index: 0, kind: input, shape index: {}]   ;;  %s346_s3 = inlined_call_operand.vmem [shape: f32[40,128], index: 3, kind: input, shape index: {}]   ;;  %s347_s4 = inlined_call_operand.vmem [shape: f32[40,128], index: 4, kind: output, shape index: {}]  }
   0x1   :  { %v234_v0 = vld [vmem:[%s343_s1 + $0x38] sm:$0xff]  ;;  %v233_v1 = vld [vmem:[%s343_s1 + $0x30] sm:$0xff]  ;;  %v232_v2 = vld [vmem:[%s343_s1 + $0x28] sm:$0xff] }
   0x2   :  { %116 = vmatpush.bf16.msra.mxu0 %v234_v0  ;;  %235 = vmatpush.bf16.msra.mxu1 %v234_v0  ;;  %v231_v3 = vld [vmem:[%s343_s1 + $0x20] sm:$0xff]  ;;  %v230_v4 = vld [vmem:[%s343_s1 + $0x18] sm:$0xff]  ;;  %v229_v5 = vld [vmem:[%s343_s1 + $0x10] sm:$0xff] }
   0x3   :  { %236 = vmatpush.bf16.msra.mxu2 %v234_v0  ;;  %v228_v6 = vld [vmem:[%s343_s1 + $0x8] sm:$0xff]  ;;  %v35_v7 = vld [vmem:[%s345_s0 + $0x10] sm:$0xf]  ;;  %v227_v8 = vld [vmem:[%s343_s1] sm:$0xff] }
   0x4   :  { %v61_v9 = vunpack.c.l.b16 %v35_v7  ;;  %v225_v10 = vld [vmem:[%s345_s0] sm:$0xff]  ;;  %v226_v11 = vld [vmem:[%s345_s0 + $0x8] sm:$0xff]  ;;  %v168_v17 = vld [vmem:[%s346_s3 + $0x10] sm:$0xff] }
   0x5   :  { %v251_v13 = vld [vmem:[%s344_s2] ss:$0 sm:$0xff]  ;;  %v167_v26 = vld [vmem:[%s346_s3 + $0x8] sm:$0xff]  ;;  %v169_v28 = vld [vmem:[%s346_s3 + $0x18] sm:$0xff] }
   0x6   :  { %117 = vmatpush.bf16.msra.mxu0 %v233_v1  ;;  %237 = vmatpush.bf16.msra.mxu1 %v233_v1  ;;  %v64_v12 = vpack.c.b16 %v61_v9, %v61_v9  ;;  %v166_v15 = vld [vmem:[%s346_s3] sm:$0xff] }
   0x7   :  { %238 = vmatpush.bf16.msra.mxu2 %v233_v1  ;;  %v170_v23 = vld [vmem:[%s346_s3 + $0x20] sm:$0xff] }
   0xa   :  { %118 = vmatpush.bf16.msra.mxu0 %v232_v2  ;;  %239 = vmatpush.bf16.msra.mxu1 %v232_v2 }
   0xb   :  { %240 = vmatpush.bf16.msra.mxu2 %v232_v2 }
   0xe   :  { %119 = vmatpush.bf16.msra.mxu0 %v231_v3  ;;  %241 = vmatpush.bf16.msra.mxu1 %v231_v3 }
   0xf   :  { %242 = vmatpush.bf16.msra.mxu2 %v231_v3 }
  0x12   :  { %120 = vmatpush.bf16.msra.mxu0 %v230_v4  ;;  %243 = vmatpush.bf16.msra.mxu1 %v230_v4 }
  0x13   :  { %244 = vmatpush.bf16.msra.mxu2 %v230_v4 }
  0x16   :  { %121 = vmatpush.bf16.msra.mxu0 %v229_v5  ;;  %245 = vmatpush.bf16.msra.mxu1 %v229_v5 }
  0x17   :  { %246 = vmatpush.bf16.msra.mxu2 %v229_v5 }
  0x1a   :  { %122 = vmatpush.bf16.msra.mxu0 %v228_v6  ;;  %247 = vmatpush.bf16.msra.mxu1 %v228_v6 }
  0x1b   :  { %248 = vmatpush.bf16.msra.mxu2 %v228_v6 }
  0x1e   :  { %123 = vmatpush.bf16.msra.mxu0 %v227_v8  ;;  %249 = vmatpush.bf16.msra.mxu1 %v227_v8 }
  0x1f   :  { %250 = vmatpush.bf16.msra.mxu2 %v227_v8 }
  0x21   :  { %124 = vmatmul.bf16.vlgmr.msra.gmra.mxu0 %v225_v10  ;;  %129 = vmatmul.bf16.vlgmr.msra.gmra.mxu1 %v226_v11 }
  0x22   :  { %134 = vmatmul.bf16.vlgmr.msra.gmra.mxu2 %v64_v12 }
  0x9e   :  { %v125_v14 = vpop.f32.mrf.mxu0  ;;  %v130_v16 = vpop.f32.mrf.mxu1 }
  0x9f   :  { %v161_v18 = vadd.f32 %v251_v13, %v125_v14  ;;  %v163_v19 = vadd.f32 %v251_v13, %v130_v16 }
  0xa1   :  { %v171_v20 = vadd.f32 %v166_v15, %v161_v18  ;;  %v173_v21 = vadd.f32 %v168_v17, %v163_v19 }
  0xa3   :  { %176 = vst [vmem:[%s347_s4] sm:$0xff] %v171_v20 }
  0xa4   :  { %178 = vst [vmem:[%s347_s4 + $0x10] sm:$0xff] %v173_v21 }
  0xa5   :  { %v135_v22 = vpop.f32.mrf.mxu2 }
  0xa6   :  { %v165_v24 = vadd.f32 %v251_v13, %v135_v22  ;;  %v127_v25 = vpop.f32.mrf.mxu0  ;;  %v132_v27 = vpop.f32.mrf.mxu1 }
  0xa7   :  { %v162_v29 = vadd.f32 %v251_v13, %v127_v25  ;;  %v164_v30 = vadd.f32 %v251_v13, %v132_v27 }
  0xa8   :  { %v175_v31 = vadd.f32 %v170_v23, %v165_v24 }
  0xa9   :  { %v172_v32 = vadd.f32 %v167_v26, %v162_v29  ;;  %v174_v33 = vadd.f32 %v169_v28, %v164_v30 }
  0xaa   :  { %180 = vst [vmem:[%s347_s4 + $0x20] sm:$0xff] %v175_v31 }
  0xab   :  { %177 = vst [vmem:[%s347_s4 + $0x8] sm:$0xff] %v172_v32 }
  0xac   :  { %179 = vst [vmem:[%s347_s4 + $0x18] sm:$0xff] %v174_v33 }
  0xad   :  { %v137_v34 = vpop.f32.mrf.mxu2 }

// kernel: _lambda_.16
= control target key start
LH: loop header
LB: loop body
LE: loop exit
PB: predicated region body
PF: predicated region fallthrough
CT: control target
= control target key end

     0   :  { %s1072_s12 = smov 0   ;;  %s1275_s0 = inlined_call_operand.vmem [shape: bf16[2,4,17,32], index: 0, kind: input, shape index: {}]   ;;  %s1276_s1 = inlined_call_operand.vmem [shape: bf16[2,4,17,32], index: 1, kind: input, shape index: {}]   ;;  %s1277_s2 = inlined_call_operand.vmem [shape: bf16[2,4,17,32], index: 2, kind: input, shape index: {}]   ;;  %s1278_s3 = inlined_call_operand.vmem [shape: bf16[2,4,17,32], index: 3, kind: output, shape index: {}]  }
   0x1 LB: > { %s909_s13 = sadd.s32 4294967295, %s1049_s12   ;;  %p913_p0 = scmp.ge.s32.totalorder %s1049_s12, 1  ;;  %s1049_s12 = sphi %s1072_s12, %s13_s12  }
   0x2   : > { %p157_p1 = scmp.lt.s32.totalorder %s1049_s12, 3 }
   0x4   : > { %p158_p2 = pnand %p913_p0, %p157_p1 }
   0x5   : > { %p191_p3 = scmp.lt.s32.totalorder (!%p158_p2), %s909_s13, 1 }
   0x6   : > { %161 = sbr.rel (%p158_p2) target bundleno = 469 (0x1d5), region = 32 }
   0xb   : > { %s1282_s13 = smov (!%p191_p3, %s909_s13), 1  ;;  %vm300_vm0 = vcmask 261120   ;;  %vm469_vm1 = vcmask 138240   ;;  %vm476_vm2 = vcmask 131072   ;;  %vm614_vm3 = vcmask 1040384  }
   0xc   : > { %s1080_s14 = smul.u32 48, %s1282_s13  ;;  %vm806_vm4 = vcmask 257024   ;;  %vm809_vm5 = vcmask 253952   ;;  %vm810_vm6 = vsmask.f32 256 }
   0xd   : > { %vm1246_vm7 = vmand %vm809_vm5, %vm810_vm6 }
   0xe   : > { %s1086_s17 = scalar_lea.vmem %s1276_s1, %s1080_s14  ;;  %s1095_s20 = scalar_lea.vmem %s1275_s0, %s1080_s14 }
   0xf   : > { %v262_v0 = vld [vmem:[%s1086_s17 + $0x8] sm:$0x1]  ;;  %v268_v1 = vld [vmem:[%s1086_s17 + $0x20] sm:$0x1]  ;;  %v271_v2 = vld [vmem:[%s1086_s17 + $0x2c] sm:$0x1]  ;;  %s1178_s23 = scalar_lea.vmem %s1277_s2, %s1080_s14  ;;  %s1234_s26 = scalar_lea.vmem %s1278_s3, %s1080_s14 }
  0x10   : > { %v297_v3 = vunpack.c.l.b16 %v262_v0  ;;  %v390_v4 = vunpack.c.l.b16 %v268_v1  ;;  %v436_v5 = vunpack.c.l.b16 %v271_v2  ;;  %v265_v6 = vld [vmem:[%s1086_s17 + $0x14] sm:$0x1]  ;;  %v968_v7 = vld [vmem:[%s1086_s17] sm:$0xff]  ;;  %v984_v13 = vld [vmem:[%s1095_s20 + $0x18] sm:$0xff]  }
  0x11   : > { %v344_v8 = vunpack.c.l.b16 %v265_v6  ;;  %v977_v9 = vld [vmem:[%s1095_s20] sm:$0xff]   ;;  %v308_v15 = vsel %vm300_vm0, %v968_v7, 0  ;;  %v215_v17 = vld [vmem:[%s1095_s20 + $0xc] sm:$0xff]   ;;  %v982_v24 = vunpack.c.l.bf16 %v984_v13  ;;  %v983_v25 = vunpack.c.h.bf16 %v984_v13  ;;  %v970_v26 = vld [vmem:[%s1086_s17 + $0x18] sm:$0xff] }
  0x12   : > { %v299_v10 = vpack.c.b16 %v297_v3, %v297_v3  ;;  %v392_v11 = vpack.c.b16 %v390_v4, %v390_v4  ;;  %v438_v12 = vpack.c.b16 %v436_v5, %v436_v5  ;;  %v221_v16 = vld [vmem:[%s1095_s20 + $0x24] sm:$0xff]   ;;  %v978_v21 = vunpack.c.l.bf16 %v977_v9  ;;  %v969_v28 = vld [vmem:[%s1086_s17 + $0xc] sm:$0xff]  ;;  %v220_v60 = vld [vmem:[%s1095_s20 + $0x20] sm:$0x1] }
  0x13   : > { %v346_v14 = vpack.c.b16 %v344_v8, %v344_v8  ;;  %v979_v23 = vunpack.c.h.bf16 %v977_v9  ;;  %v971_v27 = vld [vmem:[%s1086_s17 + $0x24] sm:$0xff]  ;;  %v233_v30 = vunpack.c.l.bf16 %v221_v16  ;;  %v234_v31 = vunpack.c.h.bf16 %v221_v16  ;;  %v223_v62 = vld [vmem:[%s1095_s20 + $0x2c] sm:$0x1]  ;;  %v217_v63 = vld [vmem:[%s1095_s20 + $0x14] sm:$0x1] }
  0x14   : > { %v311_v18 = vsel %vm300_vm0, %v299_v10, 0  ;;  %v403_v19 = vsel %vm300_vm0, %v392_v11, 0  ;;  %v449_v20 = vsel %vm300_vm0, %v438_v12, 0  ;;  %v236_v29 = vmul.f32 0.17677669, %v978_v21 }
  0x15   : > { %319 = vmatpush.bf16.xpose.msra.mxu0 %v311_v18  ;;  %411 = vmatpush.bf16.xpose.msra.mxu2 %v403_v19  ;;  %v357_v22 = vsel %vm300_vm0, %v346_v14, 0  ;;  %v227_v32 = vunpack.c.l.bf16 %v215_v17  ;;  %v237_v33 = vmul.f32 0.17677669, %v979_v23  ;;  %v242_v34 = vmul.f32 0.17677669, %v982_v24 }
  0x16   : > { %457 = vmatpush.bf16.xpose.msra.mxu3 %v449_v20  ;;  %365 = vmatpush.bf16.xpose.msra.mxu1 %v357_v22  ;;  %v243_v35 = vmul.f32 0.17677669, %v983_v25  ;;  %v228_v36 = vunpack.c.h.bf16 %v215_v17  ;;  %v248_v37 = vpack.c.bf16 %v236_v29, %v236_v29  ;;  %v245_v38 = vmul.f32 0.17677669, %v233_v30  ;;  %v214_v61 = vld [vmem:[%s1095_s20 + $0x8] sm:$0x1] }
  0x17   : > { %v246_v39 = vmul.f32 0.17677669, %v234_v31  ;;  %v239_v40 = vmul.f32 0.17677669, %v227_v32  ;;  %v249_v41 = vpack.c.bf16 %v237_v33, %v237_v33  ;;  %v254_v42 = vpack.c.bf16 %v242_v34, %v242_v34 }
  0x18   : > { %v255_v43 = vpack.c.bf16 %v243_v35, %v243_v35  ;;  %v240_v44 = vmul.f32 0.17677669, %v228_v36  ;;  %v400_v45 = vsel %vm300_vm0, %v970_v26, 0  ;;  %v257_v46 = vpack.c.bf16 %v245_v38, %v245_v38 }
  0x19   : > { %v258_v47 = vpack.c.bf16 %v246_v39, %v246_v39  ;;  %v251_v48 = vpack.c.bf16 %v239_v40, %v239_v40  ;;  %v446_v49 = vsel %vm300_vm0, %v971_v27, 0  ;;  %v354_v50 = vsel %vm300_vm0, %v969_v28, 0 }
  0x1a   : > { %v252_v51 = vpack.c.bf16 %v240_v44, %v240_v44  ;;  %v287_v52 = vunpack.c.l.b16 %v248_v37  ;;  %v288_v53 = vunpack.c.l.b16 %v249_v41  ;;  %v380_v54 = vunpack.c.l.b16 %v254_v42 }
  0x1b   : > { %v381_v55 = vunpack.c.l.b16 %v255_v43  ;;  %v426_v56 = vunpack.c.l.b16 %v257_v46  ;;  %v427_v57 = vunpack.c.l.b16 %v258_v47  ;;  %v334_v58 = vunpack.c.l.b16 %v251_v48 }
  0x1c   : > { %v335_v59 = vunpack.c.l.b16 %v252_v51  ;;  %v290_v0 = vpack.c.b16 %v288_v53, %v287_v52  ;;  %v232_v2 = vunpack.c.l.bf16 %v220_v60  ;;  %v226_v3 = vunpack.c.l.bf16 %v214_v61  ;;  %v274_v52 = vld [vmem:[%s1178_s23 + $0x8] sm:$0x1]  ;;  %v280_v53 = vld [vmem:[%s1178_s23 + $0x20] sm:$0x1] }
  0x1d   : > { %320 = vmatpush.bf16.xpose.msra.mxu0 %v308_v15  ;;  %412 = vmatpush.bf16.xpose.msra.mxu2 %v400_v45  ;;  %v383_v1 = vpack.c.b16 %v381_v55, %v380_v54  ;;  %v429_v4 = vpack.c.b16 %v427_v57, %v426_v56  ;;  %v235_v6 = vunpack.c.l.bf16 %v223_v62  ;;  %v229_v7 = vunpack.c.l.bf16 %v217_v63  ;;  %v283_v54 = vld [vmem:[%s1178_s23 + $0x2c] sm:$0x1] }
  0x1e   : > { %458 = vmatpush.bf16.xpose.msra.mxu3 %v446_v49  ;;  %366 = vmatpush.bf16.xpose.msra.mxu1 %v354_v50  ;;  %v337_v5 = vpack.c.b16 %v335_v59, %v334_v58  ;;  %v244_v8 = vmul.f32 0.17677669, %v232_v2  ;;  %v238_v9 = vmul.f32 0.17677669, %v226_v3  ;;  %v604_v55 = vunpack.c.l.b16 %v274_v52  ;;  %v277_v2 = vld [vmem:[%s1178_s23 + $0x14] sm:$0x1] }
  0x1f   : > { %v247_v10 = vmul.f32 0.17677669, %v235_v6  ;;  %v241_v11 = vmul.f32 0.17677669, %v229_v7  ;;  %v1051_v56 = vmov 0   ;;  %v695_v58 = vunpack.c.l.b16 %v280_v53  ;;  %v974_v7 = vld [vmem:[%s1178_s23 + $0x18] sm:$0xff] }
  0x20   : > { %v256_v12 = vpack.c.bf16 %v244_v8, %v244_v8  ;;  %v250_v13 = vpack.c.bf16 %v238_v9, %v238_v9  ;;  %v616_v57 = vsel %vm614_vm3, 65535, %v1051_v56  ;;  %v739_v59 = vunpack.c.l.b16 %v283_v54  ;;  %v975_v8 = vld [vmem:[%s1178_s23 + $0x24] sm:$0xff] }
  0x21   : > { %v259_v14 = vpack.c.bf16 %v247_v10, %v247_v10  ;;  %v253_v15 = vpack.c.bf16 %v241_v11, %v241_v11  ;;  %v606_v60 = vpack.c.b16 %v604_v55, %v604_v55  ;;  %v697_v61 = vpack.c.b16 %v695_v58, %v695_v58 }
  0x22   : > { %v382_v16 = vunpack.c.l.b16 %v256_v12  ;;  %v289_v17 = vunpack.c.l.b16 %v250_v13  ;;  %v741_v62 = vpack.c.b16 %v739_v59, %v739_v59  ;;  %v651_v3 = vunpack.c.l.b16 %v277_v2  ;;  %v973_v12 = vld [vmem:[%s1178_s23 + $0xc] sm:$0xff] }
  0x23   : > { %v428_v18 = vunpack.c.l.b16 %v259_v14  ;;  %v336_v19 = vunpack.c.l.b16 %v253_v15  ;;  %v618_v63 = vand.u32 %v616_v57, %v606_v60 }
  0x24   : > { %922 = vmatmul.msk.bf16.vlgmr.msra.gmra.mxu0 %vm300_vm0, %v290_v0  ;;  %934 = vmatmul.msk.bf16.vlgmr.msra.gmra.mxu2 %vm300_vm0, %v383_v1  ;;  %v384_v20 = vpack.c.b16 %v382_v16, %v382_v16  ;;  %v291_v21 = vpack.c.b16 %v289_v17, %v289_v17  ;;  %v706_v0 = vand.u32 %v697_v61, %v616_v57 }
  0x25   : > { %940 = vmatmul.msk.bf16.vlgmr.msra.gmra.mxu3 %vm300_vm0, %v429_v4  ;;  %928 = vmatmul.msk.bf16.vlgmr.msra.gmra.mxu1 %vm300_vm0, %v337_v5  ;;  %v430_v22 = vpack.c.b16 %v428_v18, %v428_v18  ;;  %v338_v23 = vpack.c.b16 %v336_v19, %v336_v19  ;;  %v750_v1 = vand.u32 %v741_v62, %v616_v57  ;;  %v972_v4 = vld [vmem:[%s1178_s23] sm:$0xff] }
  0x26   : > { %626 = vmatpush.bf16.msrb.mxu0 %v618_v63  ;;  %714 = vmatpush.bf16.msrb.mxu2 %v706_v0  ;;  %v653_v5 = vpack.c.b16 %v651_v3, %v651_v3 }
  0x27   : > { %758 = vmatpush.bf16.msrb.mxu3 %v750_v1 }
  0x28   : > { %v662_v6 = vand.u32 %v653_v5, %v616_v57 }
  0x2a   : > { %627 = vmatpush.bf16.msrb.mxu0 %v972_v4  ;;  %670 = vmatpush.bf16.msrb.mxu1 %v662_v6 }
  0x2b   : > { %715 = vmatpush.bf16.msrb.mxu2 %v974_v7  ;;  %759 = vmatpush.bf16.msrb.mxu3 %v975_v8 }
  0x2e   : > { %671 = vmatpush.bf16.msrb.mxu1 %v973_v12 }
  0x34   : > { %935 = vmatmul.msk.bf16.gmra.mxu2 %vm300_vm0, %v384_v20  ;;  %923 = vmatmul.msk.bf16.gmra.mxu0 %vm300_vm0, %v291_v21 }
  0x35   : > { %941 = vmatmul.msk.bf16.gmra.mxu3 %vm300_vm0, %v430_v22  ;;  %929 = vmatmul.msk.bf16.gmra.mxu1 %vm300_vm0, %v338_v23 }
  0xa1   : > { %v1126_v24 = vpop.f32.mrf.mxu0 }
  0xa2   : > { %v470_v25 = vsel %vm469_vm1, %v1126_v24, -inf  ;;  %v1130_v26 = vpop.f32.mrf.mxu1 }
  0xa3   : > { %471 = vmax.xlane.f32.xlu2 %v470_v25  ;;  %v480_v42 = vsel %vm469_vm1, %v1130_v26, -inf }
  0xa7   : > { %v1132_v27 = vpop.f32.mrf.mxu2 }
  0xa8   : > { %v1134_v28 = vpop.f32.mrf.mxu3  ;;  %v489_v29 = vsel %vm469_vm1, %v1132_v27, -inf }
  0xa9   : > { %v498_v30 = vsel %vm469_vm1, %v1134_v28, -inf  ;;  %490 = vmax.xlane.f32.xlu0 %v489_v29  ;;  %v1140_v31 = vpop.f32.mrf.mxu0 }
  0xaa   : > { %499 = vmax.xlane.f32.xlu1 %v498_v30  ;;  %v473_v32 = vsel %vm469_vm1, %v1140_v31, -inf  ;;  %v1144_v33 = vpop.f32.mrf.mxu1 }
  0xab   : > { %474 = vmax.xlane.f32.xlu2 %v473_v32  ;;  %v483_v44 = vsel %vm469_vm1, %v1144_v33, -inf }
  0xaf   : > { %v1146_v34 = vpop.f32.mrf.mxu2 }
  0xb0   : > { %v1148_v35 = vpop.f32.mrf.mxu3  ;;  %v492_v36 = vsel %vm469_vm1, %v1146_v34, -inf }
  0xb1   : > { %v501_v37 = vsel %vm469_vm1, %v1148_v35, -inf  ;;  %493 = vmax.xlane.f32.xlu0 %v492_v36  ;;  %v1154_v38 = vpop.f32.mrf.mxu0 }
  0xb2   : > { %502 = vmax.xlane.f32.xlu1 %v501_v37  ;;  %v1156_v39 = vpop.f32.mrf.mxu1  ;;  %v477_v50 = vsel %vm476_vm2, %v1154_v38, -inf }
  0xb3   : > { %v486_v48 = vsel %vm476_vm2, %v1156_v39, -inf }
  0xb7   : > { %v1158_v40 = vpop.f32.mrf.mxu2 }
  0xb8   : > { %v1160_v41 = vpop.f32.mrf.mxu3  ;;  %v495_v43 = vsel %vm476_vm2, %v1158_v40, -inf }
  0xb9   : > { %481 = vmax.xlane.f32.xlu0 %v480_v42  ;;  %496 = vmax.xlane.f32.xlu2 %v495_v43  ;;  %v329_v45 = vpop.f32.mrf.mxu0  ;;  %v504_v47 = vsel %vm476_vm2, %v1160_v41, -inf }
  0xba   : > { %484 = vmax.xlane.f32.xlu1 %v483_v44  ;;  %v375_v46 = vpop.f32.mrf.mxu1 }
  0xbf   : > { %v421_v49 = vpop.f32.mrf.mxu2 }
  0xc0   : > { %v467_v51 = vpop.f32.mrf.mxu3 }
  0xc1   : > { %505 = vmax.xlane.f32.xlu0 %v504_v47  ;;  %487 = vmax.xlane.f32.xlu2 %v486_v48 }
  0xc2   : > { %478 = vmax.xlane.f32.xlu1 %v477_v50 }
 0x116   : > { %v472_v9 = vpop.xlane.xlu2 %471 }
 0x117   : > { %v507_v10 = vsub.f32 %v1126_v24, %v472_v9 }
 0x119   : > { %v519_v11 = vmul.f32 1.442695, %v507_v10 }
 0x11b   : > { %995 = vpow2.f32 %v519_v11 }
 0x11c   : > { %v491_v13 = vpop.xlane.xlu0 %490 }
 0x11d   : > { %v500_v14 = vpop.xlane.xlu1 %499  ;;  %v513_v15 = vsub.f32 %v1132_v27, %v491_v13 }
 0x11e   : > { %v516_v16 = vsub.f32 %v1134_v28, %v500_v14  ;;  %v475_v17 = vpop.xlane.xlu2 %474 }
 0x11f   : > { %v531_v18 = vmul.f32 1.442695, %v513_v15  ;;  %v508_v19 = vsub.f32 %v1140_v31, %v475_v17 }
 0x120   : > { %v537_v22 = vmul.f32 1.442695, %v516_v16 }
 0x121   : > { %v996_v20 = vpop.eup %995  ;;  %997 = vpow2.f32 %v531_v18  ;;  %v521_v21 = vmul.f32 1.442695, %v508_v19 }
 0x122   : > { %v543_v23 = vsel %vm469_vm1, %v996_v20, 0.0  ;;  %v579_v32 = vpack.c.bf16 %v996_v20, %v996_v20 }
 0x123   : > { %999 = vpow2.f32 %v521_v21  ;;  %544 = vadd.xlane.f32.xlu1 %v543_v23 }
 0x124   : > { %v494_v24 = vpop.xlane.xlu0 %493  ;;  %1001 = vpow2.f32 %v537_v22  ;;  %v594_v44 = vunpack.c.l.b16 %v579_v32 }
 0x125   : > { %v503_v25 = vpop.xlane.xlu1 %502  ;;  %v514_v29 = vsub.f32 %v1146_v34, %v494_v24 }
 0x126   : > { %v517_v27 = vsub.f32 %v1148_v35, %v503_v25 }
 0x127   : > { %v998_v28 = vpop.eup %997  ;;  %v533_v30 = vmul.f32 1.442695, %v514_v29 }
 0x128   : > { %v539_v36 = vmul.f32 1.442695, %v517_v27  ;;  %v561_v31 = vsel %vm469_vm1, %v998_v28, 0.0  ;;  %v585_v49 = vpack.c.bf16 %v998_v28, %v998_v28 }
 0x129   : > { %v1000_v37 = vpop.eup %999  ;;  %1003 = vpow2.f32 %v533_v30  ;;  %562 = vadd.xlane.f32.xlu2 %v561_v31 }
 0x12a   : > { %v580_v42 = vpack.c.bf16 %v1000_v37, %v1000_v37  ;;  %1005 = vpow2.f32 %v539_v36  ;;  %v1196_v43 = vpop.eup %1001 }
 0x12b   : > { %v588_v53 = vpack.c.bf16 %v1196_v43, %v1196_v43 }
 0x12c   : > { %v595_v45 = vunpack.c.l.b16 %v580_v42  ;;  %v482_v46 = vpop.xlane.xlu0 %481  ;;  %v497_v34 = vpop.xlane.xlu2 %496 }
 0x12d   : > { %v510_v47 = vsub.f32 %v1130_v26, %v482_v46  ;;  %v485_v35 = vpop.xlane.xlu1 %484  ;;  %v515_v48 = vsub.f32 %v1158_v40, %v497_v34  ;;  %v546_v26 = vsel %vm469_vm1, %v1000_v37, 0.0  ;;  %v729_v60 = vunpack.c.l.b16 %v588_v53 }
 0x12e   : > { %v511_v50 = vsub.f32 %v1144_v33, %v485_v35  ;;  %v597_v51 = vpack.c.b16 %v595_v45, %v594_v44  ;;  %v685_v33 = vunpack.c.l.b16 %v585_v49  ;;  %v570_v37 = vsel %vm469_vm1, %v1196_v43, 0.0 }
 0x12f   : > { %v1201_v52 = vpop.eup %1003  ;;  %v525_v54 = vmul.f32 1.442695, %v510_v47  ;;  %v535_v55 = vmul.f32 1.442695, %v515_v48 }
 0x130   : > { %v1006_v56 = vpop.eup %1005  ;;  %v586_v57 = vpack.c.bf16 %v1201_v52, %v1201_v52  ;;  %v527_v58 = vmul.f32 1.442695, %v511_v50  ;;  %946 = vmatmul.msk.bf16.vlgmr.msrb.gmra.mxu0 %vm469_vm1, %v597_v51  ;;  %v564_v46 = vsel %vm469_vm1, %v1201_v52, 0.0 }
 0x131   : > { %v589_v40 = vpack.c.bf16 %v1006_v56, %v1006_v56  ;;  %1007 = vpow2.f32 %v525_v54  ;;  %547 = vadd.xlane.f32.xlu2 %v546_v26  ;;  %v573_v24 = vsel %vm469_vm1, %v1006_v56, 0.0 }
 0x132   : > { %v686_v59 = vunpack.c.l.b16 %v586_v57  ;;  %1009 = vpow2.f32 %v527_v58 }
 0x133   : > { %v730_v61 = vunpack.c.l.b16 %v589_v40  ;;  %1011 = vpow2.f32 %v535_v55 }
 0x134   : > { %v506_v62 = vpop.xlane.xlu0 %505  ;;  %v488_v63 = vpop.xlane.xlu2 %487  ;;  %v688_v0 = vpack.c.b16 %v686_v59, %v685_v33 }
 0x135   : > { %v518_v1 = vsub.f32 %v1160_v41, %v506_v62  ;;  %v512_v2 = vsub.f32 %v1156_v39, %v488_v63  ;;  %v479_v3 = vpop.xlane.xlu1 %478  ;;  %v732_v4 = vpack.c.b16 %v730_v61, %v729_v60 }
 0x136   : > { %v509_v5 = vsub.f32 %v1154_v38, %v479_v3  ;;  %958 = vmatmul.msk.bf16.vlgmr.msrb.gmra.mxu2 %vm469_vm1, %v688_v0 }
 0x137   : > { %v1008_v6 = vpop.eup %1007  ;;  %v541_v7 = vmul.f32 1.442695, %v518_v1  ;;  %v529_v8 = vmul.f32 1.442695, %v512_v2  ;;  %964 = vmatmul.msk.bf16.vlgmr.msrb.gmra.mxu3 %vm469_vm1, %v732_v4 }
 0x138   : > { %v1010_v9 = vpop.eup %1009  ;;  %v582_v10 = vpack.c.bf16 %v1008_v6, %v1008_v6  ;;  %v523_v11 = vmul.f32 1.442695, %v509_v5  ;;  %v552_v12 = vsel %vm469_vm1, %v1008_v6, 0.0 }
 0x139   : > { %v1012_v13 = vpop.eup %1011  ;;  %v583_v41 = vpack.c.bf16 %v1010_v9, %v1010_v9  ;;  %1013 = vpow2.f32 %v541_v7  ;;  %553 = vadd.xlane.f32.xlu0 %v552_v12  ;;  %v555_v39 = vsel %vm469_vm1, %v1010_v9, 0.0 }
 0x13a   : > { %v641_v14 = vunpack.c.l.b16 %v582_v10  ;;  %1015 = vpow2.f32 %v529_v8  ;;  %v567_v38 = vsel %vm476_vm2, %v1012_v13, 0.0  ;;  %556 = vadd.xlane.f32.xlu1 %v555_v39  ;;  %v587_v16 = vpack.c.bf16 %v1012_v13, %v1012_v13 }
 0x13b   : > { %v642_v15 = vunpack.c.l.b16 %v583_v41  ;;  %1017 = vpow2.f32 %v523_v11  ;;  %568 = vadd.xlane.f32.xlu2 %v567_v38 }
 0x13c   : > { %v687_v20 = vunpack.c.l.b16 %v587_v16 }
 0x13d   : > { %v644_v17 = vpack.c.b16 %v642_v15, %v641_v14 }
 0x13e   : > { %v689_v30 = vpack.c.b16 %v687_v20, %v687_v20 }
 0x13f   : > { %v1014_v18 = vpop.eup %1013  ;;  %952 = vmatmul.msk.bf16.vlgmr.msrb.gmra.mxu1 %vm469_vm1, %v644_v17 }
 0x140   : > { %v1016_v19 = vpop.eup %1015  ;;  %v590_v21 = vpack.c.bf16 %v1014_v18, %v1014_v18  ;;  %v576_v44 = vsel %vm476_vm2, %v1014_v18, 0.0  ;;  %v812_v18 = vld [vmem:[%s1234_s26 + $0x8] sm:$0x1] }
 0x141   : > { %v1018_v22 = vpop.eup %1017  ;;  %v558_v23 = vsel %vm476_vm2, %v1016_v19, 0.0  ;;  %v584_v36 = vpack.c.bf16 %v1016_v19, %v1016_v19 }
 0x142   : > { %559 = vadd.xlane.f32.xlu1 %v558_v23  ;;  %v549_v25 = vsel %vm476_vm2, %v1018_v22, 0.0  ;;  %v581_v29 = vpack.c.bf16 %v1018_v22, %v1018_v22  ;;  %v731_v27 = vunpack.c.l.b16 %v590_v21 }
 0x143   : > { %574 = vadd.xlane.f32.xlu2 %v573_v24  ;;  %550 = vadd.xlane.f32.xlu0 %v549_v25  ;;  %v643_v42 = vunpack.c.l.b16 %v584_v36  ;;  %v827_v36 = vld [vmem:[%s1234_s26 + $0x2c] sm:$0x1] }
 0x144   : > { %v596_v28 = vunpack.c.l.b16 %v581_v29  ;;  %v733_v32 = vpack.c.b16 %v731_v27, %v731_v27  ;;  %v822_v27 = vld [vmem:[%s1234_s26 + $0x20] sm:$0x1] }
 0x145   : > { %v645_v45 = vpack.c.b16 %v643_v42, %v643_v42 }
 0x146   : > { %v598_v31 = vpack.c.b16 %v596_v28, %v596_v28  ;;  %959 = vmatmul.msk.bf16.gmra.mxu2 %vm469_vm1, %v689_v30 }
 0x147   : > { %965 = vmatmul.msk.bf16.gmra.mxu3 %vm469_vm1, %v733_v32 }
 0x148   : > { %947 = vmatmul.msk.bf16.gmra.mxu0 %vm469_vm1, %v598_v31 }
 0x14a   : > { %571 = vadd.xlane.f32.xlu1 %v570_v37 }
 0x14b   : > { %577 = vadd.xlane.f32.xlu0 %v576_v44 }
 0x14f   : > { %953 = vmatmul.msk.bf16.gmra.mxu1 %vm469_vm1, %v645_v45 }
 0x153   : > { %565 = vadd.xlane.f32.xlu0 %v564_v46 }
 0x196   : > { %v545_v47 = vpop.xlane.xlu1 %544 }
 0x197   : > { %1019 = vrcp.f32 %v545_v47  ;;  %v817_v47 = vld [vmem:[%s1234_s26 + $0x14] sm:$0x1] }
 0x19c   : > { %v563_v34 = vpop.xlane.xlu2 %562 }
 0x19d   : > { %v1020_v49 = vpop.eup %1019 }
 0x1a4   : > { %v548_v35 = vpop.xlane.xlu2 %547 }
 0x1a5   : > { %1021 = vrcp.f32 %v548_v35 }
 0x1a6   : > { %1023 = vrcp.f32 %v563_v34 }
 0x1ab   : > { %v1022_v54 = vpop.eup %1021 }
 0x1ac   : > { %v554_v48 = vpop.xlane.xlu0 %553  ;;  %v1024_v40 = vpop.eup %1023 }
 0x1ad   : > { %v557_v43 = vpop.xlane.xlu1 %556  ;;  %v629_v50 = vpop.f32.mrf.mxu0  ;;  %1025 = vrcp.f32 %v554_v48 }
 0x1ae   : > { %v782_v51 = vmul.f32 %v1020_v49, %v629_v50  ;;  %v569_v53 = vpop.xlane.xlu2 %568 }
 0x1b0   : > { %v794_v52 = vpack.c.bf16 %v782_v51, %v782_v51 }
 0x1b2   : > { %807 = vst.msk [vmem:[%s1234_s26] sm:$0xf] %vm806_vm4, %v794_v52 }
 0x1b3   : > { %v1026_v62 = vpop.eup %1025 }
 0x1b5   : > { %v560_v55 = vpop.xlane.xlu1 %559  ;;  %v631_v56 = vpop.f32.mrf.mxu0 }
 0x1b6   : > { %v551_v57 = vpop.xlane.xlu0 %550  ;;  %v783_v58 = vmul.f32 %v1022_v54, %v631_v56  ;;  %v575_v33 = vpop.xlane.xlu2 %574 }
 0x1b7   : > { %1027 = vrcp.f32 %v575_v33 }
 0x1b8   : > { %v795_v26 = vpack.c.bf16 %v783_v58, %v783_v58  ;;  %1029 = vrcp.f32 %v557_v43 }
 0x1b9   : > { %v717_v59 = vpop.f32.mrf.mxu2 }
 0x1ba   : > { %808 = vst.msk [vmem:[%s1234_s26 + $0x4] sm:$0xf] %vm806_vm4, %v795_v26  ;;  %v788_v60 = vmul.f32 %v1024_v40, %v717_v59  ;;  %v761_v61 = vpop.f32.mrf.mxu3 }
 0x1bc   : > { %v800_v63 = vpack.c.bf16 %v788_v60, %v788_v60  ;;  %v673_v0 = vpop.f32.mrf.mxu1 }
 0x1bd   : > { %v785_v1 = vmul.f32 %v1026_v62, %v673_v0  ;;  %v572_v2 = vpop.xlane.xlu1 %571  ;;  %v1028_v6 = vpop.eup %1027 }
 0x1be   : > { %820 = vst.msk [vmem:[%s1234_s26 + $0x18] sm:$0xf] %vm806_vm4, %v800_v63  ;;  %v578_v3 = vpop.xlane.xlu0 %577  ;;  %1031 = vrcp.f32 %v572_v2  ;;  %v1030_v8 = vpop.eup %1029 }
 0x1bf   : > { %1033 = vrcp.f32 %v551_v57  ;;  %v797_v4 = vpack.c.bf16 %v785_v1, %v785_v1 }
 0x1c0   : > { %1035 = vrcp.f32 %v569_v53 }
 0x1c1   : > { %815 = vst.msk [vmem:[%s1234_s26 + $0xc] sm:$0xf] %vm806_vm4, %v797_v4  ;;  %v719_v5 = vpop.f32.mrf.mxu2  ;;  %1037 = vrcp.f32 %v578_v3 }
 0x1c2   : > { %v763_v7 = vpop.f32.mrf.mxu3  ;;  %1039 = vrcp.f32 %v560_v55 }
 0x1c3   : > { %v792_v9 = vmul.f32 %v1028_v6, %v763_v7 }
 0x1c4   : > { %v1032_v10 = vpop.eup %1031  ;;  %v675_v11 = vpop.f32.mrf.mxu1 }
 0x1c5   : > { %v1034_v12 = vpop.eup %1033  ;;  %v791_v13 = vmul.f32 %v1032_v10, %v761_v61  ;;  %v804_v41 = vpack.c.bf16 %v792_v9, %v792_v9  ;;  %v634_v39 = vpop.f32.mrf.mxu0  ;;  %v786_v14 = vmul.f32 %v1030_v8, %v675_v11 }
 0x1c6   : > { %v784_v38 = vmul.f32 %v1034_v12, %v634_v39  ;;  %v566_v15 = vpop.xlane.xlu0 %565  ;;  %v1036_v21 = vpop.eup %1035 }
 0x1c7   : > { %v803_v16 = vpack.c.bf16 %v791_v13, %v791_v13  ;;  %826 = vst.msk [vmem:[%s1234_s26 + $0x28] sm:$0xf] %vm806_vm4, %v804_v41  ;;  %v798_v19 = vpack.c.bf16 %v786_v14, %v786_v14  ;;  %1041 = vrcp.f32 %v566_v15  ;;  %v1038_v23 = vpop.eup %1037 }
 0x1c8   : > { %v796_v20 = vpack.c.bf16 %v784_v38, %v784_v38  ;;  %v1040_v30 = vpop.eup %1039 }
 0x1c9   : > { %825 = vst.msk [vmem:[%s1234_s26 + $0x24] sm:$0xf] %vm806_vm4, %v803_v16  ;;  %v722_v22 = vpop.f32.mrf.mxu2 }
 0x1ca   : > { %v813_v24 = vsel %vm1246_vm7, %v796_v20, %v812_v18  ;;  %816 = vst.msk [vmem:[%s1234_s26 + $0x10] sm:$0xf] %vm806_vm4, %v798_v19  ;;  %v790_v25 = vmul.f32 %v1036_v21, %v722_v22  ;;  %v766_v29 = vpop.f32.mrf.mxu3 }
 0x1cb   : > { %814 = vst [vmem:[%s1234_s26 + $0x8] sm:$0x1] %v813_v24  ;;  %v793_v28 = vmul.f32 %v1038_v23, %v766_v29 }
 0x1cc   : > { %v802_v32 = vpack.c.bf16 %v790_v25, %v790_v25  ;;  %v678_v31 = vpop.f32.mrf.mxu1 }
 0x1cd   : > { %v1042_v37 = vpop.eup %1041  ;;  %v805_v42 = vpack.c.bf16 %v793_v28, %v793_v28  ;;  %v636_v44 = vpop.f32.mrf.mxu0  ;;  %v787_v45 = vmul.f32 %v1040_v30, %v678_v31 }
 0x1ce   : > { %v789_v46 = vmul.f32 %v1042_v37, %v719_v5  ;;  %v823_v34 = vsel %vm1246_vm7, %v802_v32, %v822_v27 }
 0x1cf   : > { %824 = vst [vmem:[%s1234_s26 + $0x20] sm:$0x1] %v823_v34  ;;  %v828_v35 = vsel %vm1246_vm7, %v805_v42, %v827_v36  ;;  %v799_v48 = vpack.c.bf16 %v787_v45, %v787_v45 }
 0x1d0   : > { %v801_v49 = vpack.c.bf16 %v789_v46, %v789_v46  ;;  %829 = vst [vmem:[%s1234_s26 + $0x2c] sm:$0x1] %v828_v35 }
 0x1d1   : > { %v818_v43 = vsel %vm1246_vm7, %v799_v48, %v817_v47  ;;  %v724_v50 = vpop.f32.mrf.mxu2 }
 0x1d2   : > { %821 = vst.msk [vmem:[%s1234_s26 + $0x1c] sm:$0xf] %vm806_vm4, %v801_v49  ;;  %v768_v51 = vpop.f32.mrf.mxu3 }
 0x1d3   : > { %819 = vst [vmem:[%s1234_s26 + $0x14] sm:$0x1] %v818_v43 }
 0x1d4   : > { %v680_v53 = vpop.f32.mrf.mxu1 }
 0x1d5 PF: > { %s13_s12 = sadd.s32 1, %s1049_s12  }
 0x1d6   : > { %p10_p4 = scmp.ge.s32.totalorder %s13_s12, 4  }
 0x1d8   :  { %12 = sbr.rel (!%p10_p4) target bundleno = 1 (0x1), region = 68 }

// kernel: _lambda_.18
= control target key start
LH: loop header
LB: loop body
LE: loop exit
PB: predicated region body
PF: predicated region fallthrough
CT: control target
= control target key end

     0   :  { %s1318_s18 = smov 0   ;;  %s1320_s19 = smov 0   ;;  %s1667_s0 = inlined_call_operand.vmem [shape: f32[40,128], index: 0, kind: input, shape index: {}]   ;;  %s1668_s1 = inlined_call_operand.vmem [shape: f32[1,128], index: 1, kind: input, shape index: {}]   ;;  %s1669_s2 = inlined_call_operand.vmem [shape: f32[1,128], index: 2, kind: input, shape index: {}]   ;;  %s1670_s3 = inlined_call_operand.vmem [shape: bf16[128,512], index: 3, kind: input, shape index: {}]   ;;  %s1671_s4 = inlined_call_operand.vmem [shape: f32[1,512], index: 4, kind: input, shape index: {}]   ;;  %s1672_s5 = inlined_call_operand.vmem [shape: bf16[40,512], index: 5, kind: output, shape index: {}]  }
   0x1   :  { %s1322_s20 = smov 0   ;;  %s1324_s21 = smov 0  }
   0x2   :  { %s1326_s22 = smov 0  }
   0x3 LB: > { %s24_s23 = sadd.s32 1, %s1281_s21  ;;  %s1028_s24 = sadd.s32 4294967295, %s1285_s22   ;;  %s1285_s22 = sphi %s1326_s22, %s15_s22   ;;  %s1281_s21 = sphi %s1324_s21, %s1687_s21   ;;  %s1277_s20 = sphi %s1322_s20, %s1686_s20   ;;  %s1273_s19 = sphi %s1320_s19, %s1685_s19   ;;  %s1269_s18 = sphi %s1318_s18, %s1684_s18  }
   0x4   : > { %p25_p0 = scmp.ge.s32.totalorder %s24_s23, 2  ;;  %p109_p1 = scmp.ne.s32.totalorder %s1273_s19, %s1269_s18 }
   0x5   : > { %p110_p2 = scmp.eq.s32.totalorder %s1285_s22, 0  ;;  %p167_p4 = scmp.eq.s32.totalorder %s1028_s24, 1 }
   0x6   : > { %s1689_s23 = smov (%p25_p0, %s24_s23), 0  ;;  %s102_s26 = sadd.s32 1, %s1273_s19 }
   0x7   : > { %p111_p3 = por %p110_p2, %p109_p1  ;;  %s99_s25 = ssub.s32 %s1281_s21, %s1689_s23 }
   0x8   : > { %p100_p5 = scmp.eq.s32.totalorder %s99_s25, 0  ;;  %p1353_p6 = por %p167_p4, %p109_p1 }
   0x9   : > { %p1032_p7 = scmp.ge.s32.totalorder %s1285_s22, 2 }
   0xa   : > { %s1358_s28 = scalar_select %p100_p5, %s1273_s19, %s102_s26  }
   0xb   : > { %204 = sbr.rel (%p1032_p7) target bundleno = 36 (0x24), region = 28 }
  0x10   : > { %207 = sbr.rel (!%p111_p3) target bundleno = 36 (0x24), region = 32  ;;  %s209_s29 = sand.u32 (%p111_p3), 1, %s1273_s19  }
  0x11   : > { %s1117_s30 = sshll.u32 (%p111_p3), %s1281_s21, 3  ;;  %s1033_s6 = sshll.u32 (%p111_p3), %s209_s29, 7 }
  0x12   : > { %s1366_s9 = scalar_lea.vmem (%p111_p3), %s1670_s3, %s1117_s30  ;;  %s211_s10 = scalar_lea.vmem (%p111_p3), [#allocation2], %s1033_s6 }
  0x13   : > { %v273_v0 = vld [vmem:[%s1366_s9] sm:$0xff] (%p111_p3)  ;;  %v275_v1 = vld [vmem:[%s1366_s9 + $0x10] sm:$0xff] (%p111_p3) }
  0x14   : > { %v277_v2 = vld [vmem:[%s1366_s9 + $0x20] sm:$0xff] (%p111_p3)  ;;  %274 = vst [vmem:[%s211_s10] sm:$0xff] (%p111_p3), %v273_v0  ;;  %v279_v3 = vld [vmem:[%s1366_s9 + $0x30] sm:$0xff] (%p111_p3) }
  0x15   : > { %276 = vst [vmem:[%s211_s10 + $0x8] sm:$0xff] %v275_v1  ;;  %v281_v4 = vld [vmem:[%s1366_s9 + $0x40] sm:$0xff]  ;;  %v283_v5 = vld [vmem:[%s1366_s9 + $0x50] sm:$0xff] }
  0x16   : > { %278 = vst [vmem:[%s211_s10 + $0x10] sm:$0xff] %v277_v2  ;;  %v285_v6 = vld [vmem:[%s1366_s9 + $0x60] sm:$0xff]  ;;  %v287_v7 = vld [vmem:[%s1366_s9 + $0x70] sm:$0xff] }
  0x17   : > { %280 = vst [vmem:[%s211_s10 + $0x18] sm:$0xff] %v279_v3  ;;  %v289_v8 = vld [vmem:[%s1366_s9 + $0x80] sm:$0xff]  ;;  %v291_v9 = vld [vmem:[%s1366_s9 + $0x90] sm:$0xff] }
  0x18   : > { %282 = vst [vmem:[%s211_s10 + $0x20] sm:$0xff] %v281_v4  ;;  %v293_v10 = vld [vmem:[%s1366_s9 + $0xa0] sm:$0xff]  ;;  %v295_v11 = vld [vmem:[%s1366_s9 + $0xb0] sm:$0xff] }
  0x19   : > { %284 = vst [vmem:[%s211_s10 + $0x28] sm:$0xff] %v283_v5  ;;  %v297_v12 = vld [vmem:[%s1366_s9 + $0xc0] sm:$0xff]  ;;  %v299_v13 = vld [vmem:[%s1366_s9 + $0xd0] sm:$0xff] }
  0x1a   : > { %286 = vst [vmem:[%s211_s10 + $0x30] sm:$0xff] %v285_v6  ;;  %v301_v14 = vld [vmem:[%s1366_s9 + $0xe0] sm:$0xff]  ;;  %v303_v15 = vld [vmem:[%s1366_s9 + $0xf0] sm:$0xff] }
  0x1b   : > { %288 = vst [vmem:[%s211_s10 + $0x38] sm:$0xff] %v287_v7 }
  0x1c   : > { %290 = vst [vmem:[%s211_s10 + $0x40] sm:$0xff] %v289_v8 }
  0x1d   : > { %292 = vst [vmem:[%s211_s10 + $0x48] sm:$0xff] %v291_v9 }
  0x1e   : > { %294 = vst [vmem:[%s211_s10 + $0x50] sm:$0xff] %v293_v10 }
  0x1f   : > { %296 = vst [vmem:[%s211_s10 + $0x58] sm:$0xff] %v295_v11 }
  0x20   : > { %298 = vst [vmem:[%s211_s10 + $0x60] sm:$0xff] %v297_v12 }
  0x21   : > { %300 = vst [vmem:[%s211_s10 + $0x68] sm:$0xff] %v299_v13 }
  0x22   : > { %302 = vst [vmem:[%s211_s10 + $0x70] sm:$0xff] %v301_v14 }
  0x23   : > { %304 = vst [vmem:[%s211_s10 + $0x78] sm:$0xff] %v303_v15 }
  0x24 PF: > { %p1036_p8 = scmp.ge.s32.totalorder %s1285_s22, 1  ;;  %p317_p9 = scmp.lt.s32.totalorder %s1285_s22, 3 }
  0x26   : > { %p318_p10 = pnand %p1036_p8, %p317_p9 }
  0x27   : > { %s324_s29 = sand.u32 (!%p318_p10), 1, %s1269_s18   ;;  %s1038_s11 = sshll.u32 (!%p318_p10), %s1277_s20, 1 }
  0x28   : > { %321 = sbr.rel (%p318_p10) target bundleno = 530 (0x212), region = 74  ;;  %s1037_s30 = sshll.u32 (!%p318_p10), %s324_s29, 7 }
  0x29   : > { %s1431_s6 = scalar_lea.vmem (!%p318_p10), [#allocation2], %s1037_s30  ;;  %p367_p11 = scmp.lt.s32.totalorder (!%p318_p10), %s1038_s11, 3 }
  0x2a   : > { %s1582_s15 = smul.u32 (!%p318_p10), 40, %s324_s29 }
  0x2c   : > { %s1613_s18 = scalar_lea.vmem (!%p318_p10), [#allocation3], %s1582_s15 }
  0x2d   : > { %v375_v16 = vld [vmem:[%s1667_s0 + $0x10] sm:$0xff]  ;;  %v373_v17 = vld [vmem:[%s1667_s0] sm:$0xff]  ;;  %v376_v19 = vld [vmem:[%s1667_s0 + $0x18] sm:$0xff]  ;;  %v1287_v21 = vmov 128.0   ;;  %s1691_s11 = smov (!%p367_p11, %s1038_s11), 3  ;;  %s1134_s16 = sshll.u32 (%p1353_p6), %s1277_s20, 3 }
  0x2e   : > { %382 = vadd.xlane.f32.xlu0 %v375_v16  ;;  %378 = vadd.xlane.f32.xlu1 %v373_v17  ;;  %v377_v18 = vld [vmem:[%s1667_s0 + $0x20] sm:$0xff]  ;;  %v374_v20 = vld [vmem:[%s1667_s0 + $0x8] sm:$0xff]  ;;  %1195 = vrcp.f32 %v1287_v21  ;;  %v1097_v48 = vld [vmem:[%s1431_s6 + $0x70] sm:$0xf]  ;;  %s369_s14 = scalar_lea.vmem %s1671_s4, %s1691_s11  ;;  %s886_s25 = scalar_lea.vmem (%p1353_p6), %s1672_s5, %s1134_s16 }
  0x2f   : > { %386 = vadd.xlane.f32.xlu2 %v377_v18  ;;  %v1133_v49 = vld [vmem:[%s1431_s6 + $0x74] sm:$0xf0]  ;;  %v1132_v50 = vld [vmem:[%s1431_s6 + $0x74] sm:$0xf]  ;;  %v1099_v52 = vld [vmem:[%s1431_s6 + $0x78] sm:$0xf0] }
  0x30   : > { %v1098_v51 = vor.u32 %v1133_v49, %v1097_v48  ;;  %v1102_v53 = vor.u32 %v1132_v50, %v1099_v52  ;;  %v1089_v54 = vld [vmem:[%s1431_s6 + $0x60] sm:$0xf]  ;;  %v1131_v55 = vld [vmem:[%s1431_s6 + $0x64] sm:$0xf0]  ;;  %v1130_v56 = vld [vmem:[%s1431_s6 + $0x64] sm:$0xf] }
  0x31   : > { %v1090_v57 = vor.u32 %v1131_v55, %v1089_v54  ;;  %v1091_v58 = vld [vmem:[%s1431_s6 + $0x68] sm:$0xf0]  ;;  %v1081_v60 = vld [vmem:[%s1431_s6 + $0x50] sm:$0xf]  ;;  %v1129_v61 = vld [vmem:[%s1431_s6 + $0x54] sm:$0xf0] }
  0x32   : > { %608 = vmatpush.bf16.msra.mxu0 %v1098_v51  ;;  %1135 = vmatpush.bf16.msra.mxu2 %v1098_v51  ;;  %v1094_v59 = vor.u32 %v1130_v56, %v1091_v58  ;;  %v1128_v62 = vld [vmem:[%s1431_s6 + $0x54] sm:$0xf]  ;;  %v1082_v63 = vor.u32 %v1129_v61, %v1081_v60  ;;  %v1083_v0 = vld [vmem:[%s1431_s6 + $0x58] sm:$0xf0]  ;;  %v1073_v2 = vld [vmem:[%s1431_s6 + $0x40] sm:$0xf] }
  0x33   : > { %631 = vmatpush.bf16.msra.mxu1 %v1102_v53  ;;  %1143 = vmatpush.bf16.msra.mxu3 %v1102_v53  ;;  %v1086_v1 = vor.u32 %v1128_v62, %v1083_v0  ;;  %v1127_v3 = vld [vmem:[%s1431_s6 + $0x44] sm:$0xf0]  ;;  %v1126_v4 = vld [vmem:[%s1431_s6 + $0x44] sm:$0xf]  ;;  %v1075_v6 = vld [vmem:[%s1431_s6 + $0x48] sm:$0xf0] }
  0x34   : > { %v1196_v22 = vpop.eup %1195  ;;  %v1074_v5 = vor.u32 %v1127_v3, %v1073_v2  ;;  %v1078_v7 = vor.u32 %v1126_v4, %v1075_v6  ;;  %v1065_v8 = vld [vmem:[%s1431_s6 + $0x30] sm:$0xf]  ;;  %v1125_v9 = vld [vmem:[%s1431_s6 + $0x34] sm:$0xf0]  ;;  %v1124_v10 = vld [vmem:[%s1431_s6 + $0x34] sm:$0xf] }
  0x35   : > { %v389_v23 = vmul.f32 128.0, %v1196_v22  ;;  %vm393_vm0 = vweird.f32 %v1196_v22  ;;  %v1066_v11 = vor.u32 %v1125_v9, %v1065_v8  ;;  %v1067_v12 = vld [vmem:[%s1431_s6 + $0x38] sm:$0xf0]  ;;  %v1057_v14 = vld [vmem:[%s1431_s6 + $0x20] sm:$0xf] }
  0x36   : > { %384 = vadd.xlane.f32.xlu0 %v376_v19  ;;  %380 = vadd.xlane.f32.xlu1 %v374_v20  ;;  %v1070_v13 = vor.u32 %v1124_v10, %v1067_v12  ;;  %v1123_v15 = vld [vmem:[%s1431_s6 + $0x24] sm:$0xf0]  ;;  %v1121_v21 = vld [vmem:[%s1431_s6 + $0x14] sm:$0xf0] }
  0x37   : > { %v390_v24 = vsub.f32 1.0, %v389_v23  ;;  %609 = vmatpush.bf16.msra.mxu0 %v1090_v57  ;;  %1136 = vmatpush.bf16.msra.mxu2 %v1090_v57 }
  0x38   : > { %632 = vmatpush.bf16.msra.mxu1 %v1094_v59  ;;  %1144 = vmatpush.bf16.msra.mxu3 %v1094_v59 }
  0x39   : > { %v391_v25 = vmul.f32 %v1196_v22, %v390_v24  ;;  %v1051_v24 = vld [vmem:[%s1431_s6 + $0x18] sm:$0xf0] }
  0x3b   : > { %v392_v26 = vadd.f32 %v1196_v22, %v391_v25  ;;  %610 = vmatpush.bf16.msra.mxu0 %v1082_v63  ;;  %1137 = vmatpush.bf16.msra.mxu2 %v1082_v63 }
  0x3c   : > { %633 = vmatpush.bf16.msra.mxu1 %v1086_v1  ;;  %1145 = vmatpush.bf16.msra.mxu3 %v1086_v1 }
  0x3d   : > { %v1401_v27 = vsel %vm393_vm0, %v1196_v22, %v392_v26  ;;  %v1120_v22 = vld [vmem:[%s1431_s6 + $0x14] sm:$0xf] }
  0x3f   : > { %611 = vmatpush.bf16.msra.mxu0 %v1074_v5  ;;  %1138 = vmatpush.bf16.msra.mxu2 %v1074_v5 }
  0x40   : > { %634 = vmatpush.bf16.msra.mxu1 %v1078_v7  ;;  %1146 = vmatpush.bf16.msra.mxu3 %v1078_v7 }
  0x43   : > { %612 = vmatpush.bf16.msra.mxu0 %v1066_v11  ;;  %1139 = vmatpush.bf16.msra.mxu2 %v1066_v11 }
  0x44   : > { %635 = vmatpush.bf16.msra.mxu1 %v1070_v13  ;;  %1147 = vmatpush.bf16.msra.mxu3 %v1070_v13 }
  0xa1   : > { %v383_v28 = vpop.xlane.xlu0 %382  ;;  %v379_v29 = vpop.xlane.xlu1 %378 }
  0xa2   : > { %v397_v30 = vmul.f32 %v1401_v27, %v383_v28  ;;  %v395_v31 = vmul.f32 %v1401_v27, %v379_v29  ;;  %v387_v36 = vpop.xlane.xlu2 %386  ;;  %v1054_v28 = vor.u32 %v1120_v22, %v1051_v24 }
  0xa3   : > { %v399_v43 = vmul.f32 %v1401_v27, %v387_v36 }
  0xa4   : > { %v1405_v32 = vsub.f32 %v375_v16, %v397_v30  ;;  %v1407_v33 = vsub.f32 %v373_v17, %v395_v31  ;;  %v1122_v16 = vld [vmem:[%s1431_s6 + $0x24] sm:$0xf]  ;;  %v1058_v17 = vor.u32 %v1123_v15, %v1057_v14  ;;  %v1041_v31 = vld [vmem:[%s1431_s6] sm:$0xf] }
  0xa5   : > { %v1424_v46 = vsub.f32 %v377_v18, %v399_v43  ;;  %v1059_v18 = vld [vmem:[%s1431_s6 + $0x28] sm:$0xf0]  ;;  %v1193_v14 = vld [vmem:[%s1668_s1] ss:$0 sm:$0xff] }
  0xa6   : > { %v407_v34 = vmul.f32 %v1405_v32, %v1405_v32  ;;  %v405_v35 = vmul.f32 %v1407_v33, %v1407_v33  ;;  %613 = vmatpush.bf16.msra.mxu0 %v1058_v17  ;;  %1140 = vmatpush.bf16.msra.mxu2 %v1058_v17 }
  0xa7   : > { %v409_v47 = vmul.f32 %v1424_v46, %v1424_v46 }
  0xa8   : > { %414 = vadd.xlane.f32.xlu2 %v407_v34  ;;  %410 = vadd.xlane.f32.xlu1 %v405_v35  ;;  %v1119_v34 = vld [vmem:[%s1431_s6 + $0x4] sm:$0xf0]  ;;  %v1118_v35 = vld [vmem:[%s1431_s6 + $0x4] sm:$0xf] }
  0xa9   : > { %v385_v37 = vpop.xlane.xlu0 %384  ;;  %v381_v38 = vpop.xlane.xlu1 %380 }
  0xaa   : > { %v398_v39 = vmul.f32 %v1401_v27, %v385_v37  ;;  %v396_v40 = vmul.f32 %v1401_v27, %v381_v38  ;;  %v1042_v38 = vor.u32 %v1119_v34, %v1041_v31 }
  0xac   : > { %v1415_v41 = vsub.f32 %v376_v19, %v398_v39  ;;  %v1417_v42 = vsub.f32 %v374_v20, %v396_v40  ;;  %v1062_v19 = vor.u32 %v1122_v16, %v1059_v18  ;;  %v1049_v20 = vld [vmem:[%s1431_s6 + $0x10] sm:$0xf]  ;;  %v1043_v39 = vld [vmem:[%s1431_s6 + $0x8] sm:$0xf0] }
  0xad   : > { %v1050_v23 = vor.u32 %v1121_v21, %v1049_v20  ;;  %v1046_v40 = vor.u32 %v1118_v35, %v1043_v39 }
  0xae   : > { %v408_v44 = vmul.f32 %v1415_v41, %v1415_v41  ;;  %v406_v45 = vmul.f32 %v1417_v42, %v1417_v42  ;;  %636 = vmatpush.bf16.msra.mxu1 %v1062_v19  ;;  %1148 = vmatpush.bf16.msra.mxu3 %v1062_v19 }
  0xaf   : > { %614 = vmatpush.bf16.msra.mxu0 %v1050_v23  ;;  %1141 = vmatpush.bf16.msra.mxu2 %v1050_v23  ;;  %v1194_v23 = vld [vmem:[%s1669_s2] ss:$0 sm:$0xff] }
  0xb0   : > { %416 = vadd.xlane.f32.xlu0 %v408_v44  ;;  %412 = vadd.xlane.f32.xlu2 %v406_v45 }
  0xb2   : > { %637 = vmatpush.bf16.msra.mxu1 %v1054_v28  ;;  %1149 = vmatpush.bf16.msra.mxu3 %v1054_v28 }
  0xb3   : > { %615 = vmatpush.bf16.msra.mxu0 %v1042_v38  ;;  %1142 = vmatpush.bf16.msra.mxu2 %v1042_v38 }
  0xb6   : > { %638 = vmatpush.bf16.msra.mxu1 %v1046_v40  ;;  %1150 = vmatpush.bf16.msra.mxu3 %v1046_v40 }
  0xb8   : > { %418 = vadd.xlane.f32.xlu0 %v409_v47 }
 0x11b   : > { %v415_v25 = vpop.xlane.xlu2 %414  ;;  %v411_v26 = vpop.xlane.xlu1 %410 }
 0x11c   : > { %v422_v29 = vmul.f32 %v415_v25, %v1401_v27  ;;  %v420_v30 = vmul.f32 %v411_v26, %v1401_v27 }
 0x11e   : > { %v427_v36 = vadd.f32 1e-05, %v422_v29  ;;  %v425_v37 = vadd.f32 1e-05, %v420_v30 }
 0x120   : > { %1197 = vrsqrt.f32 %v427_v36  ;;  %vm436_vm1 = vweird.f32 %v425_v37  ;;  %vm456_vm4 = vweird.f32 %v427_v36 }
 0x121   : > { %1199 = vrsqrt.f32 %v425_v37 }
 0x123   : > { %v417_v43 = vpop.xlane.xlu0 %416  ;;  %v413_v44 = vpop.xlane.xlu2 %412 }
 0x124   : > { %v423_v45 = vmul.f32 %v417_v43, %v1401_v27  ;;  %v421_v47 = vmul.f32 %v413_v44, %v1401_v27 }
 0x126   : > { %v1198_v48 = vpop.eup %1197  ;;  %v428_v49 = vadd.f32 1e-05, %v423_v45  ;;  %v426_v50 = vadd.f32 1e-05, %v421_v47  ;;  %v522_v45 = vld [vmem:[%s369_s14] sm:$0x3] }
 0x127   : > { %v1200_v51 = vpop.eup %1199  ;;  %v451_v52 = vmul.f32 %v1198_v48, %v427_v36  ;;  %vm457_vm3 = vweird.f32 %v1198_v48  ;;  %v1491_v47 = vperm.slane %v522_v45, 0 }
 0x128   : > { %v431_v53 = vmul.f32 %v1200_v51, %v425_v37  ;;  %1201 = vrsqrt.f32 %v428_v49  ;;  %vm437_vm2 = vweird.f32 %v1200_v51  ;;  %vm458_vm6 = vmor %vm456_vm4, %vm457_vm3  ;;  %vm446_vm7 = vweird.f32 %v426_v50 }
 0x129   : > { %v452_v54 = vmul.f32 %v1198_v48, %v451_v52  ;;  %1203 = vrsqrt.f32 %v426_v50  ;;  %vm1470_vm5 = vmor %vm436_vm1, %vm437_vm2  ;;  %vm466_vm10 = vweird.f32 %v428_v49 }
 0x12a   : > { %v432_v55 = vmul.f32 %v1200_v51, %v431_v53 }
 0x12b   : > { %v453_v56 = vmul.f32 0.5, %v452_v54  ;;  %v419_v57 = vpop.xlane.xlu0 %418 }
 0x12c   : > { %v433_v58 = vmul.f32 0.5, %v432_v55  ;;  %v424_v59 = vmul.f32 %v419_v57, %v1401_v27 }
 0x12d   : > { %v454_v60 = vsub.f32 1.5, %v453_v56 }
 0x12e   : > { %v1202_v61 = vpop.eup %1201  ;;  %v434_v62 = vsub.f32 1.5, %v433_v58  ;;  %v429_v63 = vadd.f32 1e-05, %v424_v59 }
 0x12f   : > { %v1204_v0 = vpop.eup %1203  ;;  %v455_v1 = vmul.f32 %v1198_v48, %v454_v60  ;;  %v461_v2 = vmul.f32 %v1202_v61, %v428_v49  ;;  %vm467_vm9 = vweird.f32 %v1202_v61 }
 0x130   : > { %v435_v3 = vmul.f32 %v1200_v51, %v434_v62  ;;  %v441_v4 = vmul.f32 %v1204_v0, %v426_v50  ;;  %1205 = vrsqrt.f32 %v429_v63  ;;  %vm447_vm8 = vweird.f32 %v1204_v0  ;;  %vm468_vm12 = vmor %vm466_vm10, %vm467_vm9 }
 0x131   : > { %v462_v6 = vmul.f32 %v1202_v61, %v461_v2  ;;  %v459_v8 = vsel %vm458_vm6, %v1198_v48, %v455_v1  ;;  %vm448_vm11 = vmor %vm446_vm7, %vm447_vm8  ;;  %vm476_vm13 = vweird.f32 %v429_v63  ;;  %v1493_v48 = vperm.slane %v522_v45, 1 }
 0x132   : > { %v442_v27 = vmul.f32 %v1204_v0, %v441_v4  ;;  %v439_v10 = vsel %vm1470_vm5, %v1200_v51, %v435_v3  ;;  %v482_v15 = vmul.f32 %v459_v8, %v1405_v32 }
 0x133   : > { %v463_v7 = vmul.f32 0.5, %v462_v6  ;;  %v480_v18 = vmul.f32 %v439_v10, %v1407_v33 }
 0x134   : > { %v443_v9 = vmul.f32 0.5, %v442_v27  ;;  %v491_v25 = vmul.f32 %v1193_v14, %v482_v15 }
 0x135   : > { %v464_v11 = vsub.f32 1.5, %v463_v7  ;;  %v489_v28 = vmul.f32 %v1193_v14, %v480_v18 }
 0x136   : > { %v1206_v12 = vpop.eup %1205  ;;  %v444_v13 = vsub.f32 1.5, %v443_v9  ;;  %v500_v31 = vadd.f32 %v1194_v23, %v491_v25 }
 0x137   : > { %v465_v16 = vmul.f32 %v1202_v61, %v464_v11  ;;  %v471_v17 = vmul.f32 %v1206_v12, %v429_v63  ;;  %vm477_vm14 = vweird.f32 %v1206_v12  ;;  %v498_v36 = vadd.f32 %v1194_v23, %v489_v28 }
 0x138   : > { %v445_v19 = vmul.f32 %v1204_v0, %v444_v13  ;;  %vm478_vm15 = vmor %vm476_vm13, %vm477_vm14 }
 0x139   : > { %v472_v20 = vmul.f32 %v1206_v12, %v471_v17  ;;  %v469_v21 = vsel %vm468_vm12, %v1202_v61, %v465_v16 }
 0x13a   : > { %v449_v22 = vsel %vm448_vm11, %v1204_v0, %v445_v19  ;;  %v483_v24 = vmul.f32 %v469_v21, %v1415_v41 }
 0x13b   : > { %v473_v26 = vmul.f32 0.5, %v472_v20  ;;  %v481_v32 = vmul.f32 %v449_v22, %v1417_v42 }
 0x13c   : > { %v492_v29 = vmul.f32 %v1193_v14, %v483_v24 }
 0x13d   : > { %v474_v30 = vsub.f32 1.5, %v473_v26  ;;  %v490_v33 = vmul.f32 %v1193_v14, %v481_v32 }
 0x13e   : > { %v501_v34 = vadd.f32 %v1194_v23, %v492_v29 }
 0x13f   : > { %v475_v35 = vmul.f32 %v1206_v12, %v474_v30  ;;  %v499_v37 = vadd.f32 %v1194_v23, %v490_v33 }
 0x140   : > { %v504_v38 = vpack.c.bf16 %v501_v34, %v500_v31 }
 0x141   : > { %v503_v39 = vpack.c.bf16 %v499_v37, %v498_v36  ;;  %v479_v41 = vsel %vm478_vm15, %v1206_v12, %v475_v35 }
 0x142   : > { %621 = vmatmul.bf16.vlgmr.msra.gmra.mxu2 %v504_v38  ;;  %644 = vmatmul.bf16.vlgmr.msra.gmra.mxu3 %v504_v38  ;;  %v484_v42 = vmul.f32 %v479_v41, %v1424_v46 }
 0x143   : > { %616 = vmatmul.bf16.vlgmr.msra.gmra.mxu0 %v503_v39  ;;  %639 = vmatmul.bf16.vlgmr.msra.gmra.mxu1 %v503_v39 }
 0x144   : > { %v493_v40 = vmul.f32 %v1193_v14, %v484_v42 }
 0x146   : > { %v502_v43 = vadd.f32 %v1194_v23, %v493_v40 }
 0x148   : > { %v505_v44 = vpack.c.bf16 %v502_v43, %v502_v43 }
 0x152   : > { %626 = vmatmul.bf16.gmra.mxu2 %v505_v44  ;;  %649 = vmatmul.bf16.gmra.mxu3 %v505_v44 }
 0x1c0   : > { %v617_v49 = vpop.f32.mrf.mxu0  ;;  %v640_v50 = vpop.f32.mrf.mxu1 }
 0x1c1   : > { %v1496_v46 = vadd.f32 %v617_v49, %v1491_v47  ;;  %v1499_v51 = vadd.f32 %v640_v50, %v1493_v48 }
 0x1c3   : > { %v1103_v52 = vmul.f32 -1.702, %v1496_v46  ;;  %v1104_v53 = vmul.f32 -1.702, %v1499_v51 }
 0x1c5   : > { %v674_v54 = vmul.f32 1.442695, %v1103_v52  ;;  %v676_v55 = vmul.f32 1.442695, %v1104_v53  ;;  %v622_v56 = vpop.f32.mrf.mxu2  ;;  %v645_v57 = vpop.f32.mrf.mxu3 }
 0x1c6   : > { %v1504_v58 = vadd.f32 %v622_v56, %v1491_v47  ;;  %v1507_v59 = vadd.f32 %v645_v57, %v1493_v48 }
 0x1c7   : > { %1207 = vpow2.f32 %v674_v54 }
 0x1c8   : > { %1209 = vpow2.f32 %v676_v55  ;;  %v1107_v60 = vmul.f32 -1.702, %v1504_v58  ;;  %v1108_v61 = vmul.f32 -1.702, %v1507_v59  ;;  %v619_v62 = vpop.f32.mrf.mxu0  ;;  %v642_v63 = vpop.f32.mrf.mxu1 }
 0x1c9   : > { %v1512_v0 = vadd.f32 %v619_v62, %v1491_v47  ;;  %v1515_v1 = vadd.f32 %v642_v63, %v1493_v48 }
 0x1ca   : > { %v682_v2 = vmul.f32 1.442695, %v1107_v60  ;;  %v684_v3 = vmul.f32 1.442695, %v1108_v61 }
 0x1cb   : > { %v1105_v4 = vmul.f32 -1.702, %v1512_v0  ;;  %v1106_v5 = vmul.f32 -1.702, %v1515_v1 }
 0x1cc   : > { %1211 = vpow2.f32 %v682_v2 }
 0x1cd   : > { %v1208_v6 = vpop.eup %1207  ;;  %1213 = vpow2.f32 %v684_v3  ;;  %v678_v27 = vmul.f32 1.442695, %v1105_v4  ;;  %v624_v7 = vpop.f32.mrf.mxu2  ;;  %v680_v11 = vmul.f32 1.442695, %v1106_v5 }
 0x1ce   : > { %v647_v8 = vpop.f32.mrf.mxu3  ;;  %v1210_v9 = vpop.eup %1209  ;;  %v1519_v10 = vadd.f32 1.0, %v1208_v6  ;;  %v1522_v12 = vadd.f32 %v624_v7, %v1491_v47 }
 0x1cf   : > { %v1524_v13 = vadd.f32 1.0, %v1210_v9  ;;  %1215 = vpow2.f32 %v678_v27  ;;  %v1538_v23 = vadd.f32 %v647_v8, %v1493_v48 }
 0x1d0   : > { %1217 = vrcp.f32 %v1519_v10  ;;  %v1109_v15 = vmul.f32 -1.702, %v1522_v12  ;;  %v713_v17 = vand.u32 2147483647, %v1519_v10  ;;  %v715_v18 = vand.u32 2147483648, %v1519_v10 }
 0x1d1   : > { %1219 = vrcp.f32 %v1524_v13  ;;  %v730_v19 = vand.u32 2147483648, %v1524_v13  ;;  %v728_v21 = vand.u32 2147483647, %v1524_v13  ;;  %vm709_vm0 = vweird.f32 %v1519_v10 }
 0x1d2   : > { %v1212_v14 = vpop.eup %1211  ;;  %1221 = vpow2.f32 %v680_v11  ;;  %vm724_vm1 = vweird.f32 %v1524_v13  ;;  %v686_v28 = vmul.f32 1.442695, %v1109_v15  ;;  %vm1545_vm2 = vcmp.eq.f32.partialorder %v713_v17, 8.507059e+37 }
 0x1d3   : > { %v1214_v16 = vpop.eup %1213  ;;  %v1532_v20 = vadd.f32 1.0, %v1212_v14  ;;  %v716_v31 = vor.u32 1.1754944e-38, %v715_v18  ;;  %v731_v34 = vor.u32 1.1754944e-38, %v730_v19  ;;  %vm1550_vm3 = vcmp.eq.f32.partialorder %v728_v21, 8.507059e+37 }
 0x1d4   : > { %v1535_v22 = vadd.f32 1.0, %v1214_v16  ;;  %v1110_v41 = vmul.f32 -1.702, %v1538_v23 }
 0x1d5   : > { %v1216_v24 = vpop.eup %1215  ;;  %1223 = vrcp.f32 %v1532_v20  ;;  %v627_v25 = vpop.f32.mrf.mxu2  ;;  %v773_v38 = vand.u32 2147483647, %v1532_v20  ;;  %v775_v39 = vand.u32 2147483648, %v1532_v20  ;;  %vm769_vm4 = vweird.f32 %v1532_v20 }
 0x1d6   : > { %v650_v26 = vpop.f32.mrf.mxu3  ;;  %v1218_v32 = vpop.eup %1217  ;;  %1225 = vrcp.f32 %v1535_v22  ;;  %v788_v40 = vand.u32 2147483647, %v1535_v22  ;;  %v790_v43 = vand.u32 2147483648, %v1535_v22  ;;  %v1559_v44 = vadd.f32 1.0, %v1216_v24 }
 0x1d7   : > { %v1220_v29 = vpop.eup %1219  ;;  %v705_v30 = vmul.f32 %v1218_v32, %v1519_v10  ;;  %1227 = vpow2.f32 %v686_v28  ;;  %vm710_vm5 = vweird.f32 %v1218_v32  ;;  %vm784_vm6 = vweird.f32 %v1535_v22 }
 0x1d8   : > { %v1222_v35 = vpop.eup %1221  ;;  %v720_v36 = vmul.f32 %v1220_v29, %v1524_v13  ;;  %1229 = vrcp.f32 %v1559_v44  ;;  %vm725_vm7 = vweird.f32 %v1220_v29  ;;  %vm1567_vm8 = vcmp.eq.f32.partialorder %v773_v38, 8.507059e+37  ;;  %vm711_vm10 = vmor %vm709_vm0, %vm710_vm5 }
 0x1d9   : > { %v706_v42 = vsub.f32 1.0, %v705_v30  ;;  %v1562_v49 = vadd.f32 1.0, %v1222_v35  ;;  %v776_v57 = vor.u32 1.1754944e-38, %v775_v39  ;;  %vm1572_vm9 = vcmp.eq.f32.partialorder %v788_v40, 8.507059e+37  ;;  %vm726_vm11 = vmor %vm724_vm1, %vm725_vm7 }
 0x1da   : > { %v721_v45 = vsub.f32 1.0, %v720_v36  ;;  %v791_v63 = vor.u32 1.1754944e-38, %v790_v43  ;;  %v688_v6 = vmul.f32 1.442695, %v1110_v41  ;;  %v1588_v8 = vadd.f32 %v627_v25, %v1491_v47 }
 0x1db   : > { %v1224_v50 = vpop.eup %1223  ;;  %v707_v52 = vmul.f32 %v1218_v32, %v706_v42  ;;  %1231 = vrcp.f32 %v1562_v49  ;;  %v1591_v9 = vadd.f32 %v650_v26, %v1493_v48  ;;  %v743_v21 = vand.u32 2147483647, %v1559_v44 }
 0x1dc   : > { %v1226_v53 = vpop.eup %1225  ;;  %v722_v54 = vmul.f32 %v1220_v29, %v721_v45  ;;  %v765_v55 = vmul.f32 %v1224_v50, %v1532_v20  ;;  %vm770_vm12 = vweird.f32 %v1224_v50  ;;  %v745_v25 = vand.u32 2147483648, %v1559_v44 }
 0x1dd   : > { %v708_v60 = vadd.f32 %v1218_v32, %v707_v52  ;;  %v780_v61 = vmul.f32 %v1226_v53, %v1535_v22  ;;  %v629_v2 = vpop.f32.mrf.mxu2  ;;  %v1228_v10 = vpop.eup %1227  ;;  %vm785_vm13 = vweird.f32 %v1226_v53  ;;  %vm771_vm14 = vmor %vm769_vm4, %vm770_vm12  ;;  %1233 = vpow2.f32 %v688_v6 }
 0x1de   : > { %v652_v3 = vpop.f32.mrf.mxu3  ;;  %v723_v4 = vadd.f32 %v1220_v29, %v722_v54  ;;  %v766_v5 = vsub.f32 1.0, %v765_v55  ;;  %v1230_v16 = vpop.eup %1229  ;;  %vm786_vm15 = vmor %vm784_vm6, %vm785_vm13  ;;  %vm739_vm1 = vweird.f32 %v1559_v44  ;;  %v746_v36 = vor.u32 1.1754944e-38, %v745_v25 }
 0x1df   : > { %v712_v27 = vsel %vm711_vm10, %v1218_v32, %v708_v60  ;;  %v781_v7 = vsub.f32 1.0, %v780_v61  ;;  %v735_v48 = vmul.f32 %v1230_v16, %v1559_v44  ;;  %vm740_vm0 = vweird.f32 %v1230_v16 }
 0x1e0   : > { %v717_v11 = vsel %vm1545_vm2, %v716_v31, %v712_v27  ;;  %v727_v14 = vsel %vm726_vm11, %v1220_v29, %v723_v4  ;;  %v767_v15 = vmul.f32 %v1224_v50, %v766_v5  ;;  %v1111_v29 = vmul.f32 -1.702, %v1588_v8  ;;  %vm741_vm2 = vmor %vm739_vm1, %vm740_vm0 }
 0x1e1   : > { %v854_v17 = vmul.f32 %v717_v11, %v1496_v46  ;;  %v732_v13 = vsel %vm1550_vm3, %v731_v34, %v727_v14  ;;  %v782_v18 = vmul.f32 %v1226_v53, %v781_v7  ;;  %v1604_v46 = vadd.f32 1.0, %v1228_v10  ;;  %v1232_v26 = vpop.eup %1231 }
 0x1e2   : > { %v855_v47 = vmul.f32 %v732_v13, %v1499_v51  ;;  %v768_v19 = vadd.f32 %v1224_v50, %v767_v15  ;;  %v736_v51 = vsub.f32 1.0, %v735_v48  ;;  %v750_v33 = vmul.f32 %v1232_v26, %v1562_v49 }
 0x1e3   : > { %v783_v24 = vadd.f32 %v1226_v53, %v782_v18  ;;  %1235 = vrcp.f32 %v1604_v46  ;;  %v760_v39 = vand.u32 2147483648, %v1562_v49  ;;  %v690_v41 = vmul.f32 1.442695, %v1111_v29 }
 0x1e4   : > { %v864_v32 = vpack.c.bf16 %v855_v47, %v854_v17  ;;  %v772_v28 = vsel %vm771_vm14, %v1224_v50, %v768_v19  ;;  %v737_v34 = vmul.f32 %v1230_v16, %v736_v51  ;;  %v751_v37 = vsub.f32 1.0, %v750_v33 }
 0x1e5   : > { %v777_v20 = vsel %vm1567_vm8, %v776_v57, %v772_v28  ;;  %v787_v30 = vsel %vm786_vm15, %v1226_v53, %v783_v24  ;;  %v1112_v42 = vmul.f32 -1.702, %v1591_v9  ;;  %vm755_vm3 = vweird.f32 %v1232_v26 }
 0x1e6   : > { %869 = vst [vmem:[%s1613_s18] sm:$0xff] %v864_v32  ;;  %v858_v31 = vmul.f32 %v777_v20, %v1504_v58  ;;  %v792_v22 = vsel %vm1572_vm9, %v791_v63, %v787_v30  ;;  %v738_v38 = vadd.f32 %v1230_v16, %v737_v34  ;;  %v1234_v58 = vpop.eup %1233  ;;  %v752_v43 = vmul.f32 %v1232_v26, %v751_v37 }
 0x1e7   : > { %v859_v35 = vmul.f32 %v792_v22, %v1507_v59  ;;  %v758_v45 = vand.u32 2147483647, %v1562_v49  ;;  %vm744_vm4 = vcmp.eq.f32.partialorder %v743_v21, 8.507059e+37  ;;  %v701_v44 = vadd.f32 1.0, %v1234_v58 }
 0x1e8   : > { %v742_v59 = vsel %vm741_vm2, %v1230_v16, %v738_v38  ;;  %1237 = vpow2.f32 %v690_v41  ;;  %v753_v52 = vadd.f32 %v1232_v26, %v752_v43  ;;  %vm754_vm5 = vweird.f32 %v1562_v49 }
 0x1e9   : > { %v866_v40 = vpack.c.bf16 %v859_v35, %v858_v31  ;;  %v747_v50 = vsel %vm744_vm4, %v746_v36, %v742_v59  ;;  %v692_v53 = vmul.f32 1.442695, %v1112_v42  ;;  %v1236_v54 = vpop.eup %1235  ;;  %vm756_vm6 = vmor %vm754_vm5, %vm755_vm3  ;;  %v761_v55 = vor.u32 1.1754944e-38, %v760_v39 }
 0x1ea   : > { %1239 = vrcp.f32 %v701_v44  ;;  %v856_v56 = vmul.f32 %v747_v50, %v1512_v0  ;;  %v757_v57 = vsel %vm756_vm6, %v1232_v26, %v753_v52  ;;  %vm759_vm7 = vcmp.eq.f32.partialorder %v758_v45, 8.507059e+37 }
 0x1eb   : > { %871 = vst [vmem:[%s1613_s18 + $0x10] sm:$0xff] %v866_v40  ;;  %v795_v60 = vmul.f32 %v1236_v54, %v1604_v46  ;;  %v762_v61 = vsel %vm759_vm7, %v761_v55, %v757_v57  ;;  %1241 = vpow2.f32 %v692_v53  ;;  %vm800_vm8 = vweird.f32 %v1236_v54 }
 0x1ec   : > { %v857_v62 = vmul.f32 %v762_v61, %v1515_v1  ;;  %v803_v6 = vand.u32 2147483647, %v1604_v46  ;;  %v805_v0 = vand.u32 2147483648, %v1604_v46  ;;  %vm799_vm9 = vweird.f32 %v1604_v46 }
 0x1ed   : > { %v796_v63 = vsub.f32 1.0, %v795_v60  ;;  %vm801_vm10 = vmor %vm799_vm9, %vm800_vm8  ;;  %v820_v16 = vand.u32 2147483648, %v701_v44  ;;  %v818_v13 = vand.u32 2147483647, %v701_v44  ;;  %vm814_vm13 = vweird.f32 %v701_v44  ;;  %v923_v45 = vld [vmem:[%s1613_s18] sm:$0xff] (%p1353_p6) }
 0x1ee   : > { %v1238_v2 = vpop.eup %1237  ;;  %v865_v3 = vpack.c.bf16 %v857_v62, %v856_v56  ;;  %vm804_vm11 = vcmp.eq.f32.partialorder %v803_v6, 8.507059e+37  ;;  %v806_v15 = vor.u32 1.1754944e-38, %v805_v0  ;;  %924 = vst [vmem:[%s886_s25] sm:$0xff] (%p1353_p6), %v923_v45 }
 0x1ef   : > { %v797_v49 = vmul.f32 %v1236_v54, %v796_v63  ;;  %v702_v4 = vadd.f32 1.0, %v1238_v2  ;;  %v821_v48 = vor.u32 1.1754944e-38, %v820_v16  ;;  %vm819_vm15 = vcmp.eq.f32.partialorder %v818_v13, 8.507059e+37 }
 0x1f0   : > { %v1240_v5 = vpop.eup %1239  ;;  %870 = vst [vmem:[%s1613_s18 + $0x8] sm:$0xff] %v865_v3 }
 0x1f1   : > { %v798_v27 = vadd.f32 %v1236_v54, %v797_v49  ;;  %v810_v7 = vmul.f32 %v1240_v5, %v701_v44  ;;  %1243 = vrcp.f32 %v702_v4  ;;  %v1242_v10 = vpop.eup %1241  ;;  %vm815_vm12 = vweird.f32 %v1240_v5 }
 0x1f2   : > { %v703_v14 = vadd.f32 1.0, %v1242_v10  ;;  %vm816_vm14 = vmor %vm814_vm13, %vm815_vm12  ;;  %v833_v51 = vand.u32 2147483647, %v702_v4  ;;  %v835_v29 = vand.u32 2147483648, %v702_v4  ;;  %vm829_vm1 = vweird.f32 %v702_v4 }
 0x1f3   : > { %v802_v1 = vsel %vm801_vm10, %v1236_v54, %v798_v27  ;;  %v811_v11 = vsub.f32 1.0, %v810_v7 }
 0x1f4   : > { %1245 = vrcp.f32 %v703_v14  ;;  %v807_v18 = vsel %vm804_vm11, %v806_v15, %v802_v1  ;;  %vm834_vm3 = vcmp.eq.f32.partialorder %v833_v51, 8.507059e+37  ;;  %v850_v34 = vand.u32 2147483648, %v703_v14 }
 0x1f5   : > { %v812_v17 = vmul.f32 %v1240_v5, %v811_v11  ;;  %v860_v24 = vmul.f32 %v807_v18, %v1522_v12  ;;  %v836_v12 = vor.u32 1.1754944e-38, %v835_v29  ;;  %v848_v37 = vand.u32 2147483647, %v703_v14 }
 0x1f6   : > { %vm844_vm5 = vweird.f32 %v703_v14  ;;  %v851_v39 = vor.u32 1.1754944e-38, %v850_v34 }
 0x1f7   : > { %v1244_v47 = vpop.eup %1243  ;;  %v813_v19 = vadd.f32 %v1240_v5, %v812_v17  ;;  %vm849_vm7 = vcmp.eq.f32.partialorder %v848_v37, 8.507059e+37  ;;  %v925_v59 = vld [vmem:[%s1613_s18 + $0x8] sm:$0xff] (%p1353_p6) }
 0x1f8   : > { %v825_v21 = vmul.f32 %v1244_v47, %v702_v4  ;;  %vm830_vm0 = vweird.f32 %v1244_v47  ;;  %926 = vst [vmem:[%s886_s25 + $0x10] sm:$0xff] (%p1353_p6), %v925_v59 }
 0x1f9   : > { %v817_v25 = vsel %vm816_vm14, %v1240_v5, %v813_v19  ;;  %vm831_vm2 = vmor %vm829_vm1, %vm830_vm0 }
 0x1fa   : > { %v822_v46 = vsel %vm819_vm15, %v821_v48, %v817_v25  ;;  %v826_v26 = vsub.f32 1.0, %v825_v21  ;;  %v1246_v32 = vpop.eup %1245 }
 0x1fb   : > { %v861_v28 = vmul.f32 %v822_v46, %v1538_v23  ;;  %v840_v30 = vmul.f32 %v1246_v32, %v703_v14  ;;  %vm845_vm4 = vweird.f32 %v1246_v32 }
 0x1fc   : > { %v827_v20 = vmul.f32 %v1244_v47, %v826_v26  ;;  %vm846_vm6 = vmor %vm844_vm5, %vm845_vm4 }
 0x1fd   : > { %v867_v33 = vpack.c.bf16 %v861_v28, %v860_v24  ;;  %v841_v22 = vsub.f32 1.0, %v840_v30 }
 0x1fe   : > { %v828_v31 = vadd.f32 %v1244_v47, %v827_v20 }
 0x1ff   : > { %872 = vst [vmem:[%s1613_s18 + $0x18] sm:$0xff] %v867_v33  ;;  %v842_v36 = vmul.f32 %v1246_v32, %v841_v22 }
 0x200   : > { %v832_v35 = vsel %vm831_vm2, %v1244_v47, %v828_v31 }
 0x201   : > { %v837_v23 = vsel %vm834_vm3, %v836_v12, %v832_v35  ;;  %v843_v38 = vadd.f32 %v1246_v32, %v842_v36 }
 0x202   : > { %v862_v41 = vmul.f32 %v837_v23, %v1588_v8  ;;  %v927_v8 = vld [vmem:[%s1613_s18 + $0x10] sm:$0xff] (%p1353_p6) }
 0x203   : > { %v847_v42 = vsel %vm846_vm6, %v1246_v32, %v843_v38  ;;  %928 = vst [vmem:[%s886_s25 + $0x20] sm:$0xff] (%p1353_p6), %v927_v8 }
 0x204   : > { %v852_v58 = vsel %vm849_vm7, %v851_v39, %v847_v42 }
 0x205   : > { %v863_v40 = vmul.f32 %v852_v58, %v1591_v9  ;;  %880 = sbr.rel (!%p1353_p6) target bundleno = 530 (0x212), region = 82 }
 0x206   : > { %v929_v9 = vld [vmem:[%s1613_s18 + $0x18] sm:$0xff] (%p1353_p6) }
 0x207   : > { %v868_v43 = vpack.c.bf16 %v863_v40, %v862_v41  ;;  %930 = vst [vmem:[%s886_s25 + $0x30] sm:$0xff] (%p1353_p6), %v929_v9 }
 0x209   : > { %873 = vst [vmem:[%s1613_s18 + $0x20] sm:$0xff] %v868_v43 }
 0x210   : > { %v931_v44 = vld [vmem:[%s1613_s18 + $0x20] sm:$0xff] }
 0x211   : > { %932 = vst [vmem:[%s886_s25 + $0x40] sm:$0xff] %v931_v44 }
 0x212 PF: > { %s15_s22 = sadd.s32 1, %s1285_s22   ;;  %s1684_s18 = smov %s1273_s19 }
 0x213   : > { %p12_p12 = scmp.ge.s32.totalorder %s15_s22, 4   ;;  %s1685_s19 = smov %s1358_s28 }
 0x214   : > { %s1686_s20 = smov %s1281_s21  ;;  %s1687_s21 = smov %s1689_s23 }
 0x215   :  { %14 = sbr.rel (!%p12_p12) target bundleno = 3 (0x3), region = 157 }

// kernel: _lambda_.25
= control target key start
LH: loop header
LB: loop body
LE: loop exit
PB: predicated region body
PF: predicated region fallthrough
CT: control target
= control target key end

     0   :  { %v64_v1 = vmov 128.0   ;;  %s97_s0 = inlined_call_operand.vmem [shape: f32[8,128], index: 0, kind: input, shape index: {}]   ;;  %s98_s1 = inlined_call_operand.vmem [shape: f32[1,128], index: 1, kind: input, shape index: {}]   ;;  %s99_s2 = inlined_call_operand.vmem [shape: f32[1,128], index: 2, kind: input, shape index: {}]   ;;  %s100_s3 = inlined_call_operand.vmem [shape: f32[8,128], index: 3, kind: output, shape index: {}]  }
   0x1   :  { %v14_v0 = vld [vmem:[%s97_s0] sm:$0xff]  ;;  %60 = vrcp.f32 %v64_v1 }
   0x2   :  { %15 = vadd.xlane.f32.xlu0 %v14_v0  ;;  %v58_v21 = vld [vmem:[%s98_s1] ss:$0 sm:$0xff] }
   0x3   :  { %v59_v23 = vld [vmem:[%s99_s2] ss:$0 sm:$0xff] }
   0x7   :  { %v61_v2 = vpop.eup %60 }
   0x8   :  { %v18_v3 = vmul.f32 128.0, %v61_v2  ;;  %vm22_vm0 = vweird.f32 %v61_v2 }
   0xa   :  { %v19_v4 = vsub.f32 1.0, %v18_v3 }
   0xc   :  { %v20_v5 = vmul.f32 %v61_v2, %v19_v4 }
   0xe   :  { %v21_v6 = vadd.f32 %v61_v2, %v20_v5 }
  0x10   :  { %v23_v7 = vsel %vm22_vm0, %v61_v2, %v21_v6 }
  0x75   :  { %v16_v8 = vpop.xlane.xlu0 %15 }
  0x76   :  { %v24_v9 = vmul.f32 %v23_v7, %v16_v8 }
  0x78   :  { %v25_v10 = vsub.f32 %v14_v0, %v24_v9 }
  0x7a   :  { %v26_v11 = vmul.f32 %v25_v10, %v25_v10 }
  0x7c   :  { %27 = vadd.xlane.f32.xlu0 %v26_v11 }
  0xef   :  { %v28_v12 = vpop.xlane.xlu0 %27 }
  0xf0   :  { %v29_v13 = vmul.f32 %v28_v12, %v23_v7 }
  0xf2   :  { %v30_v14 = vadd.f32 1e-05, %v29_v13 }
  0xf4   :  { %62 = vrsqrt.f32 %v30_v14  ;;  %vm37_vm2 = vweird.f32 %v30_v14 }
  0xfa   :  { %v63_v15 = vpop.eup %62 }
  0xfb   :  { %v32_v16 = vmul.f32 %v63_v15, %v30_v14  ;;  %vm38_vm1 = vweird.f32 %v63_v15 }
  0xfc   :  { %vm39_vm3 = vmor %vm37_vm2, %vm38_vm1 }
  0xfd   :  { %v33_v17 = vmul.f32 %v63_v15, %v32_v16 }
  0xff   :  { %v34_v18 = vmul.f32 0.5, %v33_v17 }
 0x101   :  { %v35_v19 = vsub.f32 1.5, %v34_v18 }
 0x103   :  { %v36_v20 = vmul.f32 %v63_v15, %v35_v19 }
 0x105   :  { %v40_v22 = vsel %vm39_vm3, %v63_v15, %v36_v20 }
 0x106   :  { %v41_v24 = vmul.f32 %v40_v22, %v25_v10 }
 0x108   :  { %v46_v25 = vmul.f32 %v58_v21, %v41_v24 }
 0x10a   :  { %v51_v26 = vadd.f32 %v59_v23, %v46_v25 }
 0x10c   :  { %52 = vst [vmem:[%s100_s3] sm:$0xff] %v51_v26 }

// kernel: _lambda_.19
= control target key start
LH: loop header
LB: loop body
LE: loop exit
PB: predicated region body
PF: predicated region fallthrough
CT: control target
= control target key end

     0   :  { %s898_s1 = inlined_call_operand.vmem [shape: bf16[512,128], index: 1, kind: input, shape index: {}]   ;;  %s899_s0 = inlined_call_operand.vmem [shape: bf16[40,512], index: 0, kind: input, shape index: {}]   ;;  %s900_s2 = inlined_call_operand.vmem [shape: f32[1,128], index: 2, kind: input, shape index: {}]   ;;  %s901_s3 = inlined_call_operand.vmem [shape: f32[40,128], index: 3, kind: input, shape index: {}]   ;;  %s902_s4 = inlined_call_operand.vmem [shape: f32[40,128], index: 4, kind: output, shape index: {}]  }
   0x1   :  { %v664_v0 = vld [vmem:[%s898_s1 + $0x38] sm:$0xff]  ;;  %v663_v4 = vld [vmem:[%s898_s1 + $0x30] sm:$0xff]  ;;  %v662_v8 = vld [vmem:[%s898_s1 + $0x28] sm:$0xff] }
   0x2   :  { %v672_v1 = vld [vmem:[%s898_s1 + $0x78] sm:$0xff]  ;;  %351 = vmatpush.bf16.msra.mxu0 %v664_v0  ;;  %v671_v5 = vld [vmem:[%s898_s1 + $0x70] sm:$0xff]  ;;  %v670_v9 = vld [vmem:[%s898_s1 + $0x68] sm:$0xff] }
   0x3   :  { %v680_v2 = vld [vmem:[%s898_s1 + $0xb8] sm:$0xff]  ;;  %374 = vmatpush.bf16.msra.mxu1 %v672_v1  ;;  %v679_v6 = vld [vmem:[%s898_s1 + $0xb0] sm:$0xff]  ;;  %v678_v10 = vld [vmem:[%s898_s1 + $0xa8] sm:$0xff] }
   0x4   :  { %v688_v3 = vld [vmem:[%s898_s1 + $0xf8] sm:$0xff]  ;;  %397 = vmatpush.bf16.msra.mxu2 %v680_v2  ;;  %v687_v7 = vld [vmem:[%s898_s1 + $0xf0] sm:$0xff]  ;;  %v686_v11 = vld [vmem:[%s898_s1 + $0xe8] sm:$0xff] }
   0x5   :  { %420 = vmatpush.bf16.msra.mxu3 %v688_v3  ;;  %v661_v12 = vld [vmem:[%s898_s1 + $0x20] sm:$0xff]  ;;  %v660_v16 = vld [vmem:[%s898_s1 + $0x18] sm:$0xff]  ;;  %v659_v20 = vld [vmem:[%s898_s1 + $0x10] sm:$0xff] }
   0x6   :  { %352 = vmatpush.bf16.msra.mxu0 %v663_v4  ;;  %v669_v13 = vld [vmem:[%s898_s1 + $0x60] sm:$0xff]  ;;  %v668_v17 = vld [vmem:[%s898_s1 + $0x58] sm:$0xff]  ;;  %v667_v21 = vld [vmem:[%s898_s1 + $0x50] sm:$0xff] }
   0x7   :  { %375 = vmatpush.bf16.msra.mxu1 %v671_v5  ;;  %v677_v14 = vld [vmem:[%s898_s1 + $0xa0] sm:$0xff]  ;;  %v676_v18 = vld [vmem:[%s898_s1 + $0x98] sm:$0xff]  ;;  %v675_v22 = vld [vmem:[%s898_s1 + $0x90] sm:$0xff] }
   0x8   :  { %398 = vmatpush.bf16.msra.mxu2 %v679_v6  ;;  %v685_v15 = vld [vmem:[%s898_s1 + $0xe0] sm:$0xff]  ;;  %v684_v19 = vld [vmem:[%s898_s1 + $0xd8] sm:$0xff]  ;;  %v683_v23 = vld [vmem:[%s898_s1 + $0xd0] sm:$0xff] }
   0x9   :  { %421 = vmatpush.bf16.msra.mxu3 %v687_v7  ;;  %v658_v24 = vld [vmem:[%s898_s1 + $0x8] sm:$0xff]  ;;  %v657_v28 = vld [vmem:[%s898_s1] sm:$0xff]  ;;  %v651_v33 = vld [vmem:[%s899_s0 + $0xc] sm:$0xf0] }
   0xa   :  { %353 = vmatpush.bf16.msra.mxu0 %v662_v8  ;;  %v666_v25 = vld [vmem:[%s898_s1 + $0x48] sm:$0xff]  ;;  %v665_v29 = vld [vmem:[%s898_s1 + $0x40] sm:$0xff]  ;;  %v493_v35 = vld [vmem:[%s899_s0 + $0x10] sm:$0xf0] }
   0xb   :  { %376 = vmatpush.bf16.msra.mxu1 %v670_v9  ;;  %v674_v26 = vld [vmem:[%s898_s1 + $0x88] sm:$0xff]  ;;  %v673_v30 = vld [vmem:[%s898_s1 + $0x80] sm:$0xff]  ;;  %v652_v37 = vld [vmem:[%s899_s0 + $0x14] sm:$0xf0] }
   0xc   :  { %399 = vmatpush.bf16.msra.mxu2 %v678_v10  ;;  %v682_v27 = vld [vmem:[%s898_s1 + $0xc8] sm:$0xff]  ;;  %v681_v31 = vld [vmem:[%s898_s1 + $0xc0] sm:$0xff]  ;;  %v501_v39 = vld [vmem:[%s899_s0 + $0x18] sm:$0xf0] }
   0xd   :  { %422 = vmatpush.bf16.msra.mxu3 %v686_v11  ;;  %v491_v32 = vld [vmem:[%s899_s0] sm:$0xf]  ;;  %v649_v34 = vld [vmem:[%s899_s0 + $0x4] sm:$0xf]  ;;  %v499_v36 = vld [vmem:[%s899_s0 + $0x8] sm:$0xf] }
   0xe   :  { %354 = vmatpush.bf16.msra.mxu0 %v661_v12  ;;  %v650_v38 = vld [vmem:[%s899_s0 + $0xc] sm:$0xf]  ;;  %v492_v40 = vor.u32 %v651_v33, %v491_v32  ;;  %v496_v41 = vor.u32 %v649_v34, %v493_v35  ;;  %v500_v42 = vor.u32 %v652_v37, %v499_v36  ;;  %v507_v44 = vld [vmem:[%s899_s0 + $0x20] sm:$0xf]  ;;  %v655_v45 = vld [vmem:[%s899_s0 + $0x2c] sm:$0xf0] }
   0xf   :  { %377 = vmatpush.bf16.msra.mxu1 %v669_v13  ;;  %v504_v43 = vor.u32 %v650_v38, %v501_v39  ;;  %v653_v46 = vld [vmem:[%s899_s0 + $0x24] sm:$0xf]  ;;  %v509_v47 = vld [vmem:[%s899_s0 + $0x30] sm:$0xf0]  ;;  %v515_v48 = vld [vmem:[%s899_s0 + $0x28] sm:$0xf]  ;;  %v508_v52 = vor.u32 %v655_v45, %v507_v44 }
  0x10   :  { %400 = vmatpush.bf16.msra.mxu2 %v677_v14  ;;  %v656_v49 = vld [vmem:[%s899_s0 + $0x34] sm:$0xf0]  ;;  %v654_v50 = vld [vmem:[%s899_s0 + $0x2c] sm:$0xf]  ;;  %v517_v51 = vld [vmem:[%s899_s0 + $0x38] sm:$0xf0]  ;;  %v512_v53 = vor.u32 %v653_v46, %v509_v47 }
  0x11   :  { %423 = vmatpush.bf16.msra.mxu3 %v685_v15  ;;  %v516_v54 = vor.u32 %v656_v49, %v515_v48  ;;  %v520_v55 = vor.u32 %v654_v50, %v517_v51  ;;  %v39_v56 = vld [vmem:[%s899_s0 + $0x40] sm:$0xff]  ;;  %v40_v57 = vld [vmem:[%s899_s0 + $0x48] sm:$0xff]  ;;  %v472_v32 = vld [vmem:[%s901_s3 + $0x10] sm:$0xff] }
  0x12   :  { %355 = vmatpush.bf16.msra.mxu0 %v660_v16  ;;  %v131_v58 = vunpack.c.l.b16 %v39_v56  ;;  %v132_v59 = vunpack.c.h.b16 %v39_v56  ;;  %v133_v60 = vunpack.c.l.b16 %v40_v57  ;;  %v134_v61 = vunpack.c.h.b16 %v40_v57  ;;  %v689_v8 = vld [vmem:[%s900_s2] ss:$0 sm:$0xff] }
  0x13   :  { %378 = vmatpush.bf16.msra.mxu1 %v668_v17  ;;  %v470_v12 = vld [vmem:[%s901_s3] sm:$0xff] }
  0x14   :  { %401 = vmatpush.bf16.msra.mxu2 %v676_v18  ;;  %v143_v62 = vpack.c.b16 %v131_v58, %v131_v58  ;;  %v144_v63 = vpack.c.b16 %v132_v59, %v132_v59  ;;  %v145_v0 = vpack.c.b16 %v133_v60, %v133_v60  ;;  %v146_v1 = vpack.c.b16 %v134_v61, %v134_v61 }
  0x15   :  { %424 = vmatpush.bf16.msra.mxu3 %v684_v19 }
  0x16   :  { %356 = vmatpush.bf16.msra.mxu0 %v659_v20 }
  0x17   :  { %379 = vmatpush.bf16.msra.mxu1 %v667_v21 }
  0x18   :  { %402 = vmatpush.bf16.msra.mxu2 %v675_v22  ;;  %v471_v22 = vld [vmem:[%s901_s3 + $0x8] sm:$0xff] }
  0x19   :  { %425 = vmatpush.bf16.msra.mxu3 %v683_v23 }
  0x1a   :  { %357 = vmatpush.bf16.msra.mxu0 %v658_v24 }
  0x1b   :  { %380 = vmatpush.bf16.msra.mxu1 %v666_v25 }
  0x1c   :  { %403 = vmatpush.bf16.msra.mxu2 %v674_v26 }
  0x1d   :  { %426 = vmatpush.bf16.msra.mxu3 %v682_v27 }
  0x1e   :  { %358 = vmatpush.bf16.msra.mxu0 %v657_v28 }
  0x1f   :  { %381 = vmatpush.bf16.msra.mxu1 %v665_v29 }
  0x20   :  { %404 = vmatpush.bf16.msra.mxu2 %v673_v30 }
  0x21   :  { %427 = vmatpush.bf16.msra.mxu3 %v681_v31  ;;  %359 = vmatmul.bf16.vlgmr.msra.gmra.mxu0 %v492_v40 }
  0x22   :  { %382 = vmatmul.bf16.vlgmr.msra.gmra.mxu1 %v496_v41 }
  0x23   :  { %405 = vmatmul.bf16.vlgmr.msra.gmra.mxu2 %v500_v42  ;;  %v473_v42 = vld [vmem:[%s901_s3 + $0x18] sm:$0xff] }
  0x24   :  { %428 = vmatmul.bf16.vlgmr.msra.gmra.mxu3 %v504_v43 }
  0x31   :  { %364 = vmatmul.bf16.gmra.mxu0 %v508_v52  ;;  %v474_v52 = vld [vmem:[%s901_s3 + $0x20] sm:$0xff] }
  0x32   :  { %387 = vmatmul.bf16.gmra.mxu1 %v512_v53 }
  0x33   :  { %410 = vmatmul.bf16.gmra.mxu2 %v516_v54 }
  0x34   :  { %433 = vmatmul.bf16.gmra.mxu3 %v520_v55 }
  0x41   :  { %369 = vmatmul.bf16.gmra.mxu0 %v143_v62 }
  0x42   :  { %392 = vmatmul.bf16.gmra.mxu1 %v144_v63 }
  0x43   :  { %415 = vmatmul.bf16.gmra.mxu2 %v145_v0 }
  0x44   :  { %438 = vmatmul.bf16.gmra.mxu3 %v146_v1 }
  0x9e   :  { %v360_v2 = vpop.f32.mrf.mxu0 }
  0x9f   :  { %v383_v3 = vpop.f32.mrf.mxu1 }
  0xa0   :  { %v384_v4 = vadd.f32 %v383_v3, %v360_v2 }
  0xa6   :  { %v406_v5 = vpop.f32.mrf.mxu2  ;;  %v362_v9 = vpop.f32.mrf.mxu0 }
  0xa7   :  { %v429_v6 = vpop.f32.mrf.mxu3  ;;  %v407_v7 = vadd.f32 %v406_v5, %v384_v4  ;;  %v385_v10 = vpop.f32.mrf.mxu1 }
  0xa8   :  { %v386_v15 = vadd.f32 %v385_v10, %v362_v9 }
  0xa9   :  { %v430_v11 = vadd.f32 %v429_v6, %v407_v7 }
  0xab   :  { %v465_v13 = vadd.f32 %v689_v8, %v430_v11 }
  0xad   :  { %v475_v14 = vadd.f32 %v470_v12, %v465_v13 }
  0xae   :  { %v408_v16 = vpop.f32.mrf.mxu2  ;;  %v365_v19 = vpop.f32.mrf.mxu0 }
  0xaf   :  { %v431_v17 = vpop.f32.mrf.mxu3  ;;  %480 = vst [vmem:[%s902_s4] sm:$0xff] %v475_v14  ;;  %v409_v18 = vadd.f32 %v408_v16, %v386_v15  ;;  %v388_v20 = vpop.f32.mrf.mxu1 }
  0xb0   :  { %v389_v24 = vadd.f32 %v388_v20, %v365_v19 }
  0xb1   :  { %v432_v21 = vadd.f32 %v431_v17, %v409_v18 }
  0xb3   :  { %v466_v23 = vadd.f32 %v689_v8, %v432_v21 }
  0xb5   :  { %v476_v25 = vadd.f32 %v471_v22, %v466_v23 }
  0xb6   :  { %v411_v26 = vpop.f32.mrf.mxu2  ;;  %v367_v29 = vpop.f32.mrf.mxu0 }
  0xb7   :  { %v434_v27 = vpop.f32.mrf.mxu3  ;;  %481 = vst [vmem:[%s902_s4 + $0x8] sm:$0xff] %v476_v25  ;;  %v412_v28 = vadd.f32 %v411_v26, %v389_v24  ;;  %v390_v30 = vpop.f32.mrf.mxu1 }
  0xb8   :  { %v391_v35 = vadd.f32 %v390_v30, %v367_v29 }
  0xb9   :  { %v435_v31 = vadd.f32 %v434_v27, %v412_v28 }
  0xbb   :  { %v467_v33 = vadd.f32 %v689_v8, %v435_v31 }
  0xbd   :  { %v477_v34 = vadd.f32 %v472_v32, %v467_v33 }
  0xbe   :  { %v413_v36 = vpop.f32.mrf.mxu2  ;;  %v370_v39 = vpop.f32.mrf.mxu0 }
  0xbf   :  { %v436_v37 = vpop.f32.mrf.mxu3  ;;  %482 = vst [vmem:[%s902_s4 + $0x10] sm:$0xff] %v477_v34  ;;  %v414_v38 = vadd.f32 %v413_v36, %v391_v35  ;;  %v393_v40 = vpop.f32.mrf.mxu1 }
  0xc0   :  { %v394_v44 = vadd.f32 %v393_v40, %v370_v39 }
  0xc1   :  { %v437_v41 = vadd.f32 %v436_v37, %v414_v38 }
  0xc3   :  { %v468_v43 = vadd.f32 %v689_v8, %v437_v41 }
  0xc5   :  { %v478_v45 = vadd.f32 %v473_v42, %v468_v43 }
  0xc6   :  { %v416_v46 = vpop.f32.mrf.mxu2  ;;  %v372_v49 = vpop.f32.mrf.mxu0 }
  0xc7   :  { %v439_v47 = vpop.f32.mrf.mxu3  ;;  %483 = vst [vmem:[%s902_s4 + $0x18] sm:$0xff] %v478_v45  ;;  %v417_v48 = vadd.f32 %v416_v46, %v394_v44  ;;  %v395_v50 = vpop.f32.mrf.mxu1 }
  0xc9   :  { %v440_v51 = vadd.f32 %v439_v47, %v417_v48 }
  0xcb   :  { %v469_v53 = vadd.f32 %v689_v8, %v440_v51 }
  0xcd   :  { %v479_v54 = vadd.f32 %v474_v52, %v469_v53 }
  0xce   :  { %v418_v55 = vpop.f32.mrf.mxu2 }
  0xcf   :  { %v441_v56 = vpop.f32.mrf.mxu3  ;;  %484 = vst [vmem:[%s902_s4 + $0x20] sm:$0xff] %v479_v54 }

</bundles_post_ra>
